<compile_context>
chip_gen: v6e
topology: v6e:2x2x1
jax: 0.10.0
libtpu: 0.0.40
codegen_flags: <defaults>
</compile_context>

<pallas_src>
import numpy as np

import jax
import jax.numpy as jnp
from jax.experimental import pallas as pl
from jax.experimental.pallas import tpu as pltpu


# --------------------- host-side constant-matrix builders --------------------
def _round_up(x, m):
    return ((x + m - 1) // m) * m


def _build_conv_tap_mats(kern_hwio, w_sp, c_major_in):
    """Banded matrices M[kh] with (x_row_padded[h+kh] @ M[kh]) summed over kh
    == 3x3 same-conv output row h, in folded (W*C) lane layout."""
    kern = np.asarray(kern_hwio, dtype=np.float32)          # (3, 3, Cin, Cout)
    kh_n, kw_n, cin, cout = kern.shape
    mats = np.zeros((kh_n, w_sp * cin, w_sp * cout), np.float32)
    for kh in range(kh_n):
        for w_out in range(w_sp):
            for kw in range(kw_n):
                w_in = w_out + kw - 1
                if 0 <= w_in < w_sp:
                    for ci in range(cin):
                        lane = ci * w_sp + w_in if c_major_in else w_in * cin + ci
                        mats[kh, lane, w_out * cout:(w_out + 1) * cout] = kern[kh, kw, ci, :]
    return mats


def _build_colpool_mats(w_sp, ch):
    """0/1 selection matrices picking even/odd folded columns (w-major lanes)."""
    sc = np.zeros((2, w_sp * ch, (w_sp // 2) * ch), np.float32)
    for w2 in range(w_sp // 2):
        for c in range(ch):
            sc[0, (2 * w2) * ch + c, w2 * ch + c] = 1.0
            sc[1, (2 * w2 + 1) * ch + c, w2 * ch + c] = 1.0
    return sc


def pack_forward_plan(in_size, pool_every, conv_params, lin_params):
    """Precompute all constant operands once, outside the kernel."""
    c0, h, w = in_size
    plan, packed = [], []
    scr_cols = 0
    first = True
    for idx, (wgt, bias) in enumerate(conv_params):
        cin, cout = wgt.shape[2], wgt.shape[3]
        taps = _build_conv_tap_mats(wgt, w, c_major_in=first)     # (3, w*cin, w*cout)
        fused = taps.reshape(3 * w * cin, w * cout)               # kh taps stacked on rows
        packed.append(jnp.asarray(fused))
        packed.append(jnp.asarray(
            np.tile(np.asarray(bias, np.float32), w).reshape(1, w * cout)))
        plan.append(("conv",))
        first = False
        if (idx + 1) % pool_every == 0:
            packed.append(jnp.asarray(_build_colpool_mats(w, cout)))
            plan.append(("pool",))
            scr_cols = max(scr_cols, w * cout)
            h //= 2
            w //= 2

    # Classifier: fold torch's NCHW flatten order into the (constant) weight,
    # pad hidden/output dims to 128 lanes with zero columns.
    cf = conv_params[-1][0].shape[3]
    scr_cols = max(scr_cols, w * cf)
    w1, b1 = lin_params[0]
    hid = w1.shape[1]
    hid_pad = _round_up(hid, 128)
    w1p = (np.asarray(w1, np.float32)
           .reshape(cf, h, w, hid).transpose(1, 2, 0, 3).reshape(h * w * cf, hid))
    w_big = np.zeros((h * w * cf, hid_pad), np.float32)
    w_big[:, :hid] = w1p
    b_big = np.zeros((1, hid_pad), np.float32)
    b_big[0, :hid] = np.asarray(b1, np.float32)
    packed.append(jnp.asarray(w_big))
    packed.append(jnp.asarray(b_big))
    plan.append(("flatten_linear", len(lin_params) > 1))

    prev_pad = hid_pad
    for i in range(1, len(lin_params)):
        wl, bl = lin_params[i]
        d_in, d_out = wl.shape
        out_p = _round_up(d_out, 128)
        wpad = np.zeros((prev_pad, out_p), np.float32)
        wpad[:d_in, :d_out] = np.asarray(wl, np.float32)
        bpad = np.zeros((1, out_p), np.float32)
        bpad[0, :d_out] = np.asarray(bl, np.float32)
        packed.append(jnp.asarray(wpad))
        packed.append(jnp.asarray(bpad))
        plan.append(("linear", i < len(lin_params) - 1))
        prev_pad = out_p

    meta = dict(h0=in_size[1], k_in0=c0 * in_size[2], scr_cols=scr_cols, out_pad=prev_pad)
    return plan, packed, meta


# ------------------------------ fused kernel ---------------------------------
def _make_fused_kernel(plan, n_const):
    def kernel(*refs):
        x_ref = refs[0]
        params = refs[1:1 + n_const]
        o_ref = refs[1 + n_const]
        scr = refs[2 + n_const]                     # VMEM scratch for row regrouping

        # Host pre-folded block: (B_TILE, H, C0*W), lane = c*W + w (channel-major).
        act = x_ref[...].astype(jnp.float32)
        pi = 0
        for stage in plan:
            kind = stage[0]
            if kind == "conv":
                m_ref, b_ref = params[pi], params[pi + 1]
                pi += 2
                bb, hh, kin = act.shape
                kout = m_ref.shape[1]
                zrow = jnp.zeros((bb, 1, kin), jnp.float32)
                xp = jnp.concatenate([zrow, act, zrow], axis=1)     # per-image H pad
                # Fuse the 3 kh taps along lanes -> one K = 3*W*Cin matmul.
                xcat = jnp.concatenate(
                    [xp[:, 0:hh, :], xp[:, 1:hh + 1, :], xp[:, 2:hh + 2, :]], axis=-1)
                y = jnp.dot(xcat.reshape(bb * hh, 3 * kin), m_ref[...],
                            preferred_element_type=jnp.float32)     # M = B_TILE*H
                y = jnp.maximum(y + b_ref[...], 0.0)                # bias + fused ReLU
                act = y.reshape(bb, hh, kout)
            elif kind == "pool":
                sc_ref = params[pi]
                pi += 1
                bb, hh, kk = act.shape
                bh = bb * hh
                # Row pairs: VPU max of even/odd rows via sublane-strided loads.
                scr[pl.ds(0, bh), pl.ds(0, kk)] = act.reshape(bh, kk)
                rows = jnp.maximum(scr[pl.ds(0, bh // 2, 2), pl.ds(0, kk)],
                                   scr[pl.ds(1, bh // 2, 2), pl.ds(0, kk)])
                # Column pairs: max of two 0/1-selection matmuls (stays on MXU).
                pooled = jnp.maximum(
                    jnp.dot(rows, sc_ref[0], preferred_element_type=jnp.float32),
                    jnp.dot(rows, sc_ref[1], preferred_element_type=jnp.float32))
                act = pooled.reshape(bb, hh // 2, kk // 2)
            elif kind == "flatten_linear":
                relu = stage[1]
                w_ref, b_ref = params[pi], params[pi + 1]
                pi += 2
                bb, hh, kk = act.shape
                # Regroup (B*Hf, Wf*Cf) -> (B, Hf*Wf*Cf) with strided row loads,
                # then one K = Hf*Wf*Cf matmul (flatten folded into the weight).
                scr[pl.ds(0, bb * hh), pl.ds(0, kk)] = act.reshape(bb * hh, kk)
                flat = jnp.concatenate(
                    [scr[pl.ds(r, bb, hh), pl.ds(0, kk)] for r in range(hh)], axis=-1)
                y = jnp.dot(flat, w_ref[...],
                            preferred_element_type=jnp.float32) + b_ref[...]
                act = jnp.maximum(y, 0.0) if relu else y
            else:  # "linear"
                relu = stage[1]
                w_ref, b_ref = params[pi], params[pi + 1]
                pi += 2
                y = jnp.dot(act, w_ref[...],
                            preferred_element_type=jnp.float32) + b_ref[...]
                act = jnp.maximum(y, 0.0) if relu else y

        o_ref[...] = act.astype(o_ref.dtype)        # lane-dense (B_TILE, 128) store
    return kernel


def _const_map(ndim):
    zeros = (0,) * ndim
    return lambda g: zeros


def forward(x_nchw, plan, packed, meta, out_classes, b_tile=16):
    n, c0, h, w = x_nchw.shape
    n_pad = _round_up(n, b_tile)
    # Host-side one-time relayout: NCHW -> (N, H, C*W), lane = c*W + w.
    xf = jnp.transpose(x_nchw, (0, 2, 1, 3)).reshape(n, h, c0 * w).astype(jnp.float32)
    if n_pad != n:
        xf = jnp.pad(xf, ((0, n_pad - n), (0, 0), (0, 0)))

    out_pad = meta["out_pad"]
    kernel = _make_fused_kernel(plan, n_const=len(packed))
    in_specs = [pl.BlockSpec((b_tile, h, c0 * w), lambda g: (g, 0, 0))]
    for arr in packed:
        in_specs.append(pl.BlockSpec(arr.shape, _const_map(arr.ndim)))

    out = pl.pallas_call(
        kernel,
        out_shape=jax.ShapeDtypeStruct((n_pad, out_pad), jnp.float32),
        grid=(n_pad // b_tile,),                 # B_TILE images per step
        in_specs=in_specs,
        out_specs=pl.BlockSpec((b_tile, out_pad), lambda g: (g, 0)),
        scratch_shapes=[pltpu.VMEM((b_tile * meta["h0"], meta["scr_cols"]),
                                   jnp.float32)],
        compiler_params=pltpu.CompilerParams(
            dimension_semantics=("parallel",),
            vmem_limit_bytes=32 * 1024 * 1024),
    )(xf, *packed)
    return out[:n, :out_classes]


# ------------------------------ Parameter init -------------------------------
def init_params(key, in_size, out_classes, filters, pool_every, hidden_dims):
    """Deterministic synthetic init mirroring the PyTorch layer shapes."""
    C, H, W = in_size
    chans = [C] + list(filters)
    N, P = len(filters), pool_every
    conv_params = []
    h, w = H, W
    k = key
    for i in range(N // P):
        for j in range(P):
            cin, cout = chans[i * P + j], chans[i * P + j + 1]
            k, k1, k2 = jax.random.split(k, 3)
            bound = 1.0 / float(jnp.sqrt(cin * 9))
            wgt = jax.random.uniform(k1, (3, 3, cin, cout), jnp.float32,
                                     -bound, bound)          # HWIO
            bias = jax.random.uniform(k2, (cout,), jnp.float32, -bound, bound)
            conv_params.append((wgt, bias))
        h //= 2
        w //= 2
    feat_dim = filters[-1] * h * w
    dims = [feat_dim] + list(hidden_dims) + [out_classes]
    lin_params = []
    for i in range(len(dims) - 1):
        k, k1, k2 = jax.random.split(k, 3)
        bound = 1.0 / float(jnp.sqrt(dims[i]))
        wgt = jax.random.uniform(k1, (dims[i], dims[i + 1]), jnp.float32,
                                 -bound, bound)
        bias = jax.random.uniform(k2, (dims[i + 1],), jnp.float32,
                                  -bound, bound)
        lin_params.append((wgt, bias))
    return conv_params, lin_params


# ------------------------------ Pure-JAX reference ---------------------------
def reference_forward(x_nchw, conv_params, lin_params, pool_every):
    """Semantics identical to the PyTorch module (NCHW)."""
    x = x_nchw
    for idx, (wgt, bias) in enumerate(conv_params):
        w_oihw = jnp.transpose(wgt, (3, 2, 0, 1))
        x = jax.lax.conv_general_dilated(
            x, w_oihw, window_strides=(1, 1), padding=((1, 1), (1, 1)),
            dimension_numbers=("NCHW", "OIHW", "NCHW"))
        x = jax.nn.relu(x + bias[None, :, None, None])
        if (idx + 1) % pool_every == 0:
            x = jax.lax.reduce_window(x, -jnp.inf, jax.lax.max,
                                      (1, 1, 2, 2), (1, 1, 2, 2), "VALID")
    x = x.reshape(x.shape[0], -1)
    for i, (wgt, bias) in enumerate(lin_params):
        x = x @ wgt + bias
        if i < len(lin_params) - 1:
            x = jax.nn.relu(x)
    return x


# ----------------------------------- Main ------------------------------------
if __name__ == "__main__":
    in_size = (4, 16, 16)
    out_classes = 10
    filters = [8, 8]
    pool_every = 2
    hidden_dims = [32]
    batch = 32          # 2 grid steps of B_TILE=16 -> M=256 matmuls, 2 TCs busy
    b_tile = 16

    key = jax.random.PRNGKey(0)
    kp, kx = jax.random.split(key)
    conv_params, lin_params = init_params(
        kp, in_size, out_classes, filters, pool_every, hidden_dims)
    x = jax.random.normal(kx, (batch,) + in_size, jnp.float32)  # NCHW like torch

    plan, packed, meta = pack_forward_plan(in_size, pool_every, conv_params, lin_params)
    out = forward(x, plan, packed, meta, out_classes, b_tile=b_tile)
    out = jax.block_until_ready(out)

    ref = reference_forward(x, conv_params, lin_params, pool_every)
    assert out.shape == (batch, out_classes), out.shape
    max_err = float(jnp.max(jnp.abs(out - ref)))
    assert max_err < 1e-3, f"mismatch vs reference, max_err={max_err}"
    print("KERNEL_OK")
</pallas_src>

<mosaic_0001>
module attributes {stable_mosaic.version = 11 : i64} {
  func.func @kernel(%arg0: i32, %arg1: memref<16x16x64xf32, #tpu.memory_space<vmem>>, %arg2: memref<192x128xf32, #tpu.memory_space<vmem>>, %arg3: memref<1x128xf32, #tpu.memory_space<vmem>>, %arg4: memref<384x128xf32, #tpu.memory_space<vmem>>, %arg5: memref<1x128xf32, #tpu.memory_space<vmem>>, %arg6: memref<2x128x64xf32, #tpu.memory_space<vmem>>, %arg7: memref<512x128xf32, #tpu.memory_space<vmem>>, %arg8: memref<1x128xf32, #tpu.memory_space<vmem>>, %arg9: memref<128x128xf32, #tpu.memory_space<vmem>>, %arg10: memref<1x128xf32, #tpu.memory_space<vmem>>, %arg11: memref<16x128xf32, #tpu.memory_space<vmem>>, %arg12: memref<256x128xf32, #tpu.memory_space<vmem>>) attributes {dimension_semantics = [#tpu.dimension_semantics<parallel>], iteration_bounds = array<i64: 2>, scalar_prefetch = 0 : i64, scratch_operands = 1 : i64, tpu.core_type = #tpu.core_type<tc>, window_params = [{transform_indices = @transform_0, window_bounds = array<i64: 16, 16, 64>}, {pipeline_mode = #tpu.pipeline_mode<synchronous>, transform_indices = @transform_1, window_bounds = array<i64: 192, 128>}, {pipeline_mode = #tpu.pipeline_mode<synchronous>, transform_indices = @transform_2, window_bounds = array<i64: 1, 128>}, {pipeline_mode = #tpu.pipeline_mode<synchronous>, transform_indices = @transform_3, window_bounds = array<i64: 384, 128>}, {pipeline_mode = #tpu.pipeline_mode<synchronous>, transform_indices = @transform_4, window_bounds = array<i64: 1, 128>}, {pipeline_mode = #tpu.pipeline_mode<synchronous>, transform_indices = @transform_5, window_bounds = array<i64: 2, 128, 64>}, {pipeline_mode = #tpu.pipeline_mode<synchronous>, transform_indices = @transform_6, window_bounds = array<i64: 512, 128>}, {pipeline_mode = #tpu.pipeline_mode<synchronous>, transform_indices = @transform_7, window_bounds = array<i64: 1, 128>}, {pipeline_mode = #tpu.pipeline_mode<synchronous>, transform_indices = @transform_8, window_bounds = array<i64: 128, 128>}, {pipeline_mode = #tpu.pipeline_mode<synchronous>, transform_indices = @transform_9, window_bounds = array<i64: 1, 128>}, {transform_indices = @transform_10, window_bounds = array<i64: 16, 128>}]} {
    %c0 = arith.constant 0 : index
    %c0_0 = arith.constant 0 : index
    %c0_1 = arith.constant 0 : index
    %0 = vector.load %arg1[%c0, %c0_0, %c0_1] : memref<16x16x64xf32, #tpu.memory_space<vmem>>, vector<16x16x64xf32>
    %cst = arith.constant 0.000000e+00 : f32
    %1 = vector.broadcast %cst : f32 to vector<16x1x64xf32>
    %2 = tpu.concatenate %1, %0, %1 in 1 : vector<16x1x64xf32>, vector<16x16x64xf32>, vector<16x1x64xf32> -> vector<16x18x64xf32>
    %3 = vector.extract_strided_slice %2 {offsets = [0, 0, 0], sizes = [16, 16, 64], strides = [1, 1, 1]} : vector<16x18x64xf32> to vector<16x16x64xf32>
    %4 = vector.extract_strided_slice %2 {offsets = [0, 1, 0], sizes = [16, 16, 64], strides = [1, 1, 1]} : vector<16x18x64xf32> to vector<16x16x64xf32>
    %5 = vector.extract_strided_slice %2 {offsets = [0, 2, 0], sizes = [16, 16, 64], strides = [1, 1, 1]} : vector<16x18x64xf32> to vector<16x16x64xf32>
    %6 = tpu.concatenate %3, %4, %5 in 2 : vector<16x16x64xf32>, vector<16x16x64xf32>, vector<16x16x64xf32> -> vector<16x16x192xf32>
    %7 = vector.shape_cast %6 : vector<16x16x192xf32> to vector<256x192xf32>
    %c0_2 = arith.constant 0 : index
    %c0_3 = arith.constant 0 : index
    %8 = vector.load %arg2[%c0_2, %c0_3] : memref<192x128xf32, #tpu.memory_space<vmem>>, vector<192x128xf32>
    %cst_4 = arith.constant dense<0.000000e+00> : vector<256x128xf32>
    %9 = tpu.matmul %7, %8, %cst_4 {dimension_numbers = #tpu.dot_dimension_numbers<[1], [0], [0], [1], [0, 0, 1, 1], [], []>} : vector<256x192xf32>, vector<192x128xf32>, vector<256x128xf32> -> vector<256x128xf32>
    %c0_5 = arith.constant 0 : index
    %c0_6 = arith.constant 0 : index
    %10 = vector.load %arg3[%c0_5, %c0_6] : memref<1x128xf32, #tpu.memory_space<vmem>>, vector<1x128xf32>
    %11 = vector.broadcast %10 : vector<1x128xf32> to vector<256x128xf32>
    %12 = arith.addf %9, %11 : vector<256x128xf32>
    %cst_7 = arith.constant 0.000000e+00 : f32
    %13 = vector.broadcast %cst_7 : f32 to vector<256x128xf32>
    %14 = arith.maximumf %12, %13 : vector<256x128xf32>
    %15 = vector.shape_cast %14 : vector<256x128xf32> to vector<16x16x128xf32>
    %cst_8 = arith.constant 0.000000e+00 : f32
    %16 = vector.broadcast %cst_8 : f32 to vector<16x1x128xf32>
    %17 = tpu.concatenate %16, %15, %16 in 1 : vector<16x1x128xf32>, vector<16x16x128xf32>, vector<16x1x128xf32> -> vector<16x18x128xf32>
    %18 = vector.extract_strided_slice %17 {offsets = [0, 0, 0], sizes = [16, 16, 128], strides = [1, 1, 1]} : vector<16x18x128xf32> to vector<16x16x128xf32>
    %19 = vector.extract_strided_slice %17 {offsets = [0, 1, 0], sizes = [16, 16, 128], strides = [1, 1, 1]} : vector<16x18x128xf32> to vector<16x16x128xf32>
    %20 = vector.extract_strided_slice %17 {offsets = [0, 2, 0], sizes = [16, 16, 128], strides = [1, 1, 1]} : vector<16x18x128xf32> to vector<16x16x128xf32>
    %21 = tpu.concatenate %18, %19, %20 in 2 : vector<16x16x128xf32>, vector<16x16x128xf32>, vector<16x16x128xf32> -> vector<16x16x384xf32>
    %22 = vector.shape_cast %21 : vector<16x16x384xf32> to vector<256x384xf32>
    %c0_9 = arith.constant 0 : index
    %c0_10 = arith.constant 0 : index
    %23 = vector.load %arg4[%c0_9, %c0_10] : memref<384x128xf32, #tpu.memory_space<vmem>>, vector<384x128xf32>
    %cst_11 = arith.constant dense<0.000000e+00> : vector<256x128xf32>
    %24 = tpu.matmul %22, %23, %cst_11 {dimension_numbers = #tpu.dot_dimension_numbers<[1], [0], [0], [1], [0, 0, 1, 1], [], []>} : vector<256x384xf32>, vector<384x128xf32>, vector<256x128xf32> -> vector<256x128xf32>
    %c0_12 = arith.constant 0 : index
    %c0_13 = arith.constant 0 : index
    %25 = vector.load %arg5[%c0_12, %c0_13] : memref<1x128xf32, #tpu.memory_space<vmem>>, vector<1x128xf32>
    %26 = vector.broadcast %25 : vector<1x128xf32> to vector<256x128xf32>
    %27 = arith.addf %24, %26 : vector<256x128xf32>
    %cst_14 = arith.constant 0.000000e+00 : f32
    %28 = vector.broadcast %cst_14 : f32 to vector<256x128xf32>
    %29 = arith.maximumf %27, %28 : vector<256x128xf32>
    %30 = vector.shape_cast %29 : vector<256x128xf32> to vector<16x16x128xf32>
    %31 = vector.shape_cast %30 : vector<16x16x128xf32> to vector<256x128xf32>
    %c0_15 = arith.constant 0 : index
    %c0_16 = arith.constant 0 : index
    %32 = vector.load %arg12[%c0_15, %c0_16] : memref<256x128xf32, #tpu.memory_space<vmem>>, vector<256x128xf32>
    tpu.vector_store %arg12[%c0_15, %c0_16], %31 {strides = array<i32>} : memref<256x128xf32, #tpu.memory_space<vmem>>, vector<256x128xf32>,
    %c0_17 = arith.constant 0 : index
    %c0_18 = arith.constant 0 : index
    %33 = tpu.strided_load %arg12[%c0_17, %c0_18] {strides = array<i32: 2, 1>} : memref<256x128xf32, #tpu.memory_space<vmem>>, vector<128x128xf32>
    %c1 = arith.constant 1 : index
    %c0_19 = arith.constant 0 : index
    %34 = tpu.strided_load %arg12[%c1, %c0_19] {strides = array<i32: 2, 1>} : memref<256x128xf32, #tpu.memory_space<vmem>>, vector<128x128xf32>
    %35 = arith.maximumf %33, %34 : vector<128x128xf32>
    %c0_20 = arith.constant 0 : index
    %c0_21 = arith.constant 0 : index
    %c0_22 = arith.constant 0 : index
    %36 = vector.load %arg6[%c0_20, %c0_21, %c0_22] : memref<2x128x64xf32, #tpu.memory_space<vmem>>, vector<1x128x64xf32>
    %37 = vector.shape_cast %36 : vector<1x128x64xf32> to vector<128x64xf32>
    %cst_23 = arith.constant dense<0.000000e+00> : vector<128x64xf32>
    %38 = tpu.matmul %35, %37, %cst_23 {dimension_numbers = #tpu.dot_dimension_numbers<[1], [0], [0], [1], [0, 0, 1, 1], [], []>} : vector<128x128xf32>, vector<128x64xf32>, vector<128x64xf32> -> vector<128x64xf32>
    %c1_24 = arith.constant 1 : index
    %c0_25 = arith.constant 0 : index
    %c0_26 = arith.constant 0 : index
    %39 = vector.load %arg6[%c1_24, %c0_25, %c0_26] : memref<2x128x64xf32, #tpu.memory_space<vmem>>, vector<1x128x64xf32>
    %40 = vector.shape_cast %39 : vector<1x128x64xf32> to vector<128x64xf32>
    %cst_27 = arith.constant dense<0.000000e+00> : vector<128x64xf32>
    %41 = tpu.matmul %35, %40, %cst_27 {dimension_numbers = #tpu.dot_dimension_numbers<[1], [0], [0], [1], [0, 0, 1, 1], [], []>} : vector<128x128xf32>, vector<128x64xf32>, vector<128x64xf32> -> vector<128x64xf32>
    %42 = arith.maximumf %38, %41 : vector<128x64xf32>
    %43 = vector.shape_cast %42 : vector<128x64xf32> to vector<16x8x64xf32>
    %44 = vector.shape_cast %43 : vector<16x8x64xf32> to vector<128x64xf32>
    %c0_28 = arith.constant 0 : index
    %c0_29 = arith.constant 0 : index
    %45 = vector.load %arg12[%c0_28, %c0_29] : memref<256x128xf32, #tpu.memory_space<vmem>>, vector<128x64xf32>
    tpu.vector_store %arg12[%c0_28, %c0_29], %44 {strides = array<i32>} : memref<256x128xf32, #tpu.memory_space<vmem>>, vector<128x64xf32>,
    %c0_30 = arith.constant 0 : index
    %c0_31 = arith.constant 0 : index
    %46 = tpu.strided_load %arg12[%c0_30, %c0_31] {strides = array<i32: 8, 1>} : memref<256x128xf32, #tpu.memory_space<vmem>>, vector<16x64xf32>
    %c1_32 = arith.constant 1 : index
    %c0_33 = arith.constant 0 : index
    %47 = tpu.strided_load %arg12[%c1_32, %c0_33] {strides = array<i32: 8, 1>} : memref<256x128xf32, #tpu.memory_space<vmem>>, vector<16x64xf32>
    %c2 = arith.constant 2 : index
    %c0_34 = arith.constant 0 : index
    %48 = tpu.strided_load %arg12[%c2, %c0_34] {strides = array<i32: 8, 1>} : memref<256x128xf32, #tpu.memory_space<vmem>>, vector<16x64xf32>
    %c3 = arith.constant 3 : index
    %c0_35 = arith.constant 0 : index
    %49 = tpu.strided_load %arg12[%c3, %c0_35] {strides = array<i32: 8, 1>} : memref<256x128xf32, #tpu.memory_space<vmem>>, vector<16x64xf32>
    %c4 = arith.constant 4 : index
    %c0_36 = arith.constant 0 : index
    %50 = tpu.strided_load %arg12[%c4, %c0_36] {strides = array<i32: 8, 1>} : memref<256x128xf32, #tpu.memory_space<vmem>>, vector<16x64xf32>
    %c5 = arith.constant 5 : index
    %c0_37 = arith.constant 0 : index
    %51 = tpu.strided_load %arg12[%c5, %c0_37] {strides = array<i32: 8, 1>} : memref<256x128xf32, #tpu.memory_space<vmem>>, vector<16x64xf32>
    %c6 = arith.constant 6 : index
    %c0_38 = arith.constant 0 : index
    %52 = tpu.strided_load %arg12[%c6, %c0_38] {strides = array<i32: 8, 1>} : memref<256x128xf32, #tpu.memory_space<vmem>>, vector<16x64xf32>
    %c7 = arith.constant 7 : index
    %c0_39 = arith.constant 0 : index
    %53 = tpu.strided_load %arg12[%c7, %c0_39] {strides = array<i32: 8, 1>} : memref<256x128xf32, #tpu.memory_space<vmem>>, vector<16x64xf32>
    %54 = tpu.concatenate %46, %47, %48, %49, %50, %51, %52, %53 in 1 : vector<16x64xf32>, vector<16x64xf32>, vector<16x64xf32>, vector<16x64xf32>, vector<16x64xf32>, vector<16x64xf32>, vector<16x64xf32>, vector<16x64xf32> -> vector<16x512xf32>
    %c0_40 = arith.constant 0 : index
    %c0_41 = arith.constant 0 : index
    %55 = vector.load %arg7[%c0_40, %c0_41] : memref<512x128xf32, #tpu.memory_space<vmem>>, vector<512x128xf32>
    %cst_42 = arith.constant dense<0.000000e+00> : vector<16x128xf32>
    %56 = tpu.matmul %54, %55, %cst_42 {dimension_numbers = #tpu.dot_dimension_numbers<[1], [0], [0], [1], [0, 0, 1, 1], [], []>} : vector<16x512xf32>, vector<512x128xf32>, vector<16x128xf32> -> vector<16x128xf32>
    %c0_43 = arith.constant 0 : index
    %c0_44 = arith.constant 0 : index
    %57 = vector.load %arg8[%c0_43, %c0_44] : memref<1x128xf32, #tpu.memory_space<vmem>>, vector<1x128xf32>
    %58 = vector.broadcast %57 : vector<1x128xf32> to vector<16x128xf32>
    %59 = arith.addf %56, %58 : vector<16x128xf32>
    %cst_45 = arith.constant 0.000000e+00 : f32
    %60 = vector.broadcast %cst_45 : f32 to vector<16x128xf32>
    %61 = arith.maximumf %59, %60 : vector<16x128xf32>
    %c0_46 = arith.constant 0 : index
    %c0_47 = arith.constant 0 : index
    %62 = vector.load %arg9[%c0_46, %c0_47] : memref<128x128xf32, #tpu.memory_space<vmem>>, vector<128x128xf32>
    %cst_48 = arith.constant dense<0.000000e+00> : vector<16x128xf32>
    %63 = tpu.matmul %61, %62, %cst_48 {dimension_numbers = #tpu.dot_dimension_numbers<[1], [0], [0], [1], [0, 0, 1, 1], [], []>} : vector<16x128xf32>, vector<128x128xf32>, vector<16x128xf32> -> vector<16x128xf32>
    %c0_49 = arith.constant 0 : index
    %c0_50 = arith.constant 0 : index
    %64 = vector.load %arg10[%c0_49, %c0_50] : memref<1x128xf32, #tpu.memory_space<vmem>>, vector<1x128xf32>
    %65 = vector.broadcast %64 : vector<1x128xf32> to vector<16x128xf32>
    %66 = arith.addf %63, %65 : vector<16x128xf32>
    %c0_51 = arith.constant 0 : index
    %c0_52 = arith.constant 0 : index
    %67 = vector.load %arg11[%c0_51, %c0_52] : memref<16x128xf32, #tpu.memory_space<vmem>>, vector<16x128xf32>
    tpu.vector_store %arg11[%c0_51, %c0_52], %66 {strides = array<i32>} : memref<16x128xf32, #tpu.memory_space<vmem>>, vector<16x128xf32>,
    return
  }
  func.func @transform_0(%arg0: i32) -> (i32, i32, i32) {
    %c0_i32 = arith.constant 0 : i32
    %c0_i32_0 = arith.constant 0 : i32
    %c0_i32_1 = arith.constant 0 : i32
    return %arg0, %c0_i32, %c0_i32_0 : i32, i32, i32
  }
  func.func @transform_1(%arg0: i32) -> (i32, i32) {
    %c0_i32 = arith.constant 0 : i32
    %c0_i32_0 = arith.constant 0 : i32
    %c0_i32_1 = arith.constant 0 : i32
    return %c0_i32, %c0_i32_0 : i32, i32
  }
  func.func @transform_2(%arg0: i32) -> (i32, i32) {
    %c0_i32 = arith.constant 0 : i32
    %c0_i32_0 = arith.constant 0 : i32
    %c0_i32_1 = arith.constant 0 : i32
    return %c0_i32, %c0_i32_0 : i32, i32
  }
  func.func @transform_3(%arg0: i32) -> (i32, i32) {
    %c0_i32 = arith.constant 0 : i32
    %c0_i32_0 = arith.constant 0 : i32
    %c0_i32_1 = arith.constant 0 : i32
    return %c0_i32, %c0_i32_0 : i32, i32
  }
  func.func @transform_4(%arg0: i32) -> (i32, i32) {
    %c0_i32 = arith.constant 0 : i32
    %c0_i32_0 = arith.constant 0 : i32
    %c0_i32_1 = arith.constant 0 : i32
    return %c0_i32, %c0_i32_0 : i32, i32
  }
  func.func @transform_5(%arg0: i32) -> (i32, i32, i32) {
    %c0_i32 = arith.constant 0 : i32
    %c0_i32_0 = arith.constant 0 : i32
    %c0_i32_1 = arith.constant 0 : i32
    %c0_i32_2 = arith.constant 0 : i32
    return %c0_i32, %c0_i32_0, %c0_i32_1 : i32, i32, i32
  }
  func.func @transform_6(%arg0: i32) -> (i32, i32) {
    %c0_i32 = arith.constant 0 : i32
    %c0_i32_0 = arith.constant 0 : i32
    %c0_i32_1 = arith.constant 0 : i32
    return %c0_i32, %c0_i32_0 : i32, i32
  }
  func.func @transform_7(%arg0: i32) -> (i32, i32) {
    %c0_i32 = arith.constant 0 : i32
    %c0_i32_0 = arith.constant 0 : i32
    %c0_i32_1 = arith.constant 0 : i32
    return %c0_i32, %c0_i32_0 : i32, i32
  }
  func.func @transform_8(%arg0: i32) -> (i32, i32) {
    %c0_i32 = arith.constant 0 : i32
    %c0_i32_0 = arith.constant 0 : i32
    %c0_i32_1 = arith.constant 0 : i32
    return %c0_i32, %c0_i32_0 : i32, i32
  }
  func.func @transform_9(%arg0: i32) -> (i32, i32) {
    %c0_i32 = arith.constant 0 : i32
    %c0_i32_0 = arith.constant 0 : i32
    %c0_i32_1 = arith.constant 0 : i32
    return %c0_i32, %c0_i32_0 : i32, i32
  }
  func.func @transform_10(%arg0: i32) -> (i32, i32) {
    %c0_i32 = arith.constant 0 : i32
    %c0_i32_0 = arith.constant 0 : i32
    return %arg0, %c0_i32 : i32, i32
  }
}

</mosaic_0001>

<bundles_post_ra>
// kernel: tpu_custom_call.1
= control target key start
LH: loop header
LB: loop body
LE: loop exit
PB: predicated region body
PF: predicated region fallthrough
CT: control target
= control target key end

     0   :  { %s5444_s0 = inlined_call_operand.hbm [shape: f32[32,16,64], index: 0, kind: input, shape index: {}]   ;;  %s5445_s1 = inlined_call_operand.hbm [shape: f32[192,128], index: 1, kind: input, shape index: {}]   ;;  %s5446_s2 = inlined_call_operand.vmem [shape: f32[1,128], index: 2, kind: input, shape index: {}]   ;;  %s5447_s3 = inlined_call_operand.vmem [shape: f32[384,128], index: 3, kind: input, shape index: {}]   ;;  %s5448_s4 = inlined_call_operand.vmem [shape: f32[1,128], index: 4, kind: input, shape index: {}]   ;;  %s5449_s5 = inlined_call_operand.vmem [shape: f32[2,128,64], index: 5, kind: input, shape index: {}]   ;;  %s5450_s6 = inlined_call_operand.hbm [shape: f32[512,128], index: 6, kind: input, shape index: {}]   ;;  %s5451_s7 = inlined_call_operand.vmem [shape: f32[1,128], index: 7, kind: input, shape index: {}]   ;;  %s5452_s8 = inlined_call_operand.hbm [shape: f32[128,128], index: 8, kind: input, shape index: {}]   ;;  %s5453_s9 = inlined_call_operand.vmem [shape: f32[1,128], index: 9, kind: input, shape index: {}]   ;;  %s5454_s10 = inlined_call_operand.hbm [shape: f32[32,128], index: 10, kind: output, shape index: {}]  }
   0x1   :  { %5461 = sst [smem:[#allocation17_spill]] %s5445_s1 }
   0x2   :  { %5462 = sst [smem:[#allocation18_spill]] %s5450_s6 }
   0x3   :  { %5463 = sst [smem:[#allocation19_spill]] %s5452_s8 }
   0x4   :  { %15 = vsyncpa [#allocation4], 0 }
   0x5   :  { %17 = vsyncpa [#allocation4 + $0x1], 0 }
   0x6   :  { %18 = vsyncpa [#allocation7], 0 }
   0x7   :  { %19 = vsyncpa [#allocation10], 0 }
   0x8   :  { %20 = vsyncpa [#allocation5], 0 }
   0x9   :  { %22 = vsyncpa [#allocation5 + $0x1], 0  ;;  %s4142_s13 = smov 0   ;;  %s4144_s14 = smov 0  }
   0xa   :  { %s4146_s15 = smov 0   ;;  %s4148_s16 = smov 0  }
   0xb LB: > { %s4163_s17 = sadd.s32 4294967295, %s4074_s16   ;;  %s3252_s18 = sadd.s32 4294967294, %s4074_s16   ;;  %s4074_s16 = sphi %s4148_s16, %s5491_s16   ;;  %s4070_s15 = sphi %s4146_s15, %s5490_s15   ;;  %s4066_s14 = sphi %s4144_s14, %s5489_s14   ;;  %s4062_s13 = sphi %s4142_s13, %s5488_s13  }
   0xc   : > { %p48_p0 = scmp.ne.s32.totalorder %s4066_s14, %s4062_s13  ;;  %p5455_p1 = scmp.eq.s32.totalorder %s4163_s17, 0 }
   0xd   : > { %p261_p2 = scmp.eq.s32.totalorder %s4163_s17, 1  ;;  %p267_p3 = scmp.eq.s32.totalorder %s3252_s18, 1 }
   0xe   : > { %p4172_p4 = por %p5455_p1, %p48_p0  ;;  %p3253_p5 = scmp.ge.s32.totalorder %s4074_s16, 1 }
   0xf   : > { %p4177_p6 = por %p267_p3, %p48_p0  ;;  %p274_p7 = scmp.lt.s32.totalorder %s4074_s16, 3 }
  0x10   : > { %s5464_s19 = scalar_select %p4172_p4, 1, 0 }
  0x11   : > { %s5465_s20 = scalar_select %p4177_p6, 1, 0 }
  0x12   : > { %p4182_p8 = pnand %p3253_p5, %p274_p7  ;;  %s4076_s22 = smov [#allocation6]  }
  0x13   : > { %s286_s23 = sshll.u32 %s4076_s22, 4  ;;  %s4077_s25 = smov [#allocation8]   ;;  %s287_s23 = int_to_ptr.vmem [resolvable:$true] %s286_s23 }
  0x14   : > { %s5466_s21 = scalar_select %p4182_p8, 1, 0 }
  0x15   : > { %p3809_p9 = pneg %p4182_p8  ;;  %s311_s26 = sshll.u32 %s4077_s25, 4  ;;  %s312_s26 = int_to_ptr.vmem [resolvable:$true] %s311_s26 }
  0x16   : > { %s4078_s27 = smov [#allocation9]   ;;  %s3907_s29 = scalar_lea.vmem %s287_s23, 3072 }
  0x17   : > { %p4191_p11 = pnand %p3809_p9, %p5455_p1  ;;  %s327_s28 = sshll.u32 %s4078_s27, 4  ;;  %s328_s28 = int_to_ptr.vmem [resolvable:$true] %s327_s28 }
  0x18   : > { %p3908_p13 = scmp.ne.s32.totalorder %s287_s23, %s3907_s29  ;;  %p3915_p5 = scmp.lt.s32.totalorder %s287_s23, %s287_s23 }
  0x19   : > { %p3898_p12 = pneg %p4191_p11  ;;  %p3916_p7 = scmp.lt.s32.totalorder %s3907_s29, %s3907_s29 }
  0x1b   : > { %p3910_p0 = pnand %p3908_p13, %p3898_p12  ;;  %p3917_p9 = por %p3916_p7, %p3915_p5 }
  0x1d   : > { %p3911_p3 = pneg %p3910_p0 }
  0x1f   : > { %p3918_p10 = pnand %p3917_p9, %p3911_p3 }
  0x21   : > { %3921 = shalt.err (!%p3918_p10)
}
  0x22   : > { %s5456_s30 = smov 128   ;;  %s5457_s11 = smov 8  }
  0x23   : > { %s5468_s1 = sld [smem:[#allocation17_spill]]  ;;  %s3933_s22 = scalar_lea.vmem %s312_s26, 8192 }
  0x24   : > { %p3934_p13 = scmp.ne.s32.totalorder %s312_s26, %s3933_s22  ;;  %p3941_p3 = scmp.lt.s32.totalorder %s312_s26, %s312_s26 }
  0x25   : > { %p3942_p10 = scmp.lt.s32.totalorder %s3933_s22, %s3933_s22 }
  0x26   : > { %p3936_p0 = pnand %p3934_p13, %p3898_p12 }
  0x27   : > { %p3943_p7 = por %p3942_p10, %p3941_p3 }
  0x28   : > { %p3937_p5 = pneg %p3936_p0 }
  0x29   : > { %3812 = dma.hbm_to_vmem [thread:$0]  (!%p4191_p11), %s5468_s1, 3072, %s287_s23, [#allocation7], %s5456_s30, %s5456_s30, %s5457_s11  }
  0x2a   : > { %p3944_p9 = pnand %p3943_p7, %p3937_p5 }
  0x2c   : > { %3947 = shalt.err (!%p3944_p9)
}
  0x2d   : > { %s5469_s6 = sld [smem:[#allocation18_spill]]  ;;  %s3959_s23 = scalar_lea.vmem %s328_s28, 2048 }
  0x2e   : > { %p3960_p1 = scmp.ne.s32.totalorder %s328_s28, %s3959_s23  ;;  %p3967_p3 = scmp.lt.s32.totalorder %s328_s28, %s328_s28 }
  0x2f   : > { %p3968_p5 = scmp.lt.s32.totalorder %s3959_s23, %s3959_s23 }
  0x30   : > { %p3962_p13 = pnand %p3960_p1, %p3898_p12 }
  0x31   : > { %p3969_p10 = por %p3968_p5, %p3967_p3 }
  0x32   : > { %p3963_p0 = pneg %p3962_p13 }
  0x33   : > { %3815 = dma.hbm_to_vmem [thread:$0]  (!%p4191_p11), %s5469_s6, 8192, %s312_s26, [#allocation7], %s5456_s30, %s5456_s30, %s5457_s11  }
  0x34   : > { %p3970_p7 = pnand %p3969_p10, %p3963_p0 }
  0x36   : > { %3973 = shalt.err (!%p3970_p7)
}
  0x37   : > { %s5470_s8 = sld [smem:[#allocation19_spill]]  ;;  %s4231_s26 = sadd.s32 1, %s4074_s16  }
  0x38   : > { %s32_s24 = ssub.s32 %s4074_s16, %s4231_s26  ;;  %s35_s18 = sadd.s32 1, %s4070_s15 }
  0x39   : > { %p33_p1 = scmp.eq.s32.totalorder %s32_s24, 0  ;;  %p42_p12 = scmp.ne.s32.totalorder %s4070_s15, %s4066_s14 }
  0x3a   : > { %p43_p9 = scmp.eq.s32.totalorder %s4074_s16, 0  ;;  %p3830_p13 = scmp.lt.s32.totalorder %s4074_s16, 2 }
  0x3b   : > { %s4241_s22 = scalar_select %p33_p1, %s4070_s15, %s35_s18  }
  0x3c   : > { %p44_p0 = por %p43_p9, %p42_p12  ;;  %p4245_p3 = por %p261_p2, %p42_p12 }
  0x3d   : > { %3818 = dma.hbm_to_vmem [thread:$0]  (!%p4191_p11), %s5470_s8, 2048, %s328_s28, [#allocation10], %s5456_s30, %s5456_s30, %s5457_s11  }
  0x3e   : > { %5471 = sst [smem:[#allocation16_spill]] %s4241_s22  ;;  %s344_s27 = sand.u32 1, %s4070_s15  }
  0x3f   : > { %s5472_s25 = scalar_select %p4245_p3, 1, 0 }
  0x40   : > { %s3358_s23 = sshll.u32 %s4074_s16, 12  ;;  %s3258_s28 = sshll.u32 %s344_s27, 8 }
  0x41   : > { %s4254_s30 = scalar_lea.hbm %s5444_s0, %s3358_s23  ;;  %s348_s24 = scalar_lea.vmem [#allocation3], %s3258_s28 }
  0x42   : > { %s356_s18 = sshll.u32 %s348_s24, 4  ;;  %p4256_p11 = pnand %p3830_p13, %p44_p0  ;;  %s4260_s18 = int_to_ptr.vmem [resolvable:$true] %s356_s18 }
  0x43   : > { %s4262_s1 = scalar_lea.sflag [#allocation4], %s344_s27  ;;  %s3974_s6 = scalar_lea.hbm %s4254_s30, 4096 }
  0x44   : > { %p3975_p2 = scmp.ne.s32.totalorder %s4254_s30, %s3974_s6  ;;  %p3976_p5 = pneg %p4256_p11 }
  0x45   : > { %s3979_s28 = scalar_lea.hbm %s5444_s0, 8192  ;;  %p3980_p1 = scmp.lt.s32.totalorder %s4254_s30, %s5444_s0 }
  0x46   : > { %p3977_p10 = pnand %p3976_p5, %p3975_p2  ;;  %p3981_p12 = scmp.lt.s32.totalorder %s3979_s28, %s3974_s6 }
  0x48   : > { %p3978_p7 = pneg %p3977_p10  ;;  %p3982_p9 = por %p3981_p12, %p3980_p1 }
  0x4a   : > { %p3983_p13 = pnand %p3982_p9, %p3978_p7 }
  0x4c   : > { %3986 = shalt.err (!%p3983_p13)
}
  0x4d   : > { %s3987_s27 = scalar_lea.vmem %s4260_s18, 4096  ;;  %s4081_s8 = smov [#allocation3]  }
  0x4e   : > { %p3988_p0 = scmp.ne.s32.totalorder %s4260_s18, %s3987_s27  ;;  %s3992_s22 = sshll.u32 %s4081_s8, 4  ;;  %s3993_s22 = int_to_ptr.vmem [resolvable:$false] %s3992_s22 }
  0x4f   : > { %s3994_s23 = scalar_lea.vmem %s3993_s22, 8192  ;;  %p3995_p10 = scmp.lt.s32.totalorder %s4260_s18, %s3993_s22 }
  0x50   : > { %p3990_p6 = pnand %p3988_p0, %p3976_p5  ;;  %p3996_p3 = scmp.lt.s32.totalorder %s3994_s23, %s3987_s27 }
  0x52   : > { %p3991_p2 = pneg %p3990_p6  ;;  %p3997_p4 = por %p3996_p3, %p3995_p10 }
  0x54   : > { %p3998_p8 = pnand %p3997_p4, %p3991_p2 }
  0x56   : > { %4001 = shalt.err (!%p3998_p8)
}
  0x57   : > { %s5474_s6 = smov 8   ;;  %s5475_s29 = smov 128  }
  0x58   : > { %3822 = dma.hbm_to_vmem [thread:$0]  (!%p4256_p11), %s4254_s30, 4096, %s4260_s18, %s4262_s1, %s5475_s29, %s5475_s29, %s5474_s6  }
  0x59   : > { %p5476_p6 = scmp.ne.s32.totalorder %s5466_s21, 0 }
  0x5a   : > { %s4289_s8 = sand.u32 (!%p5476_p6), 1, %s4066_s14   ;;  %p5477_p4 = scmp.ne.s32.totalorder (!%p5476_p6), %s5464_s19, 0 }
  0x5b   : > { %368 = sbr.rel (%p5476_p6) target bundleno = 1543 (0x607), region = 60  ;;  %s3263_s22 = sshll.u32 (!%p5476_p6), %s4289_s8, 8 }
  0x5c   : > { %s371_s28 = scalar_lea.sflag (!%p5476_p6), [#allocation4], %s4289_s8  ;;  %s4293_s12 = scalar_lea.vmem (!%p5476_p6), [#allocation3], %s3263_s22 }
  0x60   : > { %4045 = dma.done.wait (%p5477_p4), %s371_s28, 4096  }
  0x61   : > { %4047 = vsyncadd (%p5477_p4), %s371_s28, 4294963200  ;;  %p5478_p8 = scmp.eq.s32.totalorder %s4163_s17, 0 }
  0x63   : > { %4049 = dma.done.wait (%p5478_p8), [#allocation7], 11264   ;;  %p5479_p3 = pmov %p5478_p8 }
  0x65   : > { %4051 = vsyncadd (%p5479_p3), [#allocation7], 4294956032  ;;  %p5480_p11 = pmov %p5479_p3 }
  0x66   : > { %p5481_p5 = pmov %p5479_p3 }
  0x67   : > { %4053 = dma.done.wait (%p5480_p11), [#allocation10], 2048  }
  0x68   : > { %4055 = vsyncadd (%p5481_p5), [#allocation10], 4294965248  ;;  %v4082_v0 = vmov 0.0   ;;  %v425_v1 = vld [vmem:[%s4293_s12] sm:$0xff]  ;;  %v426_v2 = vld [vmem:[%s4293_s12 + $0x8] sm:$0xff]  ;;  %vm489_vm0 = vcmask 1040384  }
  0x69   : > { %1036 = vmatprep.subr.mxu0 %v4082_v0  ;;  %1764 = vmatprep.subr.mxu1 %v4082_v0  ;;  %v427_v3 = vld [vmem:[%s4293_s12 + $0x10] sm:$0xff]  ;;  %v490_v4 = vrot.slane %v425_v1, 7  ;;  %v491_v5 = vrot.slane %v426_v2, 7  ;;  %v428_v6 = vld [vmem:[%s4293_s12 + $0x18] sm:$0xff]  ;;  %v429_v8 = vld [vmem:[%s4293_s12 + $0x20] sm:$0xff]  ;;  %vm650_vm1 = vcmask 1046528  }
  0x6a   : > { %v493_v7 = vrot.slane %v427_v3, 7  ;;  %v430_v9 = vld [vmem:[%s4293_s12 + $0x28] sm:$0xff]  ;;  %v494_v10 = vrot.slane %v428_v6, 7  ;;  %v496_v11 = vrot.slane %v429_v8, 7  ;;  %v431_v25 = vld [vmem:[%s4293_s12 + $0x30] sm:$0xff]  ;;  %v432_v26 = vld [vmem:[%s4293_s12 + $0x38] sm:$0xff] }
  0x6b   : > { %v497_v12 = vrot.slane %v430_v9, 7  ;;  %v4316_v13 = vsel %vm489_vm0, %v490_v4, %v491_v5  ;;  %v4319_v14 = vsel %vm489_vm0, 0.0, %v490_v4  ;;  %v4322_v15 = vsel %vm489_vm0, %v491_v5, 0.0  ;;  %v433_v27 = vld [vmem:[%s4293_s12 + $0x40] sm:$0xff]  ;;  %v434_v31 = vld [vmem:[%s4293_s12 + $0x48] sm:$0xff]  ;;  %v956_v32 = vld [vmem:[#allocation6 + $0x78] sm:$0xff] }
  0x6c   : > { %v4325_v16 = vsel %vm489_vm0, 0.0, %v493_v7  ;;  %v651_v17 = vrot.slane %v4319_v14, 1  ;;  %v652_v18 = vrot.slane %v4316_v13, 1  ;;  %v654_v19 = vrot.slane %v4322_v15, 1  ;;  %v955_v33 = vld [vmem:[#allocation6 + $0x70] sm:$0xff]  ;;  %s4083_s1 = smov 64   ;;  %1037 = vmatpush1.msra.mxu0 %v956_v32  ;;  %vm4990_vm4 = vmneg %vm489_vm0 }
  0x6d   : > { %v4331_v20 = vsel %vm489_vm0, %v493_v7, %v494_v10  ;;  %v656_v21 = vrot.slane %v4325_v16, 1  ;;  %v4336_v23 = vsel %vm489_vm0, %v494_v10, 0.0  ;;  %v4339_v24 = vsel %vm489_vm0, %v496_v11, %v497_v12  ;;  %1038 = vmatprep.subr.mxu0 %v4082_v0  ;;  %v954_v41 = vld [vmem:[#allocation6 + $0x68] sm:$0xff]  ;;  %v435_v46 = vld [vmem:[%s4293_s12 + $0x50] sm:$0xff]  ;;  %v436_v47 = vld [vmem:[%s4293_s12 + $0x58] sm:$0xff]  ;;  %s3267_s29 = sshll.u32 %s4289_s8, 4 }
  0x6e   : > { %v657_v22 = vrot.slane %v4331_v20, 1  ;;  %v653_v28 = vsel %vm650_vm1, %v651_v17, %v652_v18  ;;  %v659_v29 = vrot.slane %v4336_v23, 1  ;;  %v4347_v30 = vsel %vm489_vm0, 0.0, %v496_v11  ;;  %1039 = vmatpush1.msra.mxu0 %v955_v33  ;;  %v953_v51 = vld [vmem:[#allocation6 + $0x60] sm:$0xff]  ;;  %v952_v58 = vld [vmem:[#allocation6 + $0x58] sm:$0xff]  ;;  %v438_v1 = vld [vmem:[%s4293_s12 + $0x68] sm:$0xff] }
  0x6f   : > { %731 = vrot.lane.b32.xlu0 %v653_v28, %s4083_s1  ;;  %v655_v34 = vsel %vm650_vm1, %v652_v18, %v654_v19  ;;  %v4354_v36 = vsel %vm489_vm0, %v497_v12, 0.0  ;;  %v661_v37 = vrot.slane %v4347_v30, 1  ;;  %v662_v38 = vrot.slane %v4339_v24, 1  ;;  %1040 = vmatprep.subr.mxu0 %v4082_v0  ;;  %v437_v62 = vld [vmem:[%s4293_s12 + $0x60] sm:$0xff]  ;;  %v951_v2 = vld [vmem:[#allocation6 + $0x50] sm:$0xff]  ;;  %v950_v9 = vld [vmem:[#allocation6 + $0x48] sm:$0xff] }
  0x70   : > { %v658_v35 = vsel %vm650_vm1, %v656_v21, %v657_v22  ;;  %v499_v39 = vrot.slane %v431_v25, 7  ;;  %v500_v40 = vrot.slane %v432_v26, 7  ;;  %v660_v42 = vsel %vm650_vm1, %v657_v22, %v659_v29  ;;  %1041 = vmatpush1.msra.mxu0 %v954_v41  ;;  %v439_v17 = vld [vmem:[%s4293_s12 + $0x70] sm:$0xff]  ;;  %v440_v18 = vld [vmem:[%s4293_s12 + $0x78] sm:$0xff]  ;;  %v949_v21 = vld [vmem:[#allocation6 + $0x40] sm:$0xff]  ;;  %s3359_s21 = sshll.u32 %s4163_s17, 8 }
  0x71   : > { %735 = vrot.lane.b32.xlu1 %v658_v35, %s4083_s1  ;;  %v664_v43 = vrot.slane %v4354_v36, 1  ;;  %v502_v44 = vrot.slane %v433_v27, 7  ;;  %v503_v45 = vrot.slane %v434_v31, 7  ;;  %v663_v54 = vsel %vm650_vm1, %v661_v37, %v662_v38  ;;  %1042 = vmatprep.subr.mxu0 %v4082_v0  ;;  %v948_v31 = vld [vmem:[#allocation6 + $0x38] sm:$0xff]  ;;  %v441_v35 = vld [vmem:[%s4293_s12 + $0x80] sm:$0xff]  ;;  %s5401_s18 = scalar_lea.hbm %s5454_s10, %s3359_s21  ;;  %s3137_s24 = scalar_lea.sflag [#allocation5], %s4289_s8 }
  0x72   : > { %v4365_v48 = vsel %vm489_vm0, %v499_v39, %v500_v40  ;;  %v4368_v49 = vsel %vm489_vm0, 0.0, %v499_v39  ;;  %v4371_v50 = vsel %vm489_vm0, %v500_v40, 0.0  ;;  %v505_v56 = vrot.slane %v435_v46, 7  ;;  %1043 = vmatpush1.msra.mxu0 %v953_v51  ;;  %v947_v39 = vld [vmem:[#allocation6 + $0x30] sm:$0xff]  ;;  %v946_v46 = vld [vmem:[#allocation6 + $0x28] sm:$0xff]  ;;  %p5484_p1 = scmp.ne.s32.totalorder %s5472_s25, 0 }
  0x73   : > { %733 = vrot.lane.b32.xlu0 %v655_v34, %s4083_s1  ;;  %v666_v52 = vrot.slane %v4368_v49, 1  ;;  %v667_v53 = vrot.slane %v4365_v48, 1  ;;  %v4380_v55 = vsel %vm489_vm0, %v502_v44, %v503_v45  ;;  %v506_v57 = vrot.slane %v436_v47, 7  ;;  %1044 = vmatprep.subr.mxu0 %v4082_v0  ;;  %s4084_s17 = smov [#allocation11]  }
  0x74   : > { %v665_v59 = vsel %vm650_vm1, %v662_v38, %v664_v43  ;;  %v669_v60 = vrot.slane %v4371_v50, 1  ;;  %v4386_v61 = vsel %vm489_vm0, 0.0, %v502_v44  ;;  %v4390_v63 = vsel %vm489_vm0, %v503_v45, 0.0  ;;  %1045 = vmatpush1.msra.mxu0 %v952_v58  ;;  %v442_v38 = vld [vmem:[%s4293_s12 + $0x88] sm:$0xff]  ;;  %s4006_s23 = sshll.u32 %s4084_s17, 4  ;;  %s4007_s23 = int_to_ptr.vmem [resolvable:$false] %s4006_s23 }
  0x75   : > { %737 = vrot.lane.b32.xlu1 %v660_v42, %s4083_s1  ;;  %v668_v3 = vsel %vm650_vm1, %v666_v52, %v667_v53  ;;  %v672_v4 = vrot.slane %v4380_v55, 1  ;;  %v671_v5 = vrot.slane %v4386_v61, 1  ;;  %v4400_v6 = vsel %vm489_vm0, %v505_v56, %v506_v57  ;;  %1046 = vmatprep.subr.mxu0 %v4082_v0 }
  0x76   : > { %v4403_v7 = vsel %vm489_vm0, 0.0, %v505_v56  ;;  %v508_v8 = vrot.slane %v437_v62, 7  ;;  %v670_v10 = vsel %vm650_vm1, %v667_v53, %v669_v60  ;;  %v674_v11 = vrot.slane %v4390_v63, 1  ;;  %1047 = vmatpush1.msra.mxu0 %v951_v2  ;;  %v443_v53 = vld [vmem:[%s4293_s12 + $0x90] sm:$0xff] }
  0x77   : > { %739 = vrot.lane.b32.xlu0 %v663_v54, %s4083_s1  ;;  %v509_v12 = vrot.slane %v438_v1, 7  ;;  %v4411_v19 = vsel %vm489_vm0, %v506_v57, 0.0  ;;  %1048 = vmatprep.subr.mxu0 %v4082_v0  ;;  %v676_v22 = vrot.slane %v4403_v7, 1  ;;  %v677_v25 = vrot.slane %v4400_v6, 1  ;;  %v444_v54 = vld [vmem:[%s4293_s12 + $0x98] sm:$0xff]  ;;  %v945_v57 = vld [vmem:[#allocation6 + $0x20] sm:$0xff] }
  0x78   : > { %1049 = vmatpush1.msra.mxu0 %v950_v9  ;;  %v673_v26 = vsel %vm650_vm1, %v671_v5, %v672_v4  ;;  %v4420_v27 = vsel %vm489_vm0, 0.0, %v508_v8  ;;  %v511_v28 = vrot.slane %v439_v17, 7  ;;  %v512_v29 = vrot.slane %v440_v18, 7  ;;  %v944_v5 = vld [vmem:[#allocation6 + $0x18] sm:$0xff] }
  0x79   : > { %741 = vrot.lane.b32.xlu1 %v665_v59, %s4083_s1  ;;  %1050 = vmatprep.subr.mxu0 %v4082_v0  ;;  %v675_v32 = vsel %vm650_vm1, %v672_v4, %v674_v11  ;;  %v679_v33 = vrot.slane %v4411_v19, 1  ;;  %v4426_v34 = vsel %vm489_vm0, %v508_v8, %v509_v12  ;;  %v4430_v37 = vsel %vm489_vm0, %v509_v12, 0.0  ;;  %v446_v4 = vld [vmem:[%s4293_s12 + $0xa8] sm:$0xff]  ;;  %v943_v12 = vld [vmem:[#allocation6 + $0x10] sm:$0xff] }
  0x7a   : > { %1051 = vmatpush1.msra.mxu0 %v949_v21  ;;  %v678_v40 = vsel %vm650_vm1, %v676_v22, %v677_v25  ;;  %v681_v41 = vrot.slane %v4420_v27, 1  ;;  %v682_v42 = vrot.slane %v4426_v34, 1  ;;  %v4440_v43 = vsel %vm489_vm0, %v511_v28, %v512_v29  ;;  %v447_v22 = vld [vmem:[%s4293_s12 + $0xb0] sm:$0xff] }
  0x7b   : > { %743 = vrot.lane.b32.xlu0 %v668_v3, %s4083_s1  ;;  %1052 = vmatprep.subr.mxu0 %v4082_v0  ;;  %v4443_v44 = vsel %vm489_vm0, 0.0, %v511_v28  ;;  %v514_v45 = vrot.slane %v441_v35, 7  ;;  %v680_v47 = vsel %vm650_vm1, %v677_v25, %v679_v33  ;;  %v684_v51 = vrot.slane %v4430_v37, 1  ;;  %v445_v3 = vld [vmem:[%s4293_s12 + $0xa0] sm:$0xff]  ;;  %v448_v35 = vld [vmem:[%s4293_s12 + $0xb8] sm:$0xff] }
  0x7c   : > { %1053 = vmatpush1.msra.mxu0 %v948_v31  ;;  %v515_v52 = vrot.slane %v442_v38, 7  ;;  %v4451_v56 = vsel %vm489_vm0, %v512_v29, 0.0  ;;  %v686_v58 = vrot.slane %v4443_v44, 1  ;;  %v687_v59 = vrot.slane %v4440_v43, 1  ;;  %v942_v31 = vld [vmem:[#allocation6 + $0x8] sm:$0xff] }
  0x7d   : > { %745 = vrot.lane.b32.xlu1 %v670_v10, %s4083_s1  ;;  %1054 = vmatprep.subr.mxu0 %v4082_v0  ;;  %v683_v60 = vsel %vm650_vm1, %v681_v41, %v682_v42  ;;  %v4460_v62 = vsel %vm489_vm0, 0.0, %v514_v45  ;;  %v517_v1 = vrot.slane %v443_v53, 7  ;;  %v518_v2 = vrot.slane %v444_v54, 7 }
  0x7e   : > { %1055 = vmatpush1.msra.mxu0 %v947_v39  ;;  %v685_v8 = vsel %vm650_vm1, %v682_v42, %v684_v51  ;;  %v689_v9 = vrot.slane %v4451_v56, 1  ;;  %v4468_v10 = vsel %vm489_vm0, %v514_v45, %v515_v52  ;;  %v4471_v11 = vsel %vm489_vm0, %v515_v52, 0.0  ;;  %v964_v52 = vld [vmem:[#allocation6 + $0xb8] sm:$0xff] }
  0x7f   : > { %747 = vrot.lane.b32.xlu0 %v673_v26, %s4083_s1  ;;  %1056 = vmatprep.subr.mxu0 %v4082_v0  ;;  %v691_v17 = vrot.slane %v4460_v62, 1  ;;  %v520_v18 = vrot.slane %v445_v3, 7  ;;  %v521_v21 = vrot.slane %v446_v4, 7  ;;  %v688_v25 = vsel %vm650_vm1, %v686_v58, %v687_v59  ;;  %v449_v58 = vld [vmem:[%s4293_s12 + $0xc0] sm:$0xff] }
  0x80   : > { %1057 = vmatpush1.msra.mxu0 %v946_v46  ;;  %v692_v26 = vrot.slane %v4468_v10, 1  ;;  %v4481_v28 = vsel %vm489_vm0, %v517_v1, %v518_v2  ;;  %v4484_v29 = vsel %vm489_vm0, 0.0, %v517_v1  ;;  %v694_v33 = vrot.slane %v4471_v11, 1 }
  0x81   : > { %749 = vrot.lane.b32.xlu1 %v675_v32, %s4083_s1  ;;  %1058 = vmatprep.subr.mxu0 %v4082_v0  ;;  %v690_v32 = vsel %vm650_vm1, %v687_v59, %v689_v9  ;;  %v4491_v38 = vsel %vm489_vm0, %v518_v2, 0.0  ;;  %v523_v39 = vrot.slane %v447_v22, 7  ;;  %v696_v41 = vrot.slane %v4484_v29, 1  ;;  %v450_v59 = vld [vmem:[%s4293_s12 + $0xc8] sm:$0xff] }
  0x82   : > { %1059 = vmatpush1.msra.mxu0 %v945_v57  ;;  %v697_v42 = vrot.slane %v4481_v28, 1  ;;  %v4498_v45 = vsel %vm489_vm0, %v520_v18, %v521_v21  ;;  %v4501_v46 = vsel %vm489_vm0, 0.0, %v520_v18  ;;  %v524_v51 = vrot.slane %v448_v35, 7  ;;  %v961_v35 = vld [vmem:[#allocation6 + $0xa0] sm:$0xff] }
  0x83   : > { %751 = vrot.lane.b32.xlu0 %v678_v40, %s4083_s1  ;;  %1060 = vmatprep.subr.mxu0 %v4082_v0  ;;  %v941_v40 = vld [vmem:[#allocation6] sm:$0xff]  ;;  %vm827_vm2 = vcmask 1045504   ;;  %v828_v53 = vrot.slane %v4319_v14, 2  ;;  %v695_v54 = vsel %vm650_vm1, %v692_v26, %v694_v33  ;;  %v699_v57 = vrot.slane %v4491_v38, 1  ;;  %v452_v33 = vld [vmem:[%s4293_s12 + $0xd8] sm:$0xff] }
  0x84   : > { %1061 = vmatpush1.msra.mxu0 %v944_v5  ;;  %v831_v1 = vrot.slane %v4322_v15, 2  ;;  %v701_v2 = vrot.slane %v4501_v46, 1  ;;  %v702_v3 = vrot.slane %v4498_v45, 1  ;;  %v4516_v4 = vsel %vm489_vm0, %v521_v21, 0.0  ;;  %v963_v5 = vld [vmem:[#allocation6 + $0xb0] sm:$0xff] }
  0x85   : > { %753 = vrot.lane.b32.xlu1 %v680_v47, %s4083_s1  ;;  %1062 = vmatprep.subr.mxu0 %v4082_v0  ;;  %v693_v47 = vsel %vm650_vm1, %v691_v17, %v692_v26  ;;  %vm908_vm3 = vcmask 523264   ;;  %v4522_v9 = vsel %vm489_vm0, 0.0, %v523_v39  ;;  %v4530_v17 = vsel %vm489_vm0, %v523_v39, %v524_v51 }
  0x86   : > { %1063 = vmatpush1.msra.mxu0 %v943_v12  ;;  %v4533_v18 = vsel %vm489_vm0, %v524_v51, 0.0  ;;  %v526_v21 = vrot.slane %v449_v58, 7  ;;  %v527_v22 = vrot.slane %v450_v59, 7  ;;  %v700_v26 = vsel %vm650_vm1, %v697_v42, %v699_v57  ;;  %v959_v59 = vld [vmem:[#allocation6 + $0x90] sm:$0xff] }
  0x87   : > { %755 = vrot.lane.b32.xlu0 %v683_v60, %s4083_s1  ;;  %1064 = vmatprep.subr.mxu0 %v4082_v0  ;;  %v829_v60 = vrot.slane %v4316_v13, 2  ;;  %v703_v39 = vsel %vm650_vm1, %v701_v2, %v702_v3 }
  0x88   : > { %1065 = vmatpush1.msra.mxu0 %v942_v31  ;;  %v704_v31 = vrot.slane %v4516_v4, 1  ;;  %v4552_v51 = vsel %vm489_vm0, 0.0, %v526_v21  ;;  %v4557_v58 = vsel %vm489_vm0, %v527_v22, 0.0 }
  0x89   : > { %757 = vrot.lane.b32.xlu1 %v685_v8, %s4083_s1  ;;  %1066 = vmatprep.subr.mxu0 %v4082_v0  ;;  %v698_v8 = vsel %vm650_vm1, %v696_v41, %v697_v42  ;;  %v830_v15 = vsel %vm827_vm2, %v828_v53, %v829_v60  ;;  %v4526_v12 = vsel %vm827_vm2, %v829_v60, %v831_v1  ;;  %v707_v41 = vrot.slane %v4530_v17, 1  ;;  %v453_v60 = vld [vmem:[%s4293_s12 + $0xe0] sm:$0xff]  ;;  %v454_v1 = vld [vmem:[%s4293_s12 + $0xe8] sm:$0xff] }
  0x8a   : > { %1067 = vmatpush1.msra.mxu0 %v941_v40  ;;  %3269 = vmatprep.mubr.msk.f32.mxu0 %vm908_vm3, %v830_v15  ;;  %v706_v40 = vrot.slane %v4522_v9, 1  ;;  %v709_v42 = vrot.slane %v4533_v18, 1  ;;  %v530_v53 = vrot.slane %v452_v33, 7  ;;  %v705_v57 = vsel %vm650_vm1, %v702_v3, %v704_v31  ;;  %v957_v33 = vld [vmem:[#allocation6 + $0x80] sm:$0xff] }
  0x8b   : > { %759 = vrot.lane.b32.xlu0 %v688_v25, %s4083_s1  ;;  %1084 = vmatprep.subr.mxu0 %v4082_v0  ;;  %v962_v25 = vld [vmem:[#allocation6 + $0xa8] sm:$0xff]  ;;  %v711_v2 = vrot.slane %v4552_v51, 1  ;;  %v714_v15 = vrot.slane %v4557_v58, 1  ;;  %v532_v31 = vrot.slane %v453_v60, 7 }
  0x8c   : > { %1085 = vmatpush2.msra.mxu0 %v964_v52  ;;  %v708_v3 = vsel %vm650_vm1, %v706_v40, %v707_v41 }
  0x8d   : > { %761 = vrot.lane.b32.xlu1 %v690_v32, %s4083_s1  ;;  %1086 = vmatprep.subr.mxu0 %v4082_v0  ;;  %v451_v32 = vld [vmem:[%s4293_s12 + $0xd0] sm:$0xff] }
  0x8e   : > { %1087 = vmatpush2.msra.mxu0 %v963_v5  ;;  %v529_v52 = vrot.slane %v451_v32, 7  ;;  %v533_v32 = vrot.slane %v454_v1, 7 }
  0x8f   : > { %763 = vrot.lane.b32.xlu0 %v693_v47, %s4083_s1  ;;  %1088 = vmatprep.subr.mxu0 %v4082_v0  ;;  %v4549_v47 = vsel %vm489_vm0, %v526_v21, %v527_v22  ;;  %v958_v22 = vld [vmem:[#allocation6 + $0x88] sm:$0xff] }
  0x90   : > { %1089 = vmatpush2.msra.mxu0 %v962_v25  ;;  %v712_v5 = vrot.slane %v4549_v47, 1  ;;  %v4570_v21 = vsel %vm489_vm0, %v529_v52, %v530_v53  ;;  %v4574_v25 = vsel %vm489_vm0, 0.0, %v529_v52  ;;  %v4597_v1 = vsel %vm489_vm0, %v533_v32, 0.0 }
  0x91   : > { %765 = vrot.lane.b32.xlu1 %v695_v54, %s4083_s1  ;;  %1090 = vmatprep.subr.mxu0 %v4082_v0  ;;  %v960_v54 = vld [vmem:[#allocation6 + $0x98] sm:$0xff]  ;;  %v717_v52 = vrot.slane %v4570_v21, 1 }
  0x92   : > { %1091 = vmatpush2.msra.mxu0 %v961_v35  ;;  %v455_v35 = vld [vmem:[%s4293_s12 + $0xf0] sm:$0xff]  ;;  %v713_v40 = vsel %vm650_vm1, %v711_v2, %v712_v5 }
  0x93   : > { %767 = vrot.lane.b32.xlu0 %v698_v8, %s4083_s1  ;;  %1092 = vmatprep.subr.mxu0 %v4082_v0  ;;  %v710_v8 = vsel %vm650_vm1, %v707_v41, %v709_v42  ;;  %v715_v41 = vsel %vm650_vm1, %v712_v5, %v714_v15  ;;  %v716_v42 = vrot.slane %v4574_v25, 1  ;;  %v724_v15 = vrot.slane %v4597_v1, 1 }
  0x94   : > { %1093 = vmatpush2.msra.mxu0 %v960_v54  ;;  %v4591_v54 = vsel %vm489_vm0, %v532_v31, %v533_v32 }
  0x95   : > { %769 = vrot.lane.b32.xlu1 %v700_v26, %s4083_s1  ;;  %1094 = vmatprep.subr.mxu0 %v4082_v0  ;;  %v4577_v26 = vsel %vm489_vm0, %v530_v53, 0.0  ;;  %v718_v2 = vsel %vm650_vm1, %v716_v42, %v717_v52 }
  0x96   : > { %1095 = vmatpush2.msra.mxu0 %v959_v59  ;;  %v719_v53 = vrot.slane %v4577_v26, 1  ;;  %v535_v59 = vrot.slane %v455_v35, 7 }
  0x97   : > { %771 = vrot.lane.b32.xlu0 %v703_v39, %s4083_s1  ;;  %1096 = vmatprep.subr.mxu0 %v4082_v0  ;;  %v456_v39 = vld [vmem:[%s4293_s12 + $0xf8] sm:$0xff]  ;;  %s422_s12 = scalar_lea.vmem [#allocation11], %s3267_s29 }
  0x98   : > { %1097 = vmatpush2.msra.mxu0 %v958_v22  ;;  %v536_v60 = vrot.slane %v456_v39, 7  ;;  %s3150_s19 = sshll.u32 %s422_s12, 4  ;;  %s5396_s19 = int_to_ptr.vmem [resolvable:$true] %s3150_s19 }
  0x99   : > { %773 = vrot.lane.b32.xlu1 %v705_v57, %s4083_s1  ;;  %1098 = vmatprep.subr.mxu0 %v4082_v0  ;;  %v4594_v57 = vsel %vm489_vm0, 0.0, %v532_v31  ;;  %v4610_v31 = vsel %vm489_vm0, 0.0, %v535_v59  ;;  %s4002_s27 = scalar_lea.vmem %s5396_s19, 256  ;;  %p4009_p13 = scmp.lt.s32.totalorder %s5396_s19, %s4007_s23 }
  0x9a   : > { %1099 = vmatpush2.msra.mxu0 %v957_v33  ;;  %v721_v5 = vrot.slane %v4594_v57, 1  ;;  %v4607_v22 = vsel %vm489_vm0, %v535_v59, %v536_v60  ;;  %v4613_v32 = vsel %vm489_vm0, %v536_v60, 0.0  ;;  %v726_v35 = vrot.slane %v4610_v31, 1  ;;  %v1724_v59 = vld [vmem:[%s5447_s3 + $0x78] sm:$0xff]  ;;  %v1723_v60 = vld [vmem:[%s5447_s3 + $0x70] sm:$0xff]  ;;  %p4003_p7 = scmp.ne.s32.totalorder %s5396_s19, %s4002_s27 }
  0x9b   : > { %775 = vrot.lane.b32.xlu0 %v708_v3, %s4083_s1  ;;  %v722_v3 = vrot.slane %v4591_v54, 1  ;;  %v727_v39 = vrot.slane %v4607_v22, 1  ;;  %1765 = vmatpush1.msra.mxu1 %v1724_v59 }
  0x9c   : > { %1766 = vmatprep.subr.mxu1 %v4082_v0  ;;  %p4004_p12 = pnand %p4003_p7, %p5484_p1 }
  0x9d   : > { %777 = vrot.lane.b32.xlu1 %v710_v8, %s4083_s1  ;;  %v720_v8 = vsel %vm650_vm1, %v717_v52, %v719_v53  ;;  %v723_v33 = vsel %vm650_vm1, %v721_v5, %v722_v3  ;;  %v728_v42 = vsel %vm650_vm1, %v726_v35, %v727_v39  ;;  %v1756_v53 = vld [vmem:[%s5447_s3 + $0x178] sm:$0xff]  ;;  %v833_v5 = vrot.slane %v4325_v16, 2  ;;  %1767 = vmatpush1.msra.mxu1 %v1723_v60 }
  0x9e   : > { %3566 = vmatprep.subr.mxu0 %v1756_v53  ;;  %1768 = vmatprep.subr.mxu1 %v4082_v0  ;;  %v838_v60 = vrot.slane %v4347_v30, 2  ;;  %p4005_p9 = pneg %p4004_p12 }
  0x9f   : > { %779 = vrot.lane.b32.xlu0 %v713_v40, %s4083_s1  ;;  %v725_v40 = vsel %vm650_vm1, %v722_v3, %v724_v15  ;;  %v834_v3 = vrot.slane %v4331_v20, 2  ;;  %v1722_v15 = vld [vmem:[%s5447_s3 + $0x68] sm:$0xff] }
  0xa0   : > { %1769 = vmatpush1.msra.mxu1 %v1722_v15 }
  0xa1   : > { %781 = vrot.lane.b32.xlu1 %v715_v41, %s4083_s1  ;;  %v729_v41 = vrot.slane %v4613_v32, 1  ;;  %1770 = vmatprep.subr.mxu1 %v4082_v0 }
  0xa3   : > { %783 = vrot.lane.b32.xlu0 %v718_v2, %s4083_s1  ;;  %v730_v52 = vsel %vm650_vm1, %v727_v39, %v729_v41  ;;  %v836_v41 = vrot.slane %v4336_v23, 2 }
  0xa5   : > { %785 = vrot.lane.b32.xlu1 %v720_v8, %s4083_s1  ;;  %v837_v59 = vsel %vm827_vm2, %v834_v3, %v836_v41 }
  0xa7   : > { %787 = vrot.lane.b32.xlu0 %v723_v33, %s4083_s1  ;;  %v1755_v33 = vld [vmem:[%s5447_s3 + $0x170] sm:$0xff] }
  0xa9   : > { %789 = vrot.lane.b32.xlu1 %v725_v40, %s4083_s1  ;;  %v835_v40 = vsel %vm827_vm2, %v833_v5, %v834_v3  ;;  %v1753_v5 = vld [vmem:[%s5447_s3 + $0x160] sm:$0xff] }
  0xab   : > { %791 = vrot.lane.b32.xlu0 %v728_v42, %s4083_s1 }
  0xad   : > { %793 = vrot.lane.b32.xlu1 %v730_v52, %s4083_s1  ;;  %v1754_v52 = vld [vmem:[%s5447_s3 + $0x168] sm:$0xff] }
  0xe1   : > { %v732_v2 = vpop.permute.xlu0 %731 }
  0xe2   : > { %v909_v8 = vsel %vm908_vm3, %v4319_v14, %v732_v2  ;;  %v1721_v14 = vld [vmem:[%s5447_s3 + $0x60] sm:$0xff]  ;;  %v839_v2 = vrot.slane %v4339_v24, 2 }
  0xe3   : > { %1101 = vmatmul.mubr.f32.vlgmr.msra.gmra.mxu0 %v909_v8  ;;  %v736_v35 = vpop.permute.xlu1 %735  ;;  %1771 = vmatpush1.msra.mxu1 %v1721_v14  ;;  %v1717_v8 = vld [vmem:[%s5447_s3 + $0x40] sm:$0xff]  ;;  %v1716_v14 = vld [vmem:[%s5447_s3 + $0x38] sm:$0xff] }
  0xe4   : > { %3270 = vmatprep.mubr.msk.f32.mxu0 %vm908_vm3, %v4526_v12  ;;  %3567 = vmatpush3.msra.mxu0 %v1756_v53  ;;  %v1720_v12 = vld [vmem:[%s5447_s3 + $0x58] sm:$0xff]  ;;  %v911_v23 = vsel %vm908_vm3, %v4325_v16, %v736_v35  ;;  %v1718_v16 = vld [vmem:[%s5447_s3 + $0x48] sm:$0xff]  ;;  %v841_v35 = vrot.slane %v4354_v36, 2 }
  0xe5   : > { %v734_v39 = vpop.permute.xlu0 %733  ;;  %3568 = vmatprep.subr.mxu0 %v1755_v33  ;;  %1772 = vmatprep.subr.mxu1 %v4082_v0 }
  0xe6   : > { %v910_v42 = vsel %vm908_vm3, %v4316_v13, %v734_v39  ;;  %3569 = vmatpush3.msra.mxu0 %v1755_v33  ;;  %v1719_v13 = vld [vmem:[%s5447_s3 + $0x50] sm:$0xff]  ;;  %1773 = vmatpush1.msra.mxu1 %v1720_v12  ;;  %v840_v33 = vsel %vm827_vm2, %v838_v60, %v839_v2  ;;  %v842_v41 = vsel %vm827_vm2, %v839_v2, %v841_v35  ;;  %v844_v12 = vrot.slane %v4365_v48, 2  ;;  %v1712_v2 = vld [vmem:[%s5447_s3 + $0x18] sm:$0xff] }
  0xe7   : > { %1106 = vmatmul.mubr.f32.gmra.mxu0 %v910_v42  ;;  %v738_v53 = vpop.permute.xlu1 %737  ;;  %3570 = vmatprep.subr.mxu0 %v1754_v52  ;;  %v1715_v39 = vld [vmem:[%s5447_s3 + $0x30] sm:$0xff]  ;;  %v843_v42 = vrot.slane %v4368_v49, 2  ;;  %v846_v60 = vrot.slane %v4371_v50, 2 }
  0xe8   : > { %3271 = vmatprep.mubr.msk.f32.mxu0 %vm908_vm3, %v835_v40  ;;  %1774 = vmatprep.subr.mxu1 %v4082_v0  ;;  %v912_v3 = vsel %vm908_vm3, %v4331_v20, %v738_v53  ;;  %v1752_v20 = vld [vmem:[%s5447_s3 + $0x158] sm:$0xff] }
  0xe9   : > { %3571 = vmatpush3.msra.mxu0 %v1754_v52  ;;  %1775 = vmatpush1.msra.mxu1 %v1719_v13  ;;  %v740_v15 = vpop.permute.xlu0 %739  ;;  %v1751_v52 = vld [vmem:[%s5447_s3 + $0x150] sm:$0xff]  ;;  %v1713_v13 = vld [vmem:[%s5447_s3 + $0x20] sm:$0xff] }
  0xea   : > { %1776 = vmatprep.subr.mxu1 %v4082_v0  ;;  %3572 = vmatprep.subr.mxu0 %v1753_v5  ;;  %v913_v36 = vsel %vm908_vm3, %v4347_v30, %v740_v15  ;;  %v1714_v30 = vld [vmem:[%s5447_s3 + $0x28] sm:$0xff]  ;;  %v849_v15 = vrot.slane %v4380_v55, 2 }
  0xeb   : > { %1111 = vmatmul.mubr.f32.gmra.mxu0 %v911_v23  ;;  %1777 = vmatpush1.msra.mxu1 %v1718_v16  ;;  %v742_v40 = vpop.permute.xlu1 %741  ;;  %v1711_v16 = vld [vmem:[%s5447_s3 + $0x10] sm:$0xff] }
  0xec   : > { %3272 = vmatprep.mubr.msk.f32.mxu0 %vm908_vm3, %v837_v59  ;;  %1778 = vmatprep.subr.mxu1 %v4082_v0  ;;  %v914_v23 = vsel %vm908_vm3, %v4339_v24, %v742_v40  ;;  %v845_v59 = vsel %vm827_vm2, %v843_v42, %v844_v12  ;;  %v1750_v24 = vld [vmem:[%s5447_s3 + $0x148] sm:$0xff]  ;;  %v1740_v40 = vld [vmem:[%s5447_s3 + $0xf8] sm:$0xff] }
  0xed   : > { %3573 = vmatpush3.msra.mxu0 %v1753_v5  ;;  %1779 = vmatpush1.msra.mxu1 %v1717_v8  ;;  %v744_v53 = vpop.permute.xlu0 %743  ;;  %v848_v8 = vrot.slane %v4386_v61, 2 }
  0xee   : > { %1780 = vmatprep.subr.mxu1 %v4082_v0  ;;  %3574 = vmatprep.subr.mxu0 %v1752_v20  ;;  %v915_v50 = vsel %vm908_vm3, %v4368_v49, %v744_v53  ;;  %v1710_v49 = vld [vmem:[%s5447_s3 + $0x8] sm:$0xff] }
  0xef   : > { %1116 = vmatmul.mubr.f32.gmra.mxu0 %v912_v3  ;;  %1781 = vmatpush1.msra.mxu1 %v1716_v14  ;;  %v746_v5 = vpop.permute.xlu1 %745  ;;  %v847_v3 = vsel %vm827_vm2, %v844_v12, %v846_v60  ;;  %v1709_v14 = vld [vmem:[%s5447_s3] sm:$0xff]  ;;  %v853_v12 = vrot.slane %v4403_v7, 2  ;;  %v1736_v60 = vld [vmem:[%s5447_s3 + $0xd8] sm:$0xff] }
  0xf0   : > { %3273 = vmatprep.mubr.msk.f32.mxu0 %vm908_vm3, %v840_v33  ;;  %1782 = vmatprep.subr.mxu1 %v4082_v0  ;;  %v1749_v33 = vld [vmem:[%s5447_s3 + $0x140] sm:$0xff]  ;;  %v916_v35 = vsel %vm908_vm3, %v4365_v48, %v746_v5 }
  0xf1   : > { %3575 = vmatpush3.msra.mxu0 %v1752_v20  ;;  %1783 = vmatpush1.msra.mxu1 %v1715_v39  ;;  %v748_v20 = vpop.permute.xlu0 %747  ;;  %v851_v39 = vrot.slane %v4390_v63, 2  ;;  %v1739_v63 = vld [vmem:[%s5447_s3 + $0xf0] sm:$0xff] }
  0xf2   : > { %1784 = vmatprep.subr.mxu1 %v4082_v0  ;;  %3576 = vmatprep.subr.mxu0 %v1751_v52  ;;  %v917_v48 = vsel %vm908_vm3, %v4386_v61, %v748_v20  ;;  %v1738_v61 = vld [vmem:[%s5447_s3 + $0xe8] sm:$0xff]  ;;  %v864_v20 = vrot.slane %v4440_v43, 2 }
  0xf3   : > { %1121 = vmatmul.mubr.f32.gmra.mxu0 %v913_v36  ;;  %1785 = vmatpush1.msra.mxu1 %v1714_v30  ;;  %v850_v36 = vsel %vm827_vm2, %v848_v8, %v849_v15  ;;  %v852_v42 = vsel %vm827_vm2, %v849_v15, %v851_v39  ;;  %v854_v30 = vrot.slane %v4400_v6, 2 }
  0xf4   : > { %3274 = vmatprep.mubr.msk.f32.mxu0 %vm908_vm3, %v842_v41  ;;  %1786 = vmatprep.subr.mxu1 %v4082_v0  ;;  %v750_v41 = vpop.permute.xlu1 %749 }
  0xf5   : > { %3577 = vmatpush3.msra.mxu0 %v1751_v52  ;;  %1787 = vmatpush1.msra.mxu1 %v1713_v13  ;;  %v918_v52 = vsel %vm908_vm3, %v4380_v55, %v750_v41  ;;  %v752_v13 = vpop.permute.xlu0 %751  ;;  %v855_v53 = vsel %vm827_vm2, %v853_v12, %v854_v30  ;;  %v868_v41 = vrot.slane %v4460_v62, 2 }
  0xf6   : > { %1788 = vmatprep.subr.mxu1 %v4082_v0  ;;  %3578 = vmatprep.subr.mxu0 %v1750_v24  ;;  %v919_v55 = vsel %vm908_vm3, %v4403_v7, %v752_v13  ;;  %v1734_v7 = vld [vmem:[%s5447_s3 + $0xc8] sm:$0xff]  ;;  %v874_v13 = vrot.slane %v4481_v28, 2 }
  0xf7   : > { %1126 = vmatmul.mubr.f32.gmra.mxu0 %v914_v23  ;;  %1789 = vmatpush1.msra.mxu1 %v1712_v2  ;;  %v1737_v23 = vld [vmem:[%s5447_s3 + $0xe0] sm:$0xff] }
  0xf8   : > { %3275 = vmatprep.mubr.msk.f32.mxu0 %vm908_vm3, %v845_v59  ;;  %1790 = vmatprep.subr.mxu1 %v4082_v0  ;;  %v856_v59 = vrot.slane %v4411_v19, 2  ;;  %v1735_v19 = vld [vmem:[%s5447_s3 + $0xd0] sm:$0xff]  ;;  %v754_v2 = vpop.permute.xlu1 %753 }
  0xf9   : > { %3579 = vmatpush3.msra.mxu0 %v1750_v24  ;;  %1791 = vmatpush1.msra.mxu1 %v1711_v16  ;;  %v859_v16 = vrot.slane %v4426_v34, 2  ;;  %v920_v5 = vsel %vm908_vm3, %v4400_v6, %v754_v2  ;;  %v756_v8 = vpop.permute.xlu0 %755 }
  0xfa   : > { %1792 = vmatprep.subr.mxu1 %v4082_v0  ;;  %3580 = vmatprep.subr.mxu0 %v1749_v33  ;;  %v857_v24 = vsel %vm827_vm2, %v854_v30, %v856_v59  ;;  %v921_v6 = vsel %vm908_vm3, %v4420_v27, %v756_v8  ;;  %v871_v30 = vrot.slane %v4471_v11, 2  ;;  %v1732_v11 = vld [vmem:[%s5447_s3 + $0xb8] sm:$0xff] }
  0xfb   : > { %1131 = vmatmul.mubr.f32.gmra.mxu0 %v915_v50  ;;  %1793 = vmatpush1.msra.mxu1 %v1710_v49  ;;  %v858_v50 = vrot.slane %v4420_v27, 2  ;;  %v861_v49 = vrot.slane %v4430_v37, 2  ;;  %v866_v27 = vrot.slane %v4451_v56, 2  ;;  %v1728_v8 = vld [vmem:[%s5447_s3 + $0x98] sm:$0xff] }
  0xfc   : > { %3276 = vmatprep.mubr.msk.f32.mxu0 %vm908_vm3, %v847_v3  ;;  %1794 = vmatprep.subr.mxu1 %v4082_v0  ;;  %v1733_v3 = vld [vmem:[%s5447_s3 + $0xc0] sm:$0xff] }
  0xfd   : > { %3581 = vmatpush3.msra.mxu0 %v1749_v33  ;;  %1795 = vmatpush1.msra.mxu1 %v1709_v14  ;;  %v860_v15 = vsel %vm827_vm2, %v858_v50, %v859_v16  ;;  %v758_v33 = vpop.permute.xlu1 %757  ;;  %v863_v14 = vrot.slane %v4443_v44, 2 }
  0xfe   : > { %1796 = vmatprep.subr.mxu1 %v4082_v0  ;;  %v922_v37 = vsel %vm908_vm3, %v4426_v34, %v758_v33  ;;  %v881_v33 = vrot.slane %v4516_v4, 2  ;;  %v1742_v4 = vld [vmem:[%s5447_s3 + $0x108] sm:$0xff] }
  0xff   : > { %1136 = vmatmul.mubr.f32.gmra.mxu0 %v916_v35  ;;  %1797 = vmatpush2.msra.mxu1 %v1740_v40  ;;  %v862_v35 = vsel %vm827_vm2, %v859_v16, %v861_v49  ;;  %v865_v39 = vsel %vm827_vm2, %v863_v14, %v864_v20  ;;  %v1727_v14 = vld [vmem:[%s5447_s3 + $0x90] sm:$0xff] }
 0x100   : > { %3277 = vmatprep.mubr.msk.f32.mxu0 %vm908_vm3, %v850_v36  ;;  %1798 = vmatprep.subr.mxu1 %v4082_v0  ;;  %v760_v36 = vpop.permute.xlu0 %759 }
 0x101   : > { %1799 = vmatpush2.msra.mxu1 %v1739_v63  ;;  %v923_v40 = vsel %vm908_vm3, %v4443_v44, %v760_v36  ;;  %v867_v63 = vsel %vm827_vm2, %v864_v20, %v866_v27  ;;  %v883_v36 = vrot.slane %v4522_v9, 2  ;;  %v1726_v27 = vld [vmem:[%s5447_s3 + $0x88] sm:$0xff] }
 0x102   : > { %1800 = vmatprep.subr.mxu1 %v4082_v0 }
 0x103   : > { %1141 = vmatmul.mubr.f32.gmra.mxu0 %v917_v48  ;;  %1801 = vmatpush2.msra.mxu1 %v1738_v61  ;;  %v762_v48 = vpop.permute.xlu1 %761 }
 0x104   : > { %3278 = vmatprep.mubr.msk.f32.mxu0 %vm908_vm3, %v852_v42  ;;  %1802 = vmatprep.subr.mxu1 %v4082_v0  ;;  %v869_v42 = vrot.slane %v4468_v10, 2  ;;  %v924_v34 = vsel %vm908_vm3, %v4440_v43, %v762_v48  ;;  %v764_v56 = vpop.permute.xlu0 %763  ;;  %v1748_v43 = vld [vmem:[%s5447_s3 + $0x138] sm:$0xff] }
 0x105   : > { %1803 = vmatpush2.msra.mxu1 %v1737_v23  ;;  %v925_v44 = vsel %vm908_vm3, %v4460_v62, %v764_v56  ;;  %v873_v23 = vrot.slane %v4484_v29, 2  ;;  %3582 = vmatprep.subr.mxu0 %v1748_v43 }
 0x106   : > { %1804 = vmatprep.subr.mxu1 %v4082_v0  ;;  %v870_v12 = vsel %vm827_vm2, %v868_v41, %v869_v42  ;;  %3583 = vmatpush3.msra.mxu0 %v1748_v43  ;;  %v894_v43 = vrot.slane %v4570_v21, 2 }
 0x107   : > { %1146 = vmatmul.mubr.f32.gmra.mxu0 %v918_v52  ;;  %1805 = vmatpush2.msra.mxu1 %v1736_v60  ;;  %v766_v61 = vpop.permute.xlu1 %765  ;;  %v872_v52 = vsel %vm827_vm2, %v869_v42, %v871_v30  ;;  %v875_v60 = vsel %vm827_vm2, %v873_v23, %v874_v13  ;;  %v886_v42 = vrot.slane %v4533_v18, 2  ;;  %v889_v30 = vrot.slane %v4549_v47, 2 }
 0x108   : > { %3279 = vmatprep.mubr.msk.f32.mxu0 %vm908_vm3, %v855_v53  ;;  %1806 = vmatprep.subr.mxu1 %v4082_v0  ;;  %v926_v62 = vsel %vm908_vm3, %v4468_v10, %v766_v61  ;;  %v1747_v53 = vld [vmem:[%s5447_s3 + $0x130] sm:$0xff]  ;;  %v768_v59 = vpop.permute.xlu0 %767  ;;  %v1746_v10 = vld [vmem:[%s5447_s3 + $0x128] sm:$0xff]  ;;  %v891_v61 = vrot.slane %v4557_v58, 2 }
 0x109   : > { %1807 = vmatpush2.msra.mxu1 %v1735_v19  ;;  %v1731_v19 = vld [vmem:[%s5447_s3 + $0xb0] sm:$0xff]  ;;  %3584 = vmatprep.subr.mxu0 %v1747_v53  ;;  %v927_v2 = vsel %vm908_vm3, %v4484_v29, %v768_v59  ;;  %v1744_v29 = vld [vmem:[%s5447_s3 + $0x118] sm:$0xff] }
 0x10a   : > { %1808 = vmatprep.subr.mxu1 %v4082_v0  ;;  %3585 = vmatpush3.msra.mxu0 %v1747_v53  ;;  %v892_v23 = vsel %vm827_vm2, %v889_v30, %v891_v61 }
 0x10b   : > { %1151 = vmatmul.mubr.f32.gmra.mxu0 %v919_v55  ;;  %1809 = vmatpush2.msra.mxu1 %v1734_v7  ;;  %v876_v55 = vrot.slane %v4491_v38, 2  ;;  %v1730_v38 = vld [vmem:[%s5447_s3 + $0xa8] sm:$0xff]  ;;  %v770_v50 = vpop.permute.xlu1 %769  ;;  %v878_v7 = vrot.slane %v4501_v46, 2 }
 0x10c   : > { %3280 = vmatprep.mubr.msk.f32.mxu0 %vm908_vm3, %v857_v24  ;;  %1810 = vmatprep.subr.mxu1 %v4082_v0  ;;  %v1745_v24 = vld [vmem:[%s5447_s3 + $0x120] sm:$0xff]  ;;  %v772_v49 = vpop.permute.xlu0 %771 }
 0x10d   : > { %1811 = vmatpush2.msra.mxu1 %v1733_v3  ;;  %v877_v16 = vsel %vm827_vm2, %v874_v13, %v876_v55  ;;  %3586 = vmatprep.subr.mxu0 %v1746_v10  ;;  %v1729_v3 = vld [vmem:[%s5447_s3 + $0xa0] sm:$0xff]  ;;  %v893_v13 = vrot.slane %v4574_v25, 2  ;;  %v899_v55 = vrot.slane %v4591_v54, 2 }
 0x10e   : > { %1812 = vmatprep.subr.mxu1 %v4082_v0  ;;  %3587 = vmatpush3.msra.mxu0 %v1746_v10  ;;  %v901_v10 = vrot.slane %v4597_v1, 2 }
 0x10f   : > { %1156 = vmatmul.mubr.f32.gmra.mxu0 %v920_v5  ;;  %1813 = vmatpush2.msra.mxu1 %v1732_v11  ;;  %v879_v5 = vrot.slane %v4498_v45, 2  ;;  %v774_v20 = vpop.permute.xlu1 %773  ;;  %v895_v11 = vsel %vm827_vm2, %v893_v13, %v894_v43 }
 0x110   : > { %3281 = vmatprep.mubr.msk.f32.mxu0 %vm908_vm3, %v860_v15  ;;  %1814 = vmatprep.subr.mxu1 %v4082_v0  ;;  %v928_v15 = vsel %vm908_vm3, %v4481_v28, %v770_v50  ;;  %v929_v28 = vsel %vm908_vm3, %v4501_v46, %v772_v49  ;;  %v1741_v46 = vld [vmem:[%s5447_s3 + $0x100] sm:$0xff]  ;;  %v930_v48 = vsel %vm908_vm3, %v4498_v45, %v774_v20  ;;  %v904_v50 = vrot.slane %v4607_v22, 2 }
 0x111   : > { %1815 = vmatpush2.msra.mxu1 %v1731_v19  ;;  %3588 = vmatprep.subr.mxu0 %v1745_v24 }
 0x112   : > { %1816 = vmatprep.subr.mxu1 %v4082_v0  ;;  %3589 = vmatpush3.msra.mxu0 %v1745_v24  ;;  %v903_v24 = vrot.slane %v4610_v31, 2 }
 0x113   : > { %1161 = vmatmul.mubr.f32.gmra.mxu0 %v921_v6  ;;  %1817 = vmatpush2.msra.mxu1 %v1730_v38  ;;  %v880_v6 = vsel %vm827_vm2, %v878_v7, %v879_v5  ;;  %v778_v56 = vpop.permute.xlu1 %777  ;;  %v906_v7 = vrot.slane %v4613_v32, 2  ;;  %v4977_v32 = vld [vmem:[%s5446_s2] ss:$0 sm:$0xff] }
 0x114   : > { %3282 = vmatprep.mubr.msk.f32.mxu0 %vm908_vm3, %v862_v35  ;;  %1818 = vmatprep.subr.mxu1 %v4082_v0  ;;  %v1743_v35 = vld [vmem:[%s5447_s3 + $0x110] sm:$0xff] }
 0x115   : > { %1819 = vmatpush2.msra.mxu1 %v1729_v3  ;;  %3590 = vmatprep.subr.mxu0 %v1744_v29  ;;  %v907_v3 = vsel %vm827_vm2, %v904_v50, %v906_v7 }
 0x116   : > { %1820 = vmatprep.subr.mxu1 %v4082_v0  ;;  %3591 = vmatpush3.msra.mxu0 %v1744_v29 }
 0x117   : > { %1166 = vmatmul.mubr.f32.gmra.mxu0 %v922_v37  ;;  %1821 = vmatpush2.msra.mxu1 %v1728_v8  ;;  %v882_v37 = vsel %vm827_vm2, %v879_v5, %v881_v33 }
 0x118   : > { %3283 = vmatprep.mubr.msk.f32.mxu0 %vm908_vm3, %v865_v39  ;;  %1822 = vmatprep.subr.mxu1 %v4082_v0  ;;  %v884_v39 = vrot.slane %v4530_v17, 2 }
 0x119   : > { %3592 = vmatprep.subr.mxu0 %v1743_v35  ;;  %1823 = vmatpush2.msra.mxu1 %v1727_v14 }
 0x11a   : > { %3593 = vmatpush3.msra.mxu0 %v1743_v35  ;;  %1824 = vmatprep.subr.mxu1 %v4082_v0  ;;  %v885_v41 = vsel %vm827_vm2, %v883_v36, %v884_v39  ;;  %v887_v45 = vsel %vm827_vm2, %v884_v39, %v886_v42 }
 0x11b   : > { %1171 = vmatmul.mubr.f32.gmra.mxu0 %v923_v40  ;;  %3594 = vmatprep.subr.mxu0 %v1742_v4  ;;  %v1725_v40 = vld [vmem:[%s5447_s3 + $0x80] sm:$0xff] }
 0x11c   : > { %3284 = vmatprep.mubr.msk.f32.mxu0 %vm908_vm3, %v867_v63  ;;  %1825 = vmatpush2.msra.mxu1 %v1726_v27  ;;  %v776_v63 = vpop.permute.xlu0 %775 }
 0x11d   : > { %3595 = vmatpush3.msra.mxu0 %v1742_v4  ;;  %1826 = vmatprep.subr.mxu1 %v4082_v0  ;;  %v932_v0 = vsel %vm908_vm3, %v4530_v17, %v778_v56  ;;  %v2372_v56 = vld [vmem:[%s5449_s5 + $0x78] sm:$0xff] }
 0x11e   : > { %3596 = vmatprep.subr.mxu0 %v1741_v46  ;;  %1827 = vmatpush2.msra.mxu1 %v1725_v40 }
 0x11f   : > { %1176 = vmatmul.mubr.f32.gmra.mxu0 %v924_v34  ;;  %v931_v34 = vsel %vm908_vm3, %v4522_v9, %v776_v63  ;;  %3646 = vmatprep.subr.mxu1 %v2372_v56 }
 0x120   : > { %3285 = vmatprep.mubr.msk.f32.mxu0 %vm908_vm3, %v870_v12  ;;  %3597 = vmatpush3.msra.mxu0 %v1741_v46  ;;  %v888_v12 = vrot.slane %v4552_v51, 2  ;;  %v780_v18 = vpop.permute.xlu0 %779 }
 0x121   : > { %v933_v9 = vsel %vm908_vm3, %v4552_v51, %v780_v18 }
 0x123   : > { %1181 = vmatmul.mubr.f32.gmra.mxu0 %v925_v44  ;;  %v890_v44 = vsel %vm827_vm2, %v888_v12, %v889_v30 }
 0x124   : > { %3286 = vmatprep.mubr.msk.f32.mxu0 %vm908_vm3, %v872_v52  ;;  %v782_v52 = vpop.permute.xlu1 %781  ;;  %v784_v58 = vpop.permute.xlu0 %783 }
 0x125   : > { %v934_v17 = vsel %vm908_vm3, %v4549_v47, %v782_v52  ;;  %v935_v51 = vsel %vm908_vm3, %v4574_v25, %v784_v58 }
 0x127   : > { %1186 = vmatmul.mubr.f32.gmra.mxu0 %v926_v62  ;;  %v896_v62 = vrot.slane %v4577_v26, 2 }
 0x128   : > { %3287 = vmatprep.mubr.msk.f32.mxu0 %vm908_vm3, %v875_v60  ;;  %v786_v53 = vpop.permute.xlu1 %785  ;;  %v898_v60 = vrot.slane %v4594_v57, 2  ;;  %v788_v26 = vpop.permute.xlu0 %787 }
 0x129   : > { %v897_v59 = vsel %vm827_vm2, %v894_v43, %v896_v62  ;;  %v936_v47 = vsel %vm908_vm3, %v4570_v21, %v786_v53  ;;  %v937_v25 = vsel %vm908_vm3, %v4594_v57, %v788_v26 }
 0x12a   : > { %v900_v19 = vsel %vm827_vm2, %v898_v60, %v899_v55 }
 0x12b   : > { %1191 = vmatmul.mubr.f32.gmra.mxu0 %v927_v2  ;;  %v902_v2 = vsel %vm827_vm2, %v899_v55, %v901_v10 }
 0x12c   : > { %3288 = vmatprep.mubr.msk.f32.mxu0 %vm908_vm3, %v877_v16  ;;  %v790_v38 = vpop.permute.xlu1 %789  ;;  %v792_v1 = vpop.permute.xlu0 %791  ;;  %v905_v16 = vsel %vm827_vm2, %v903_v24, %v904_v50 }
 0x12d   : > { %v938_v21 = vsel %vm908_vm3, %v4591_v54, %v790_v38  ;;  %v939_v57 = vsel %vm908_vm3, %v4610_v31, %v792_v1 }
 0x12f   : > { %1196 = vmatmul.mubr.f32.gmra.mxu0 %v928_v15 }
 0x130   : > { %3289 = vmatprep.mubr.msk.f32.mxu0 %vm908_vm3, %v880_v6  ;;  %v794_v5 = vpop.permute.xlu1 %793 }
 0x131   : > { %v940_v54 = vsel %vm908_vm3, %v4607_v22, %v794_v5 }
 0x133   : > { %1201 = vmatmul.mubr.f32.gmra.mxu0 %v929_v28 }
 0x134   : > { %3290 = vmatprep.mubr.msk.f32.mxu0 %vm908_vm3, %v882_v37 }
 0x137   : > { %1206 = vmatmul.mubr.f32.gmra.mxu0 %v930_v48 }
 0x138   : > { %3291 = vmatprep.mubr.msk.f32.mxu0 %vm908_vm3, %v885_v41 }
 0x13b   : > { %1211 = vmatmul.mubr.f32.gmra.mxu0 %v931_v34 }
 0x13c   : > { %3292 = vmatprep.mubr.msk.f32.mxu0 %vm908_vm3, %v887_v45 }
 0x13f   : > { %1216 = vmatmul.mubr.f32.gmra.mxu0 %v932_v0 }
 0x140   : > { %3293 = vmatprep.mubr.msk.f32.mxu0 %vm908_vm3, %v890_v44 }
 0x143   : > { %1221 = vmatmul.mubr.f32.gmra.mxu0 %v933_v9 }
 0x144   : > { %3294 = vmatprep.mubr.msk.f32.mxu0 %vm908_vm3, %v892_v23  ;;  %v2371_v23 = vld [vmem:[%s5449_s5 + $0x70] sm:$0xff] }
 0x147   : > { %1226 = vmatmul.mubr.f32.gmra.mxu0 %v934_v17 }
 0x148   : > { %3295 = vmatprep.mubr.msk.f32.mxu0 %vm908_vm3, %v895_v11 }
 0x14b   : > { %1231 = vmatmul.mubr.f32.gmra.mxu0 %v935_v51 }
 0x14c   : > { %3296 = vmatprep.mubr.msk.f32.mxu0 %vm908_vm3, %v897_v59 }
 0x14f   : > { %1236 = vmatmul.mubr.f32.gmra.mxu0 %v936_v47 }
 0x150   : > { %3297 = vmatprep.mubr.msk.f32.mxu0 %vm908_vm3, %v900_v19 }
 0x153   : > { %1241 = vmatmul.mubr.f32.gmra.mxu0 %v937_v25 }
 0x154   : > { %3298 = vmatprep.mubr.msk.f32.mxu0 %vm908_vm3, %v902_v2 }
 0x157   : > { %1246 = vmatmul.mubr.f32.gmra.mxu0 %v938_v21 }
 0x158   : > { %3299 = vmatprep.mubr.msk.f32.mxu0 %vm908_vm3, %v905_v16 }
 0x15b   : > { %1251 = vmatmul.mubr.f32.gmra.mxu0 %v939_v57 }
 0x15c   : > { %3300 = vmatprep.mubr.msk.f32.mxu0 %vm908_vm3, %v907_v3 }
 0x15f   : > { %1256 = vmatmul.mubr.f32.gmra.mxu0 %v940_v54 }
 0x1a3   : > { %v1102_v29 = vpop.f32.mrf.mxu0 }
 0x1a4   : > { %v1103_v8 = vadd.f32 %v4977_v32, %v1102_v29 }
 0x1a5   : > { %v1104_v15 = vpop.f32.mrf.mxu0 }
 0x1a6   : > { %v1261_v31 = vmax.f32 %v1103_v8, 0.0 }
 0x1a7   : > { %v1107_v49 = vpop.f32.mrf.mxu0 }
 0x1a8   : > { %v1325_v6 = vrot.slane %v1261_v31, 7  ;;  %v1108_v33 = vadd.f32 %v4977_v32, %v1107_v49 }
 0x1a9   : > { %v1109_v35 = vpop.f32.mrf.mxu0 }
 0x1aa   : > { %v1262_v14 = vmax.f32 %v1108_v33, 0.0  ;;  %v1421_v28 = vsel %vm489_vm0, 0.0, %v1325_v6 }
 0x1ab   : > { %v1112_v22 = vpop.f32.mrf.mxu0  ;;  %v1485_v36 = vrot.slane %v1421_v28, 1  ;;  %v1597_v40 = vrot.slane %v1421_v28, 2 }
 0x1ac   : > { %v1326_v4 = vrot.slane %v1262_v14, 7  ;;  %v1113_v20 = vadd.f32 %v4977_v32, %v1112_v22 }
 0x1ad   : > { %v1114_v37 = vpop.f32.mrf.mxu0 }
 0x1ae   : > { %v1327_v39 = vsel %vm489_vm0, %v1325_v6, %v1326_v4  ;;  %v1437_v27 = vsel %vm489_vm0, %v1326_v4, 0.0  ;;  %v1263_v46 = vmax.f32 %v1113_v20, 0.0 }
 0x1af   : > { %v1488_v48 = vrot.slane %v1437_v27, 1  ;;  %v1600_v63 = vrot.slane %v1437_v27, 2  ;;  %v1117_v41 = vpop.f32.mrf.mxu0  ;;  %v1486_v42 = vrot.slane %v1327_v39, 1  ;;  %v1598_v34 = vrot.slane %v1327_v39, 2 }
 0x1b0   : > { %v1328_v45 = vrot.slane %v1263_v46, 7  ;;  %v1118_v12 = vadd.f32 %v4977_v32, %v1117_v41 }
 0x1b1   : > { %v1119_v0 = vpop.f32.mrf.mxu0  ;;  %v1487_v18 = vsel %vm650_vm1, %v1485_v36, %v1486_v42  ;;  %v1599_v44 = vsel %vm827_vm2, %v1597_v40, %v1598_v34  ;;  %v1601_v61 = vsel %vm827_vm2, %v1598_v34, %v1600_v63  ;;  %v1489_v43 = vsel %vm650_vm1, %v1486_v42, %v1488_v48 }
 0x1b2   : > { %v1422_v9 = vsel %vm489_vm0, 0.0, %v1328_v45  ;;  %v1264_v52 = vmax.f32 %v1118_v12, 0.0  ;;  %1828 = vmatprep.mubr.f32.mxu1 %v1487_v18  ;;  %3598 = vmatprep.mubr.f32.mxu0 %v1599_v44 }
 0x1b3   : > { %v1122_v13 = vpop.f32.mrf.mxu0  ;;  %3303 = vmatmul.mubr.msk.f32.vlgmr.msra.gmra.mxu1 %vm4990_vm4, %v1325_v6  ;;  %3599 = vmatmul.mubr.f32.vlgmr.msra.gmra.mxu0 %v1601_v61  ;;  %v1490_v62 = vrot.slane %v1422_v9, 1  ;;  %v1602_v60 = vrot.slane %v1422_v9, 2 }
 0x1b4   : > { %v1329_v17 = vrot.slane %v1264_v52, 7  ;;  %v1123_v58 = vadd.f32 %v4977_v32, %v1122_v13  ;;  %1833 = vmatprep.mubr.f32.mxu1 %v1489_v43  ;;  %3647 = vmatpush3.msra.mxu1 %v2372_v56 }
 0x1b5   : > { %v1124_v11 = vpop.f32.mrf.mxu0  ;;  %3648 = vmatprep.subr.mxu1 %v2371_v23 }
 0x1b6   : > { %v1330_v51 = vsel %vm489_vm0, %v1328_v45, %v1329_v17  ;;  %v1438_v53 = vsel %vm489_vm0, %v1329_v17, 0.0  ;;  %v1265_v59 = vmax.f32 %v1123_v58, 0.0  ;;  %3649 = vmatpush3.msra.mxu1 %v2371_v23 }
 0x1b7   : > { %v1493_v55 = vrot.slane %v1438_v53, 1  ;;  %v1605_v47 = vrot.slane %v1438_v53, 2  ;;  %v1127_v26 = vpop.f32.mrf.mxu0  ;;  %1834 = vmatmul.mubr.f32.gmra.mxu1 %v1327_v39  ;;  %v1491_v19 = vrot.slane %v1330_v51, 1  ;;  %v1603_v10 = vrot.slane %v1330_v51, 2 }
 0x1b8   : > { %v1331_v25 = vrot.slane %v1265_v59, 7  ;;  %v1128_v38 = vadd.f32 %v4977_v32, %v1127_v26 }
 0x1b9   : > { %v1129_v2 = vpop.f32.mrf.mxu0  ;;  %v1492_v24 = vsel %vm650_vm1, %v1490_v62, %v1491_v19  ;;  %v1604_v50 = vsel %vm827_vm2, %v1602_v60, %v1603_v10  ;;  %v1606_v21 = vsel %vm827_vm2, %v1603_v10, %v1605_v47  ;;  %v1494_v57 = vsel %vm650_vm1, %v1491_v19, %v1493_v55 }
 0x1ba   : > { %v1423_v1 = vsel %vm489_vm0, 0.0, %v1331_v25  ;;  %v1266_v16 = vmax.f32 %v1128_v38, 0.0  ;;  %1838 = vmatprep.mubr.f32.mxu1 %v1492_v24  ;;  %3601 = vmatprep.mubr.f32.mxu0 %v1604_v50 }
 0x1bb   : > { %v1132_v7 = vpop.f32.mrf.mxu0  ;;  %3305 = vmatmul.mubr.msk.f32.gmra.mxu1 %vm4990_vm4, %v1328_v45  ;;  %3602 = vmatmul.mubr.f32.gmra.mxu0 %v1606_v21  ;;  %v1495_v29 = vrot.slane %v1423_v1, 1  ;;  %v1607_v49 = vrot.slane %v1423_v1, 2 }
 0x1bc   : > { %v1332_v5 = vrot.slane %v1266_v16, 7  ;;  %v1133_v3 = vadd.f32 %v4977_v32, %v1132_v7  ;;  %1843 = vmatprep.mubr.f32.mxu1 %v1494_v57 }
 0x1bd   : > { %v1134_v54 = vpop.f32.mrf.mxu0 }
 0x1be   : > { %v1333_v8 = vsel %vm489_vm0, %v1331_v25, %v1332_v5  ;;  %v1439_v15 = vsel %vm489_vm0, %v1332_v5, 0.0  ;;  %v1267_v31 = vmax.f32 %v1133_v3, 0.0 }
 0x1bf   : > { %v1498_v6 = vrot.slane %v1439_v15, 1  ;;  %v1610_v33 = vrot.slane %v1439_v15, 2  ;;  %v1137_v35 = vpop.f32.mrf.mxu0  ;;  %1844 = vmatmul.mubr.f32.gmra.mxu1 %v1330_v51  ;;  %v1496_v14 = vrot.slane %v1333_v8, 1  ;;  %v1608_v28 = vrot.slane %v1333_v8, 2 }
 0x1c0   : > { %v1334_v22 = vrot.slane %v1267_v31, 7  ;;  %v1138_v4 = vadd.f32 %v4977_v32, %v1137_v35 }
 0x1c1   : > { %v1139_v20 = vpop.f32.mrf.mxu0  ;;  %v1497_v37 = vsel %vm650_vm1, %v1495_v29, %v1496_v14  ;;  %v1609_v36 = vsel %vm827_vm2, %v1607_v49, %v1608_v28  ;;  %v1611_v39 = vsel %vm827_vm2, %v1608_v28, %v1610_v33  ;;  %v1499_v48 = vsel %vm650_vm1, %v1496_v14, %v1498_v6 }
 0x1c2   : > { %v1424_v27 = vsel %vm489_vm0, 0.0, %v1334_v22  ;;  %v1268_v46 = vmax.f32 %v1138_v4, 0.0  ;;  %1848 = vmatprep.mubr.f32.mxu1 %v1497_v37  ;;  %3604 = vmatprep.mubr.f32.mxu0 %v1609_v36 }
 0x1c3   : > { %v1142_v40 = vpop.f32.mrf.mxu0  ;;  %3307 = vmatmul.mubr.msk.f32.gmra.mxu1 %vm4990_vm4, %v1331_v25  ;;  %3605 = vmatmul.mubr.f32.gmra.mxu0 %v1611_v39  ;;  %v1500_v34 = vrot.slane %v1424_v27, 1  ;;  %v1612_v0 = vrot.slane %v1424_v27, 2 }
 0x1c4   : > { %v1335_v63 = vrot.slane %v1268_v46, 7  ;;  %v1143_v41 = vadd.f32 %v4977_v32, %v1142_v40  ;;  %1853 = vmatprep.mubr.f32.mxu1 %v1499_v48 }
 0x1c5   : > { %v1144_v42 = vpop.f32.mrf.mxu0 }
 0x1c6   : > { %v1336_v56 = vsel %vm489_vm0, %v1334_v22, %v1335_v63  ;;  %v1440_v45 = vsel %vm489_vm0, %v1335_v63, 0.0  ;;  %v1269_v12 = vmax.f32 %v1143_v41, 0.0 }
 0x1c7   : > { %v1503_v18 = vrot.slane %v1440_v45, 1  ;;  %v1615_v44 = vrot.slane %v1440_v45, 2  ;;  %v1147_v61 = vpop.f32.mrf.mxu0  ;;  %1854 = vmatmul.mubr.f32.gmra.mxu1 %v1333_v8  ;;  %v1501_v9 = vrot.slane %v1336_v56, 1  ;;  %v1613_v52 = vrot.slane %v1336_v56, 2 }
 0x1c8   : > { %v1337_v23 = vrot.slane %v1269_v12, 7  ;;  %v1148_v13 = vadd.f32 %v4977_v32, %v1147_v61 }
 0x1c9   : > { %v1149_v43 = vpop.f32.mrf.mxu0  ;;  %v1502_v17 = vsel %vm650_vm1, %v1500_v34, %v1501_v9  ;;  %v1614_v58 = vsel %vm827_vm2, %v1612_v0, %v1613_v52  ;;  %v1616_v11 = vsel %vm827_vm2, %v1613_v52, %v1615_v44  ;;  %v1504_v59 = vsel %vm650_vm1, %v1501_v9, %v1503_v18 }
 0x1ca   : > { %v1425_v62 = vsel %vm489_vm0, 0.0, %v1337_v23  ;;  %v1270_v51 = vmax.f32 %v1148_v13, 0.0  ;;  %1858 = vmatprep.mubr.f32.mxu1 %v1502_v17  ;;  %3607 = vmatprep.mubr.f32.mxu0 %v1614_v58 }
 0x1cb   : > { %v1152_v53 = vpop.f32.mrf.mxu0  ;;  %3309 = vmatmul.mubr.msk.f32.gmra.mxu1 %vm4990_vm4, %v1334_v22  ;;  %3608 = vmatmul.mubr.f32.gmra.mxu0 %v1616_v11  ;;  %v1505_v26 = vrot.slane %v1425_v62, 1  ;;  %v1617_v38 = vrot.slane %v1425_v62, 2 }
 0x1cc   : > { %v1338_v60 = vrot.slane %v1270_v51, 7  ;;  %v1153_v55 = vadd.f32 %v4977_v32, %v1152_v53  ;;  %1863 = vmatprep.mubr.f32.mxu1 %v1504_v59 }
 0x1cd   : > { %v1154_v47 = vpop.f32.mrf.mxu0 }
 0x1ce   : > { %v1339_v19 = vsel %vm489_vm0, %v1337_v23, %v1338_v60  ;;  %v1441_v10 = vsel %vm489_vm0, %v1338_v60, 0.0  ;;  %v1271_v25 = vmax.f32 %v1153_v55, 0.0 }
 0x1cf   : > { %v1508_v2 = vrot.slane %v1441_v10, 1  ;;  %v1620_v24 = vrot.slane %v1441_v10, 2  ;;  %v1157_v50 = vpop.f32.mrf.mxu0  ;;  %1864 = vmatmul.mubr.f32.gmra.mxu1 %v1336_v56  ;;  %v1506_v21 = vrot.slane %v1339_v19, 1  ;;  %v1618_v1 = vrot.slane %v1339_v19, 2 }
 0x1d0   : > { %v1340_v16 = vrot.slane %v1271_v25, 7  ;;  %v1158_v7 = vadd.f32 %v4977_v32, %v1157_v50 }
 0x1d1   : > { %v1159_v57 = vpop.f32.mrf.mxu0  ;;  %v1507_v5 = vsel %vm650_vm1, %v1505_v26, %v1506_v21  ;;  %v1619_v3 = vsel %vm827_vm2, %v1617_v38, %v1618_v1  ;;  %v1621_v54 = vsel %vm827_vm2, %v1618_v1, %v1620_v24  ;;  %v1509_v31 = vsel %vm650_vm1, %v1506_v21, %v1508_v2 }
 0x1d2   : > { %v1426_v29 = vsel %vm489_vm0, 0.0, %v1340_v16  ;;  %v1272_v8 = vmax.f32 %v1158_v7, 0.0  ;;  %1868 = vmatprep.mubr.f32.mxu1 %v1507_v5  ;;  %3610 = vmatprep.mubr.f32.mxu0 %v1619_v3 }
 0x1d3   : > { %v1162_v15 = vpop.f32.mrf.mxu0  ;;  %3311 = vmatmul.mubr.msk.f32.gmra.mxu1 %vm4990_vm4, %v1337_v23  ;;  %3611 = vmatmul.mubr.f32.gmra.mxu0 %v1621_v54  ;;  %v1510_v35 = vrot.slane %v1426_v29, 1  ;;  %v1622_v4 = vrot.slane %v1426_v29, 2 }
 0x1d4   : > { %v1341_v49 = vrot.slane %v1272_v8, 7  ;;  %v1163_v6 = vadd.f32 %v4977_v32, %v1162_v15  ;;  %1873 = vmatprep.mubr.f32.mxu1 %v1509_v31 }
 0x1d5   : > { %v1164_v33 = vpop.f32.mrf.mxu0 }
 0x1d6   : > { %v1342_v14 = vsel %vm489_vm0, %v1340_v16, %v1341_v49  ;;  %v1442_v28 = vsel %vm489_vm0, %v1341_v49, 0.0  ;;  %v1273_v22 = vmax.f32 %v1163_v6, 0.0 }
 0x1d7   : > { %v1513_v20 = vrot.slane %v1442_v28, 1  ;;  %v1625_v37 = vrot.slane %v1442_v28, 2  ;;  %v1167_v36 = vpop.f32.mrf.mxu0  ;;  %1874 = vmatmul.mubr.f32.gmra.mxu1 %v1339_v19  ;;  %v1511_v39 = vrot.slane %v1342_v14, 1  ;;  %v1623_v27 = vrot.slane %v1342_v14, 2 }
 0x1d8   : > { %v1343_v46 = vrot.slane %v1273_v22, 7  ;;  %v1168_v40 = vadd.f32 %v4977_v32, %v1167_v36 }
 0x1d9   : > { %v1169_v48 = vpop.f32.mrf.mxu0  ;;  %v1512_v63 = vsel %vm650_vm1, %v1510_v35, %v1511_v39  ;;  %v1624_v41 = vsel %vm827_vm2, %v1622_v4, %v1623_v27  ;;  %v1626_v42 = vsel %vm827_vm2, %v1623_v27, %v1625_v37  ;;  %v1514_v12 = vsel %vm650_vm1, %v1511_v39, %v1513_v20 }
 0x1da   : > { %v1427_v34 = vsel %vm489_vm0, 0.0, %v1343_v46  ;;  %v1274_v56 = vmax.f32 %v1168_v40, 0.0  ;;  %1878 = vmatprep.mubr.f32.mxu1 %v1512_v63  ;;  %3613 = vmatprep.mubr.f32.mxu0 %v1624_v41 }
 0x1db   : > { %v1172_v45 = vpop.f32.mrf.mxu0  ;;  %3313 = vmatmul.mubr.msk.f32.gmra.mxu1 %vm4990_vm4, %v1340_v16  ;;  %3614 = vmatmul.mubr.f32.gmra.mxu0 %v1626_v42  ;;  %v1515_v61 = vrot.slane %v1427_v34, 1  ;;  %v1627_v13 = vrot.slane %v1427_v34, 2 }
 0x1dc   : > { %v1344_v0 = vrot.slane %v1274_v56, 7  ;;  %v1173_v18 = vadd.f32 %v4977_v32, %v1172_v45  ;;  %1883 = vmatprep.mubr.f32.mxu1 %v1514_v12 }
 0x1dd   : > { %v1174_v44 = vpop.f32.mrf.mxu0 }
 0x1de   : > { %v1345_v9 = vsel %vm489_vm0, %v1343_v46, %v1344_v0  ;;  %v1443_v52 = vsel %vm489_vm0, %v1344_v0, 0.0  ;;  %v1275_v23 = vmax.f32 %v1173_v18, 0.0 }
 0x1df   : > { %v1518_v43 = vrot.slane %v1443_v52, 1  ;;  %v1630_v17 = vrot.slane %v1443_v52, 2  ;;  %v1177_v58 = vpop.f32.mrf.mxu0  ;;  %1884 = vmatmul.mubr.f32.gmra.mxu1 %v1342_v14  ;;  %v1516_v11 = vrot.slane %v1345_v9, 1  ;;  %v1628_v62 = vrot.slane %v1345_v9, 2 }
 0x1e0   : > { %v1346_v51 = vrot.slane %v1275_v23, 7  ;;  %v1178_v53 = vadd.f32 %v4977_v32, %v1177_v58 }
 0x1e1   : > { %v1179_v59 = vpop.f32.mrf.mxu0  ;;  %v1517_v60 = vsel %vm650_vm1, %v1515_v61, %v1516_v11  ;;  %v1629_v55 = vsel %vm827_vm2, %v1627_v13, %v1628_v62  ;;  %v1631_v47 = vsel %vm827_vm2, %v1628_v62, %v1630_v17  ;;  %v1519_v25 = vsel %vm650_vm1, %v1516_v11, %v1518_v43  ;;  %v2370_v13 = vld [vmem:[%s5449_s5 + $0x68] sm:$0xff]  ;;  %v2369_v62 = vld [vmem:[%s5449_s5 + $0x60] sm:$0xff] }
 0x1e2   : > { %v1428_v26 = vsel %vm489_vm0, 0.0, %v1346_v51  ;;  %v1276_v19 = vmax.f32 %v1178_v53, 0.0  ;;  %1888 = vmatprep.mubr.f32.mxu1 %v1517_v60  ;;  %3616 = vmatprep.mubr.f32.mxu0 %v1629_v55 }
 0x1e3   : > { %v1182_v10 = vpop.f32.mrf.mxu0  ;;  %3315 = vmatmul.mubr.msk.f32.gmra.mxu1 %vm4990_vm4, %v1343_v46  ;;  %3617 = vmatmul.mubr.f32.gmra.mxu0 %v1631_v47  ;;  %v1520_v50 = vrot.slane %v1428_v26, 1  ;;  %v1632_v7 = vrot.slane %v1428_v26, 2 }
 0x1e4   : > { %v1347_v38 = vrot.slane %v1276_v19, 7  ;;  %v1183_v2 = vadd.f32 %v4977_v32, %v1182_v10  ;;  %1893 = vmatprep.mubr.f32.mxu1 %v1519_v25  ;;  %3650 = vmatprep.subr.mxu1 %v2370_v13  ;;  %v2368_v25 = vld [vmem:[%s5449_s5 + $0x58] sm:$0xff] }
 0x1e5   : > { %v1184_v24 = vpop.f32.mrf.mxu0  ;;  %3651 = vmatpush3.msra.mxu1 %v2370_v13  ;;  %v2362_v13 = vld [vmem:[%s5449_s5 + $0x28] sm:$0xff] }
 0x1e6   : > { %v1348_v21 = vsel %vm489_vm0, %v1346_v51, %v1347_v38  ;;  %v1444_v1 = vsel %vm489_vm0, %v1347_v38, 0.0  ;;  %v1277_v16 = vmax.f32 %v1183_v2, 0.0  ;;  %3652 = vmatprep.subr.mxu1 %v2369_v62 }
 0x1e7   : > { %v1523_v57 = vrot.slane %v1444_v1, 1  ;;  %v1635_v5 = vrot.slane %v1444_v1, 2  ;;  %v1187_v3 = vpop.f32.mrf.mxu0  ;;  %1894 = vmatmul.mubr.f32.gmra.mxu1 %v1345_v9  ;;  %v1521_v54 = vrot.slane %v1348_v21, 1  ;;  %v1633_v29 = vrot.slane %v1348_v21, 2 }
 0x1e8   : > { %v1349_v8 = vrot.slane %v1277_v16, 7  ;;  %v1188_v15 = vadd.f32 %v4977_v32, %v1187_v3  ;;  %3653 = vmatpush3.msra.mxu1 %v2369_v62 }
 0x1e9   : > { %v1189_v31 = vpop.f32.mrf.mxu0  ;;  %v1522_v49 = vsel %vm650_vm1, %v1520_v50, %v1521_v54  ;;  %v1634_v6 = vsel %vm827_vm2, %v1632_v7, %v1633_v29  ;;  %v1636_v33 = vsel %vm827_vm2, %v1633_v29, %v1635_v5  ;;  %v1524_v22 = vsel %vm650_vm1, %v1521_v54, %v1523_v57  ;;  %3654 = vmatprep.subr.mxu1 %v2368_v25  ;;  %v2367_v57 = vld [vmem:[%s5449_s5 + $0x50] sm:$0xff] }
 0x1ea   : > { %v1429_v35 = vsel %vm489_vm0, 0.0, %v1349_v8  ;;  %v1278_v14 = vmax.f32 %v1188_v15, 0.0  ;;  %1898 = vmatprep.mubr.f32.mxu1 %v1522_v49  ;;  %3619 = vmatprep.mubr.f32.mxu0 %v1634_v6 }
 0x1eb   : > { %v1192_v28 = vpop.f32.mrf.mxu0  ;;  %3317 = vmatmul.mubr.msk.f32.gmra.mxu1 %vm4990_vm4, %v1346_v51  ;;  %3620 = vmatmul.mubr.f32.gmra.mxu0 %v1636_v33  ;;  %v1525_v36 = vrot.slane %v1429_v35, 1  ;;  %v1637_v40 = vrot.slane %v1429_v35, 2 }
 0x1ec   : > { %v1350_v4 = vrot.slane %v1278_v14, 7  ;;  %v1193_v20 = vadd.f32 %v4977_v32, %v1192_v28  ;;  %1903 = vmatprep.mubr.f32.mxu1 %v1524_v22  ;;  %3655 = vmatpush3.msra.mxu1 %v2368_v25  ;;  %v2365_v14 = vld [vmem:[%s5449_s5 + $0x40] sm:$0xff] }
 0x1ed   : > { %v1194_v37 = vpop.f32.mrf.mxu0  ;;  %3656 = vmatprep.subr.mxu1 %v2367_v57 }
 0x1ee   : > { %v1351_v39 = vsel %vm489_vm0, %v1349_v8, %v1350_v4  ;;  %v1445_v27 = vsel %vm489_vm0, %v1350_v4, 0.0  ;;  %v1279_v46 = vmax.f32 %v1193_v20, 0.0  ;;  %3657 = vmatpush3.msra.mxu1 %v2367_v57 }
 0x1ef   : > { %v1528_v48 = vrot.slane %v1445_v27, 1  ;;  %v1640_v63 = vrot.slane %v1445_v27, 2  ;;  %v1197_v41 = vpop.f32.mrf.mxu0  ;;  %1904 = vmatmul.mubr.f32.gmra.mxu1 %v1348_v21  ;;  %v1526_v42 = vrot.slane %v1351_v39, 1  ;;  %v1638_v34 = vrot.slane %v1351_v39, 2 }
 0x1f0   : > { %v1352_v56 = vrot.slane %v1279_v46, 7  ;;  %v1198_v45 = vadd.f32 %v4977_v32, %v1197_v41 }
 0x1f1   : > { %v1199_v12 = vpop.f32.mrf.mxu0  ;;  %v1527_v0 = vsel %vm650_vm1, %v1525_v36, %v1526_v42  ;;  %v1639_v18 = vsel %vm827_vm2, %v1637_v40, %v1638_v34  ;;  %v1641_v44 = vsel %vm827_vm2, %v1638_v34, %v1640_v63  ;;  %v1529_v23 = vsel %vm650_vm1, %v1526_v42, %v1528_v48  ;;  %v2364_v42 = vld [vmem:[%s5449_s5 + $0x38] sm:$0xff] }
 0x1f2   : > { %v1430_v61 = vsel %vm489_vm0, 0.0, %v1352_v56  ;;  %v1280_v9 = vmax.f32 %v1198_v45, 0.0  ;;  %1908 = vmatprep.mubr.f32.mxu1 %v1527_v0  ;;  %3622 = vmatprep.mubr.f32.mxu0 %v1639_v18  ;;  %v2363_v0 = vld [vmem:[%s5449_s5 + $0x30] sm:$0xff] }
 0x1f3   : > { %v1202_v52 = vpop.f32.mrf.mxu0  ;;  %3319 = vmatmul.mubr.msk.f32.gmra.mxu1 %vm4990_vm4, %v1349_v8  ;;  %3623 = vmatmul.mubr.f32.gmra.mxu0 %v1641_v44  ;;  %v1530_v11 = vrot.slane %v1430_v61, 1  ;;  %v1642_v60 = vrot.slane %v1430_v61, 2  ;;  %v2366_v8 = vld [vmem:[%s5449_s5 + $0x48] sm:$0xff] }
 0x1f4   : > { %v1353_v43 = vrot.slane %v1280_v9, 7  ;;  %v1203_v17 = vadd.f32 %v4977_v32, %v1202_v52  ;;  %1913 = vmatprep.mubr.f32.mxu1 %v1529_v23  ;;  %3658 = vmatprep.subr.mxu1 %v2366_v8 }
 0x1f5   : > { %v1204_v58 = vpop.f32.mrf.mxu0  ;;  %3659 = vmatpush3.msra.mxu1 %v2366_v8 }
 0x1f6   : > { %v1354_v51 = vsel %vm489_vm0, %v1352_v56, %v1353_v43  ;;  %v1446_v53 = vsel %vm489_vm0, %v1353_v43, 0.0  ;;  %v1281_v59 = vmax.f32 %v1203_v17, 0.0  ;;  %3660 = vmatprep.subr.mxu1 %v2365_v14 }
 0x1f7   : > { %v1533_v55 = vrot.slane %v1446_v53, 1  ;;  %v1645_v47 = vrot.slane %v1446_v53, 2  ;;  %v1207_v26 = vpop.f32.mrf.mxu0  ;;  %1914 = vmatmul.mubr.f32.gmra.mxu1 %v1351_v39  ;;  %v1531_v19 = vrot.slane %v1354_v51, 1  ;;  %v1643_v10 = vrot.slane %v1354_v51, 2 }
 0x1f8   : > { %v1355_v38 = vrot.slane %v1281_v59, 7  ;;  %v1208_v2 = vadd.f32 %v4977_v32, %v1207_v26  ;;  %3661 = vmatpush3.msra.mxu1 %v2365_v14 }
 0x1f9   : > { %v1209_v24 = vpop.f32.mrf.mxu0  ;;  %v1532_v50 = vsel %vm650_vm1, %v1530_v11, %v1531_v19  ;;  %v1644_v21 = vsel %vm827_vm2, %v1642_v60, %v1643_v10  ;;  %v1646_v1 = vsel %vm827_vm2, %v1643_v10, %v1645_v47  ;;  %v1534_v3 = vsel %vm650_vm1, %v1531_v19, %v1533_v55  ;;  %3662 = vmatprep.subr.mxu1 %v2364_v42  ;;  %v2361_v10 = vld [vmem:[%s5449_s5 + $0x20] sm:$0xff] }
 0x1fa   : > { %v1431_v16 = vsel %vm489_vm0, 0.0, %v1355_v38  ;;  %v1282_v7 = vmax.f32 %v1208_v2, 0.0  ;;  %1918 = vmatprep.mubr.f32.mxu1 %v1532_v50  ;;  %3625 = vmatprep.mubr.f32.mxu0 %v1644_v21  ;;  %v2360_v50 = vld [vmem:[%s5449_s5 + $0x18] sm:$0xff] }
 0x1fb   : > { %v1212_v5 = vpop.f32.mrf.mxu0  ;;  %3321 = vmatmul.mubr.msk.f32.gmra.mxu1 %vm4990_vm4, %v1352_v56  ;;  %3626 = vmatmul.mubr.f32.gmra.mxu0 %v1646_v1  ;;  %v1535_v31 = vrot.slane %v1431_v16, 1  ;;  %v1647_v35 = vrot.slane %v1431_v16, 2 }
 0x1fc   : > { %v1356_v54 = vrot.slane %v1282_v7, 7  ;;  %v1213_v29 = vadd.f32 %v4977_v32, %v1212_v5  ;;  %1923 = vmatprep.mubr.f32.mxu1 %v1534_v3  ;;  %3663 = vmatpush3.msra.mxu1 %v2364_v42  ;;  %v2359_v3 = vld [vmem:[%s5449_s5 + $0x10] sm:$0xff] }
 0x1fd   : > { %v1214_v15 = vpop.f32.mrf.mxu0  ;;  %3664 = vmatprep.subr.mxu1 %v2363_v0 }
 0x1fe   : > { %v1357_v49 = vsel %vm489_vm0, %v1355_v38, %v1356_v54  ;;  %v1447_v6 = vsel %vm489_vm0, %v1356_v54, 0.0  ;;  %v1283_v33 = vmax.f32 %v1213_v29, 0.0  ;;  %3665 = vmatpush3.msra.mxu1 %v2363_v0 }
 0x1ff   : > { %v1538_v28 = vrot.slane %v1447_v6, 1  ;;  %v1650_v22 = vrot.slane %v1447_v6, 2  ;;  %v1217_v4 = vpop.f32.mrf.mxu0  ;;  %1924 = vmatmul.mubr.f32.gmra.mxu1 %v1354_v51  ;;  %v1536_v20 = vrot.slane %v1357_v49, 1  ;;  %v1648_v37 = vrot.slane %v1357_v49, 2  ;;  %3666 = vmatprep.subr.mxu1 %v2362_v13 }
 0x200   : > { %v1358_v36 = vrot.slane %v1283_v33, 7  ;;  %v1218_v39 = vadd.f32 %v4977_v32, %v1217_v4  ;;  %3667 = vmatpush3.msra.mxu1 %v2362_v13 }
 0x201   : > { %v1219_v27 = vpop.f32.mrf.mxu0  ;;  %v1537_v46 = vsel %vm650_vm1, %v1535_v31, %v1536_v20  ;;  %v1649_v40 = vsel %vm827_vm2, %v1647_v35, %v1648_v37  ;;  %v1651_v48 = vsel %vm827_vm2, %v1648_v37, %v1650_v22  ;;  %v1539_v56 = vsel %vm650_vm1, %v1536_v20, %v1538_v28  ;;  %3668 = vmatprep.subr.mxu1 %v2361_v10  ;;  %v2358_v20 = vld [vmem:[%s5449_s5 + $0x8] sm:$0xff] }
 0x202   : > { %v1432_v63 = vsel %vm489_vm0, 0.0, %v1358_v36  ;;  %v1284_v41 = vmax.f32 %v1218_v39, 0.0  ;;  %1928 = vmatprep.mubr.f32.mxu1 %v1537_v46  ;;  %3628 = vmatprep.mubr.f32.mxu0 %v1649_v40  ;;  %v2357_v46 = vld [vmem:[%s5449_s5] sm:$0xff] }
 0x203   : > { %v1222_v34 = vpop.f32.mrf.mxu0  ;;  %3323 = vmatmul.mubr.msk.f32.gmra.mxu1 %vm4990_vm4, %v1355_v38  ;;  %3629 = vmatmul.mubr.f32.gmra.mxu0 %v1651_v48  ;;  %v1540_v44 = vrot.slane %v1432_v63, 1  ;;  %v1652_v23 = vrot.slane %v1432_v63, 2 }
 0x204   : > { %v1359_v45 = vrot.slane %v1284_v41, 7  ;;  %v1223_v12 = vadd.f32 %v4977_v32, %v1222_v34  ;;  %1933 = vmatprep.mubr.f32.mxu1 %v1539_v56  ;;  %3669 = vmatpush3.msra.mxu1 %v2361_v10 }
 0x205   : > { %v1224_v18 = vpop.f32.mrf.mxu0  ;;  %3670 = vmatprep.subr.mxu1 %v2360_v50 }
 0x206   : > { %v1360_v61 = vsel %vm489_vm0, %v1358_v36, %v1359_v45  ;;  %v1448_v9 = vsel %vm489_vm0, %v1359_v45, 0.0  ;;  %v1285_v52 = vmax.f32 %v1223_v12, 0.0  ;;  %3671 = vmatpush3.msra.mxu1 %v2360_v50 }
 0x207   : > { %v1543_v43 = vrot.slane %v1448_v9, 1  ;;  %v1655_v17 = vrot.slane %v1448_v9, 2  ;;  %v1227_v58 = vpop.f32.mrf.mxu0  ;;  %1934 = vmatmul.mubr.f32.gmra.mxu1 %v1357_v49  ;;  %v1541_v11 = vrot.slane %v1360_v61, 1  ;;  %v1653_v62 = vrot.slane %v1360_v61, 2  ;;  %3672 = vmatprep.subr.mxu1 %v2359_v3 }
 0x208   : > { %v1361_v51 = vrot.slane %v1285_v52, 7  ;;  %v1228_v53 = vadd.f32 %v4977_v32, %v1227_v58  ;;  %3673 = vmatpush3.msra.mxu1 %v2359_v3 }
 0x209   : > { %v1229_v59 = vpop.f32.mrf.mxu0  ;;  %v1542_v60 = vsel %vm650_vm1, %v1540_v44, %v1541_v11  ;;  %v1654_v55 = vsel %vm827_vm2, %v1652_v23, %v1653_v62  ;;  %v1656_v47 = vsel %vm827_vm2, %v1653_v62, %v1655_v17  ;;  %v1544_v38 = vsel %vm650_vm1, %v1541_v11, %v1543_v43  ;;  %3674 = vmatprep.subr.mxu1 %v2358_v20 }
 0x20a   : > { %v1433_v26 = vsel %vm489_vm0, 0.0, %v1361_v51  ;;  %v1286_v19 = vmax.f32 %v1228_v53, 0.0  ;;  %1938 = vmatprep.mubr.f32.mxu1 %v1542_v60  ;;  %3631 = vmatprep.mubr.f32.mxu0 %v1654_v55 }
 0x20b   : > { %v1232_v25 = vpop.f32.mrf.mxu0  ;;  %3325 = vmatmul.mubr.msk.f32.gmra.mxu1 %vm4990_vm4, %v1358_v36  ;;  %3632 = vmatmul.mubr.f32.gmra.mxu0 %v1656_v47  ;;  %v1545_v1 = vrot.slane %v1433_v26, 1  ;;  %v1657_v5 = vrot.slane %v1433_v26, 2 }
 0x20c   : > { %v1362_v2 = vrot.slane %v1286_v19, 7  ;;  %v1233_v24 = vadd.f32 %v4977_v32, %v1232_v25  ;;  %1943 = vmatprep.mubr.f32.mxu1 %v1544_v38  ;;  %3675 = vmatpush3.msra.mxu1 %v2358_v20  ;;  %v5217_v20 = vld [vmem:[%s5448_s4] ss:$0 sm:$0xff] }
 0x20d   : > { %v1234_v21 = vpop.f32.mrf.mxu0  ;;  %3676 = vmatprep.subr.mxu1 %v2357_v46 }
 0x20e   : > { %v1363_v16 = vsel %vm489_vm0, %v1361_v51, %v1362_v2  ;;  %v1449_v7 = vsel %vm489_vm0, %v1362_v2, 0.0  ;;  %v1287_v57 = vmax.f32 %v1233_v24, 0.0  ;;  %3677 = vmatpush3.msra.mxu1 %v2357_v46 }
 0x20f   : > { %v1548_v54 = vrot.slane %v1449_v7, 1  ;;  %v1660_v29 = vrot.slane %v1449_v7, 2  ;;  %v1237_v8 = vpop.f32.mrf.mxu0  ;;  %1944 = vmatmul.mubr.f32.gmra.mxu1 %v1360_v61  ;;  %v1546_v15 = vrot.slane %v1363_v16, 1  ;;  %v1658_v31 = vrot.slane %v1363_v16, 2 }
 0x210   : > { %v1364_v49 = vrot.slane %v1287_v57, 7  ;;  %v1238_v6 = vadd.f32 %v4977_v32, %v1237_v8 }
 0x211   : > { %v1239_v33 = vpop.f32.mrf.mxu0  ;;  %v1547_v35 = vsel %vm650_vm1, %v1545_v1, %v1546_v15  ;;  %v1659_v14 = vsel %vm827_vm2, %v1657_v5, %v1658_v31  ;;  %v1661_v28 = vsel %vm827_vm2, %v1658_v31, %v1660_v29  ;;  %v1549_v36 = vsel %vm650_vm1, %v1546_v15, %v1548_v54 }
 0x212   : > { %v1434_v22 = vsel %vm489_vm0, 0.0, %v1364_v49  ;;  %v1288_v4 = vmax.f32 %v1238_v6, 0.0  ;;  %1948 = vmatprep.mubr.f32.mxu1 %v1547_v35  ;;  %3634 = vmatprep.mubr.f32.mxu0 %v1659_v14 }
 0x213   : > { %v1242_v37 = vpop.f32.mrf.mxu0  ;;  %3327 = vmatmul.mubr.msk.f32.gmra.mxu1 %vm4990_vm4, %v1361_v51  ;;  %3635 = vmatmul.mubr.f32.gmra.mxu0 %v1661_v28  ;;  %v1550_v48 = vrot.slane %v1434_v22, 1  ;;  %v1662_v34 = vrot.slane %v1434_v22, 2 }
 0x214   : > { %v1365_v39 = vrot.slane %v1288_v4, 7  ;;  %v1243_v27 = vadd.f32 %v4977_v32, %v1242_v37  ;;  %1953 = vmatprep.mubr.f32.mxu1 %v1549_v36  ;;  %v5211_v4 = vld [vmem:[%s5449_s5 + $0xf8] sm:$0xff] }
 0x215   : > { %v1244_v40 = vpop.f32.mrf.mxu0  ;;  %3702 = vmatprep.subr.mxu1 %v5211_v4 }
 0x216   : > { %v1366_v63 = vsel %vm489_vm0, %v1364_v49, %v1365_v39  ;;  %v1450_v41 = vsel %vm489_vm0, %v1365_v39, 0.0  ;;  %v1289_v42 = vmax.f32 %v1243_v27, 0.0 }
 0x217   : > { %v1553_v56 = vrot.slane %v1450_v41, 1  ;;  %v1665_v45 = vrot.slane %v1450_v41, 2  ;;  %v1247_v12 = vpop.f32.mrf.mxu0  ;;  %1954 = vmatmul.mubr.f32.gmra.mxu1 %v1363_v16  ;;  %v1551_v0 = vrot.slane %v1366_v63, 1  ;;  %v1663_v18 = vrot.slane %v1366_v63, 2 }
 0x218   : > { %v1367_v44 = vrot.slane %v1289_v42, 7  ;;  %v1248_v61 = vadd.f32 %v4977_v32, %v1247_v12 }
 0x219   : > { %v1249_v9 = vpop.f32.mrf.mxu0  ;;  %v1552_v52 = vsel %vm650_vm1, %v1550_v48, %v1551_v0  ;;  %v1664_v23 = vsel %vm827_vm2, %v1662_v34, %v1663_v18  ;;  %v1666_v13 = vsel %vm827_vm2, %v1663_v18, %v1665_v45  ;;  %v1554_v11 = vsel %vm650_vm1, %v1551_v0, %v1553_v56 }
 0x21a   : > { %v1435_v43 = vsel %vm489_vm0, 0.0, %v1367_v44  ;;  %v1290_v17 = vmax.f32 %v1248_v61, 0.0  ;;  %1958 = vmatprep.mubr.f32.mxu1 %v1552_v52  ;;  %3637 = vmatprep.mubr.f32.mxu0 %v1664_v23 }
 0x21b   : > { %v1252_v58 = vpop.f32.mrf.mxu0  ;;  %3329 = vmatmul.mubr.msk.f32.gmra.mxu1 %vm4990_vm4, %v1364_v49  ;;  %3638 = vmatmul.mubr.f32.gmra.mxu0 %v1666_v13  ;;  %v1555_v59 = vrot.slane %v1435_v43, 1  ;;  %v1667_v26 = vrot.slane %v1435_v43, 2 }
 0x21c   : > { %v1368_v62 = vrot.slane %v1290_v17, 7  ;;  %v1253_v51 = vadd.f32 %v4977_v32, %v1252_v58  ;;  %1963 = vmatprep.mubr.f32.mxu1 %v1554_v11 }
 0x21d   : > { %v1254_v53 = vpop.f32.mrf.mxu0 }
 0x21e   : > { %v1369_v60 = vsel %vm489_vm0, %v1367_v44, %v1368_v62  ;;  %v1451_v55 = vsel %vm489_vm0, %v1368_v62, 0.0  ;;  %v1291_v47 = vmax.f32 %v1253_v51, 0.0 }
 0x21f   : > { %v1558_v19 = vrot.slane %v1451_v55, 1  ;;  %v1670_v10 = vrot.slane %v1451_v55, 2  ;;  %v1257_v25 = vpop.f32.mrf.mxu0  ;;  %1964 = vmatmul.mubr.f32.gmra.mxu1 %v1366_v63  ;;  %v1556_v38 = vrot.slane %v1369_v60, 1  ;;  %v1668_v2 = vrot.slane %v1369_v60, 2 }
 0x220   : > { %v1370_v24 = vrot.slane %v1291_v47, 7  ;;  %v1258_v50 = vadd.f32 %v4977_v32, %v1257_v25 }
 0x221   : > { %v1259_v21 = vpop.f32.mrf.mxu0  ;;  %v1557_v1 = vsel %vm650_vm1, %v1555_v59, %v1556_v38  ;;  %v1669_v16 = vsel %vm827_vm2, %v1667_v26, %v1668_v2  ;;  %v1671_v7 = vsel %vm827_vm2, %v1668_v2, %v1670_v10  ;;  %v1559_v3 = vsel %vm650_vm1, %v1556_v38, %v1558_v19 }
 0x222   : > { %v1292_v57 = vmax.f32 %v1258_v50, 0.0  ;;  %1968 = vmatprep.mubr.f32.mxu1 %v1557_v1  ;;  %3640 = vmatprep.mubr.f32.mxu0 %v1669_v16  ;;  %v1436_v5 = vsel %vm489_vm0, 0.0, %v1370_v24 }
 0x223   : > { %3331 = vmatmul.mubr.msk.f32.gmra.mxu1 %vm4990_vm4, %v1367_v44  ;;  %3641 = vmatmul.mubr.f32.gmra.mxu0 %v1671_v7  ;;  %v1560_v8 = vrot.slane %v1436_v5, 1  ;;  %v1672_v15 = vrot.slane %v1436_v5, 2 }
 0x224   : > { %v1371_v54 = vrot.slane %v1292_v57, 7  ;;  %1973 = vmatprep.mubr.f32.mxu1 %v1559_v3 }
 0x226   : > { %v1372_v32 = vsel %vm489_vm0, %v1370_v24, %v1371_v54  ;;  %v1452_v29 = vsel %vm489_vm0, %v1371_v54, 0.0  ;;  %v3348_v54 = vld [vmem:[%s5449_s5 + $0xf0] sm:$0xff] }
 0x227   : > { %v1563_v31 = vrot.slane %v1452_v29, 1  ;;  %v1675_v49 = vrot.slane %v1452_v29, 2  ;;  %1974 = vmatmul.mubr.f32.gmra.mxu1 %v1369_v60  ;;  %v1561_v6 = vrot.slane %v1372_v32, 1  ;;  %v1673_v33 = vrot.slane %v1372_v32, 2 }
 0x229   : > { %v1562_v35 = vsel %vm650_vm1, %v1560_v8, %v1561_v6  ;;  %v1674_v14 = vsel %vm827_vm2, %v1672_v15, %v1673_v33  ;;  %v1676_v28 = vsel %vm827_vm2, %v1673_v33, %v1675_v49  ;;  %v1564_v22 = vsel %vm650_vm1, %v1561_v6, %v1563_v31  ;;  %v3347_v15 = vld [vmem:[%s5449_s5 + $0xe8] sm:$0xff]  ;;  %v3346_v33 = vld [vmem:[%s5449_s5 + $0xe0] sm:$0xff] }
 0x22a   : > { %1978 = vmatprep.mubr.f32.mxu1 %v1562_v35  ;;  %3643 = vmatprep.mubr.f32.mxu0 %v1674_v14 }
 0x22b   : > { %3333 = vmatmul.mubr.msk.f32.gmra.mxu1 %vm4990_vm4, %v1370_v24  ;;  %3644 = vmatmul.mubr.f32.gmra.mxu0 %v1676_v28 }
 0x22c   : > { %1983 = vmatprep.mubr.f32.mxu1 %v1564_v22 }
 0x22f   : > { %1984 = vmatmul.mubr.f32.gmra.mxu1 %v1372_v32 }
 0x273   : > { %v1830_v37 = vpop.f32.mrf.mxu1  ;;  %v3600_v30 = vpop.f32.mrf.mxu0 }
 0x274   : > { %v1831_v36 = vadd.f32 %v5217_v20, %v1830_v37 }
 0x275   : > { %v1832_v39 = vpop.f32.mrf.mxu1  ;;  %v2055_v27 = vpop.f32.mrf.mxu0 }
 0x276   : > { %v2056_v46 = vadd.f32 %v2055_v27, %v1831_v36 }
 0x277   : > { %v1835_v40 = vpop.f32.mrf.mxu1 }
 0x278   : > { %v2214_v48 = vmax.f32 %v2056_v46, 0.0  ;;  %v1836_v63 = vadd.f32 %v5217_v20, %v1835_v40  ;;  %v3344_v46 = vld [vmem:[%s5449_s5 + $0xd0] sm:$0xff] }
 0x279   : > { %v1837_v41 = vpop.f32.mrf.mxu1 }
 0x27a   : > { %2246 = vst [vmem:[#allocation2] sm:$0xff] %v2214_v48  ;;  %v2061_v42 = vadd.f32 %v3600_v30, %v1836_v63  ;;  %v3345_v30 = vld [vmem:[%s5449_s5 + $0xd8] sm:$0xff]  ;;  %v3343_v41 = vld [vmem:[%s5449_s5 + $0xc8] sm:$0xff] }
 0x27b   : > { %v1840_v34 = vpop.f32.mrf.mxu1  ;;  %v3603_v56 = vpop.f32.mrf.mxu0 }
 0x27c   : > { %v2215_v45 = vmax.f32 %v2061_v42, 0.0  ;;  %v1841_v12 = vadd.f32 %v5217_v20, %v1840_v34 }
 0x27d   : > { %v1842_v0 = vpop.f32.mrf.mxu1  ;;  %v2065_v18 = vpop.f32.mrf.mxu0 }
 0x27e   : > { %2247 = vst [vmem:[#allocation2 + $0x8] sm:$0xff] %v2215_v45  ;;  %v2066_v44 = vadd.f32 %v2065_v18, %v1841_v12  ;;  %v3342_v45 = vld [vmem:[%s5449_s5 + $0xc0] sm:$0xff] }
 0x27f   : > { %v1845_v61 = vpop.f32.mrf.mxu1 }
 0x280   : > { %v2216_v9 = vmax.f32 %v2066_v44, 0.0  ;;  %v1846_v52 = vadd.f32 %v5217_v20, %v1845_v61 }
 0x281   : > { %v1847_v23 = vpop.f32.mrf.mxu1 }
 0x282   : > { %2248 = vst [vmem:[#allocation2 + $0x10] sm:$0xff] %v2216_v9  ;;  %v2071_v13 = vadd.f32 %v3603_v56, %v1846_v52  ;;  %v3341_v52 = vld [vmem:[%s5449_s5 + $0xb8] sm:$0xff] }
 0x283   : > { %v1850_v43 = vpop.f32.mrf.mxu1  ;;  %v3606_v17 = vpop.f32.mrf.mxu0 }
 0x284   : > { %v2217_v58 = vmax.f32 %v2071_v13, 0.0  ;;  %v1851_v11 = vadd.f32 %v5217_v20, %v1850_v43 }
 0x285   : > { %v1852_v62 = vpop.f32.mrf.mxu1  ;;  %v2075_v51 = vpop.f32.mrf.mxu0  ;;  %v2278_v53 = vld [vmem:[#allocation2] ss:$2 sm:$0xff]  ;;  %v2310_v59 = vld [vmem:[#allocation2 + $0x1] ss:$2 sm:$0xff] }
 0x286   : > { %2249 = vst [vmem:[#allocation2 + $0x18] sm:$0xff] %v2217_v58  ;;  %v2076_v60 = vadd.f32 %v2075_v51, %v1851_v11  ;;  %v5224_v55 = vmax.f32 %v2278_v53, %v2310_v59  ;;  %v3339_v51 = vld [vmem:[%s5449_s5 + $0xa8] sm:$0xff] }
 0x287   : > { %v1855_v47 = vpop.f32.mrf.mxu1 }
 0x288   : > { %v2218_v26 = vmax.f32 %v2076_v60, 0.0  ;;  %v1856_v19 = vadd.f32 %v5217_v20, %v1855_v47  ;;  %3678 = vmatprep.mubr.f32.mxu1 %v5224_v55  ;;  %v3338_v47 = vld [vmem:[%s5449_s5 + $0xa0] sm:$0xff] }
 0x289   : > { %v1857_v10 = vpop.f32.mrf.mxu1 }
 0x28a   : > { %2250 = vst [vmem:[#allocation2 + $0x20] sm:$0xff] %v2218_v26  ;;  %v2081_v25 = vadd.f32 %v3606_v17, %v1856_v19  ;;  %v3340_v17 = vld [vmem:[%s5449_s5 + $0xb0] sm:$0xff] }
 0x28b   : > { %v1860_v38 = vpop.f32.mrf.mxu1  ;;  %v3609_v2 = vpop.f32.mrf.mxu0 }
 0x28c   : > { %v2219_v24 = vmax.f32 %v2081_v25, 0.0  ;;  %v1861_v50 = vadd.f32 %v5217_v20, %v1860_v38 }
 0x28d   : > { %v1862_v21 = vpop.f32.mrf.mxu1  ;;  %v2085_v1 = vpop.f32.mrf.mxu0  ;;  %v2280_v16 = vld [vmem:[#allocation2 + $0x10] ss:$2 sm:$0xff]  ;;  %v2312_v7 = vld [vmem:[#allocation2 + $0x11] ss:$2 sm:$0xff] }
 0x28e   : > { %2251 = vst [vmem:[#allocation2 + $0x28] sm:$0xff] %v2219_v24  ;;  %v2086_v57 = vadd.f32 %v2085_v1, %v1861_v50  ;;  %v5229_v5 = vmax.f32 %v2280_v16, %v2312_v7  ;;  %v3337_v24 = vld [vmem:[%s5449_s5 + $0x98] sm:$0xff]  ;;  %v3336_v16 = vld [vmem:[%s5449_s5 + $0x90] sm:$0xff] }
 0x28f   : > { %v1865_v3 = vpop.f32.mrf.mxu1 }
 0x290   : > { %v2220_v32 = vmax.f32 %v2086_v57, 0.0  ;;  %v1866_v29 = vadd.f32 %v5217_v20, %v1865_v3  ;;  %3679 = vmatmul.mubr.f32.vlgmr.msra.gmra.mxu1 %v5229_v5 }
 0x291   : > { %v1867_v8 = vpop.f32.mrf.mxu1  ;;  %3703 = vmatpush3.msra.mxu1 %v5211_v4 }
 0x292   : > { %2252 = vst [vmem:[#allocation2 + $0x30] sm:$0xff] %v2220_v32  ;;  %v2091_v31 = vadd.f32 %v3609_v2, %v1866_v29  ;;  %3704 = vmatprep.subr.mxu1 %v3348_v54 }
 0x293   : > { %v1870_v49 = vpop.f32.mrf.mxu1  ;;  %v3612_v6 = vpop.f32.mrf.mxu0  ;;  %3705 = vmatpush3.msra.mxu1 %v3348_v54  ;;  %v3335_v54 = vld [vmem:[%s5449_s5 + $0x88] sm:$0xff] }
 0x294   : > { %v2221_v35 = vmax.f32 %v2091_v31, 0.0  ;;  %v1871_v14 = vadd.f32 %v5217_v20, %v1870_v49  ;;  %3706 = vmatprep.subr.mxu1 %v3347_v15 }
 0x295   : > { %v1872_v28 = vpop.f32.mrf.mxu1  ;;  %v2095_v22 = vpop.f32.mrf.mxu0  ;;  %v2282_v4 = vld [vmem:[#allocation2 + $0x20] ss:$2 sm:$0xff]  ;;  %v2314_v37 = vld [vmem:[#allocation2 + $0x21] ss:$2 sm:$0xff]  ;;  %3707 = vmatpush3.msra.mxu1 %v3347_v15 }
 0x296   : > { %2253 = vst [vmem:[#allocation2 + $0x38] sm:$0xff] %v2221_v35  ;;  %v2096_v36 = vadd.f32 %v2095_v22, %v1871_v14  ;;  %v5247_v39 = vmax.f32 %v2282_v4, %v2314_v37  ;;  %3708 = vmatprep.subr.mxu1 %v3346_v33  ;;  %v3334_v15 = vld [vmem:[%s5449_s5 + $0x80] sm:$0xff] }
 0x297   : > { %v1875_v27 = vpop.f32.mrf.mxu1  ;;  %3709 = vmatpush3.msra.mxu1 %v3346_v33 }
 0x298   : > { %v2222_v40 = vmax.f32 %v2096_v36, 0.0  ;;  %v1876_v48 = vadd.f32 %v5217_v20, %v1875_v27  ;;  %3681 = vmatprep.mubr.f32.mxu1 %v5247_v39  ;;  %3710 = vmatprep.subr.mxu1 %v3345_v30 }
 0x299   : > { %v1877_v63 = vpop.f32.mrf.mxu1  ;;  %3711 = vmatpush3.msra.mxu1 %v3345_v30 }
 0x29a   : > { %2254 = vst [vmem:[#allocation2 + $0x40] sm:$0xff] %v2222_v40  ;;  %v2101_v42 = vadd.f32 %v3612_v6, %v1876_v48  ;;  %3712 = vmatprep.subr.mxu1 %v3344_v46 }
 0x29b   : > { %v1880_v34 = vpop.f32.mrf.mxu1  ;;  %v3615_v56 = vpop.f32.mrf.mxu0  ;;  %3713 = vmatpush3.msra.mxu1 %v3344_v46 }
 0x29c   : > { %v2223_v12 = vmax.f32 %v2101_v42, 0.0  ;;  %v1881_v0 = vadd.f32 %v5217_v20, %v1880_v34  ;;  %3714 = vmatprep.subr.mxu1 %v3343_v41 }
 0x29d   : > { %v1882_v18 = vpop.f32.mrf.mxu1  ;;  %v2105_v44 = vpop.f32.mrf.mxu0  ;;  %v2284_v61 = vld [vmem:[#allocation2 + $0x30] ss:$2 sm:$0xff]  ;;  %v2316_v9 = vld [vmem:[#allocation2 + $0x31] ss:$2 sm:$0xff]  ;;  %3715 = vmatpush3.msra.mxu1 %v3343_v41 }
 0x29e   : > { %2255 = vst [vmem:[#allocation2 + $0x48] sm:$0xff] %v2223_v12  ;;  %v2106_v23 = vadd.f32 %v2105_v44, %v1881_v0  ;;  %v5264_v13 = vmax.f32 %v2284_v61, %v2316_v9  ;;  %3716 = vmatprep.subr.mxu1 %v3342_v45 }
 0x29f   : > { %v1885_v43 = vpop.f32.mrf.mxu1  ;;  %3717 = vmatpush3.msra.mxu1 %v3342_v45 }
 0x2a0   : > { %v2224_v58 = vmax.f32 %v2106_v23, 0.0  ;;  %v1886_v11 = vadd.f32 %v5217_v20, %v1885_v43  ;;  %3682 = vmatmul.mubr.f32.gmra.mxu1 %v5264_v13  ;;  %3718 = vmatprep.subr.mxu1 %v3341_v52 }
 0x2a1   : > { %v1887_v62 = vpop.f32.mrf.mxu1  ;;  %3719 = vmatpush3.msra.mxu1 %v3341_v52 }
 0x2a2   : > { %2256 = vst [vmem:[#allocation2 + $0x50] sm:$0xff] %v2224_v58  ;;  %v2111_v53 = vadd.f32 %v3615_v56, %v1886_v11  ;;  %3720 = vmatprep.subr.mxu1 %v3340_v17 }
 0x2a3   : > { %v1890_v59 = vpop.f32.mrf.mxu1  ;;  %v3618_v60 = vpop.f32.mrf.mxu0  ;;  %3721 = vmatpush3.msra.mxu1 %v3340_v17 }
 0x2a4   : > { %v2225_v26 = vmax.f32 %v2111_v53, 0.0  ;;  %v1891_v19 = vadd.f32 %v5217_v20, %v1890_v59  ;;  %3722 = vmatprep.subr.mxu1 %v3339_v51 }
 0x2a5   : > { %v1892_v10 = vpop.f32.mrf.mxu1  ;;  %v2115_v25 = vpop.f32.mrf.mxu0  ;;  %v2286_v38 = vld [vmem:[#allocation2 + $0x40] ss:$2 sm:$0xff]  ;;  %v2318_v2 = vld [vmem:[#allocation2 + $0x41] ss:$2 sm:$0xff]  ;;  %3723 = vmatpush3.msra.mxu1 %v3339_v51 }
 0x2a6   : > { %2257 = vst [vmem:[#allocation2 + $0x58] sm:$0xff] %v2225_v26  ;;  %v2116_v50 = vadd.f32 %v2115_v25, %v1891_v19  ;;  %v5281_v21 = vmax.f32 %v2286_v38, %v2318_v2  ;;  %3724 = vmatprep.subr.mxu1 %v3338_v47 }
 0x2a7   : > { %v1895_v1 = vpop.f32.mrf.mxu1  ;;  %3725 = vmatpush3.msra.mxu1 %v3338_v47 }
 0x2a8   : > { %v2226_v7 = vmax.f32 %v2116_v50, 0.0  ;;  %v1896_v57 = vadd.f32 %v5217_v20, %v1895_v1  ;;  %3684 = vmatprep.mubr.f32.mxu1 %v5281_v21  ;;  %3726 = vmatprep.subr.mxu1 %v3337_v24 }
 0x2a9   : > { %v1897_v3 = vpop.f32.mrf.mxu1  ;;  %3727 = vmatpush3.msra.mxu1 %v3337_v24 }
 0x2aa   : > { %2258 = vst [vmem:[#allocation2 + $0x60] sm:$0xff] %v2226_v7  ;;  %v2121_v32 = vadd.f32 %v3618_v60, %v1896_v57  ;;  %3728 = vmatprep.subr.mxu1 %v3336_v16 }
 0x2ab   : > { %v1900_v29 = vpop.f32.mrf.mxu1  ;;  %v3621_v8 = vpop.f32.mrf.mxu0  ;;  %3729 = vmatpush3.msra.mxu1 %v3336_v16 }
 0x2ac   : > { %v2227_v31 = vmax.f32 %v2121_v32, 0.0  ;;  %v1901_v49 = vadd.f32 %v5217_v20, %v1900_v29  ;;  %3730 = vmatprep.subr.mxu1 %v3335_v54 }
 0x2ad   : > { %v1902_v6 = vpop.f32.mrf.mxu1  ;;  %v2125_v33 = vpop.f32.mrf.mxu0  ;;  %v2288_v35 = vld [vmem:[#allocation2 + $0x50] ss:$2 sm:$0xff]  ;;  %v2320_v14 = vld [vmem:[#allocation2 + $0x51] ss:$2 sm:$0xff]  ;;  %3731 = vmatpush3.msra.mxu1 %v3335_v54 }
 0x2ae   : > { %2259 = vst [vmem:[#allocation2 + $0x68] sm:$0xff] %v2227_v31  ;;  %v2126_v28 = vadd.f32 %v2125_v33, %v1901_v49  ;;  %v5295_v22 = vmax.f32 %v2288_v35, %v2320_v14  ;;  %3732 = vmatprep.subr.mxu1 %v3334_v15 }
 0x2af   : > { %v1905_v4 = vpop.f32.mrf.mxu1  ;;  %3733 = vmatpush3.msra.mxu1 %v3334_v15 }
 0x2b0   : > { %v2228_v37 = vmax.f32 %v2126_v28, 0.0  ;;  %v1906_v30 = vadd.f32 %v5217_v20, %v1905_v4  ;;  %3685 = vmatmul.mubr.f32.gmra.mxu1 %v5295_v22 }
 0x2b1   : > { %v1907_v36 = vpop.f32.mrf.mxu1 }
 0x2b2   : > { %2260 = vst [vmem:[#allocation2 + $0x70] sm:$0xff] %v2228_v37  ;;  %v2131_v27 = vadd.f32 %v3621_v8, %v1906_v30 }
 0x2b3   : > { %v1910_v46 = vpop.f32.mrf.mxu1  ;;  %v3624_v40 = vpop.f32.mrf.mxu0 }
 0x2b4   : > { %v2229_v48 = vmax.f32 %v2131_v27, 0.0  ;;  %v1911_v63 = vadd.f32 %v5217_v20, %v1910_v46 }
 0x2b5   : > { %v1912_v41 = vpop.f32.mrf.mxu1  ;;  %v2135_v42 = vpop.f32.mrf.mxu0  ;;  %v2290_v34 = vld [vmem:[#allocation2 + $0x60] ss:$2 sm:$0xff]  ;;  %v2322_v56 = vld [vmem:[#allocation2 + $0x61] ss:$2 sm:$0xff] }
 0x2b6   : > { %2261 = vst [vmem:[#allocation2 + $0x78] sm:$0xff] %v2229_v48  ;;  %v2136_v45 = vadd.f32 %v2135_v42, %v1911_v63  ;;  %v5300_v12 = vmax.f32 %v2290_v34, %v2322_v56 }
 0x2b7   : > { %v1915_v0 = vpop.f32.mrf.mxu1 }
 0x2b8   : > { %v2230_v18 = vmax.f32 %v2136_v45, 0.0  ;;  %v1916_v44 = vadd.f32 %v5217_v20, %v1915_v0  ;;  %3687 = vmatprep.mubr.f32.mxu1 %v5300_v12 }
 0x2b9   : > { %v1917_v61 = vpop.f32.mrf.mxu1 }
 0x2ba   : > { %2262 = vst [vmem:[#allocation2 + $0x80] sm:$0xff] %v2230_v18  ;;  %v2141_v9 = vadd.f32 %v3624_v40, %v1916_v44 }
 0x2bb   : > { %v1920_v52 = vpop.f32.mrf.mxu1  ;;  %v3627_v23 = vpop.f32.mrf.mxu0 }
 0x2bc   : > { %v2231_v43 = vmax.f32 %v2141_v9, 0.0  ;;  %v1921_v17 = vadd.f32 %v5217_v20, %v1920_v52 }
 0x2bd   : > { %v1922_v58 = vpop.f32.mrf.mxu1  ;;  %v2145_v11 = vpop.f32.mrf.mxu0  ;;  %v2292_v62 = vld [vmem:[#allocation2 + $0x70] ss:$2 sm:$0xff]  ;;  %v2324_v51 = vld [vmem:[#allocation2 + $0x71] ss:$2 sm:$0xff] }
 0x2be   : > { %2263 = vst [vmem:[#allocation2 + $0x88] sm:$0xff] %v2231_v43  ;;  %v2146_v53 = vadd.f32 %v2145_v11, %v1921_v17  ;;  %v5305_v59 = vmax.f32 %v2292_v62, %v2324_v51 }
 0x2bf   : > { %v1925_v60 = vpop.f32.mrf.mxu1 }
 0x2c0   : > { %v2232_v47 = vmax.f32 %v2146_v53, 0.0  ;;  %v1926_v26 = vadd.f32 %v5217_v20, %v1925_v60  ;;  %3688 = vmatmul.mubr.f32.gmra.mxu1 %v5305_v59 }
 0x2c1   : > { %v1927_v19 = vpop.f32.mrf.mxu1 }
 0x2c2   : > { %2264 = vst [vmem:[#allocation2 + $0x90] sm:$0xff] %v2232_v47  ;;  %v2151_v10 = vadd.f32 %v3627_v23, %v1926_v26 }
 0x2c3   : > { %v1930_v25 = vpop.f32.mrf.mxu1  ;;  %v3630_v38 = vpop.f32.mrf.mxu0 }
 0x2c4   : > { %v2233_v2 = vmax.f32 %v2151_v10, 0.0  ;;  %v1931_v24 = vadd.f32 %v5217_v20, %v1930_v25 }
 0x2c5   : > { %v1932_v50 = vpop.f32.mrf.mxu1  ;;  %v2155_v1 = vpop.f32.mrf.mxu0  ;;  %v2294_v16 = vld [vmem:[#allocation2 + $0x80] ss:$2 sm:$0xff]  ;;  %v2326_v7 = vld [vmem:[#allocation2 + $0x81] ss:$2 sm:$0xff] }
 0x2c6   : > { %2265 = vst [vmem:[#allocation2 + $0x98] sm:$0xff] %v2233_v2  ;;  %v2156_v57 = vadd.f32 %v2155_v1, %v1931_v24  ;;  %v5310_v3 = vmax.f32 %v2294_v16, %v2326_v7 }
 0x2c7   : > { %v1935_v54 = vpop.f32.mrf.mxu1 }
 0x2c8   : > { %v2234_v32 = vmax.f32 %v2156_v57, 0.0  ;;  %v1936_v29 = vadd.f32 %v5217_v20, %v1935_v54  ;;  %3690 = vmatprep.mubr.f32.mxu1 %v5310_v3 }
 0x2c9   : > { %v1937_v8 = vpop.f32.mrf.mxu1 }
 0x2ca   : > { %2266 = vst [vmem:[#allocation2 + $0xa0] sm:$0xff] %v2234_v32  ;;  %v2161_v15 = vadd.f32 %v3630_v38, %v1936_v29 }
 0x2cb   : > { %v1940_v31 = vpop.f32.mrf.mxu1  ;;  %v3633_v49 = vpop.f32.mrf.mxu0 }
 0x2cc   : > { %v2235_v6 = vmax.f32 %v2161_v15, 0.0  ;;  %v1941_v33 = vadd.f32 %v5217_v20, %v1940_v31 }
 0x2cd   : > { %v1942_v35 = vpop.f32.mrf.mxu1  ;;  %v2165_v14 = vpop.f32.mrf.mxu0  ;;  %v2296_v28 = vld [vmem:[#allocation2 + $0x90] ss:$2 sm:$0xff]  ;;  %v2328_v4 = vld [vmem:[#allocation2 + $0x91] ss:$2 sm:$0xff] }
 0x2ce   : > { %2267 = vst [vmem:[#allocation2 + $0xa8] sm:$0xff] %v2235_v6  ;;  %v2166_v37 = vadd.f32 %v2165_v14, %v1941_v33  ;;  %v5315_v30 = vmax.f32 %v2296_v28, %v2328_v4 }
 0x2cf   : > { %v1945_v36 = vpop.f32.mrf.mxu1 }
 0x2d0   : > { %v2236_v27 = vmax.f32 %v2166_v37, 0.0  ;;  %v1946_v46 = vadd.f32 %v5217_v20, %v1945_v36  ;;  %3691 = vmatmul.mubr.f32.gmra.mxu1 %v5315_v30 }
 0x2d1   : > { %v1947_v40 = vpop.f32.mrf.mxu1 }
 0x2d2   : > { %2268 = vst [vmem:[#allocation2 + $0xb0] sm:$0xff] %v2236_v27  ;;  %v2171_v48 = vadd.f32 %v3633_v49, %v1946_v46 }
 0x2d3   : > { %v1950_v63 = vpop.f32.mrf.mxu1  ;;  %v3636_v41 = vpop.f32.mrf.mxu0 }
 0x2d4   : > { %v2237_v42 = vmax.f32 %v2171_v48, 0.0  ;;  %v1951_v34 = vadd.f32 %v5217_v20, %v1950_v63 }
 0x2d5   : > { %v1952_v56 = vpop.f32.mrf.mxu1  ;;  %v2175_v45 = vpop.f32.mrf.mxu0  ;;  %v2298_v0 = vld [vmem:[#allocation2 + $0xa0] ss:$2 sm:$0xff]  ;;  %v2330_v18 = vld [vmem:[#allocation2 + $0xa1] ss:$2 sm:$0xff] }
 0x2d6   : > { %2269 = vst [vmem:[#allocation2 + $0xb8] sm:$0xff] %v2237_v42  ;;  %v2176_v44 = vadd.f32 %v2175_v45, %v1951_v34  ;;  %v5320_v61 = vmax.f32 %v2298_v0, %v2330_v18 }
 0x2d7   : > { %v1955_v9 = vpop.f32.mrf.mxu1 }
 0x2d8   : > { %v2238_v52 = vmax.f32 %v2176_v44, 0.0  ;;  %v1956_v23 = vadd.f32 %v5217_v20, %v1955_v9  ;;  %3693 = vmatprep.mubr.f32.mxu1 %v5320_v61 }
 0x2d9   : > { %v1957_v43 = vpop.f32.mrf.mxu1 }
 0x2da   : > { %2270 = vst [vmem:[#allocation2 + $0xc0] sm:$0xff] %v2238_v52  ;;  %v2181_v17 = vadd.f32 %v3636_v41, %v1956_v23 }
 0x2db   : > { %v1960_v58 = vpop.f32.mrf.mxu1  ;;  %v3639_v11 = vpop.f32.mrf.mxu0 }
 0x2dc   : > { %v2239_v62 = vmax.f32 %v2181_v17, 0.0  ;;  %v1961_v51 = vadd.f32 %v5217_v20, %v1960_v58  ;;  %v2840_v58 = vld [vmem:[#allocation8 + $0xd8] sm:$0xff] }
 0x2dd   : > { %v1962_v53 = vpop.f32.mrf.mxu1  ;;  %v2185_v60 = vpop.f32.mrf.mxu0  ;;  %v2300_v47 = vld [vmem:[#allocation2 + $0xb0] ss:$2 sm:$0xff]  ;;  %v2332_v26 = vld [vmem:[#allocation2 + $0xb1] ss:$2 sm:$0xff] }
 0x2de   : > { %2271 = vst [vmem:[#allocation2 + $0xc8] sm:$0xff] %v2239_v62  ;;  %v2186_v19 = vadd.f32 %v2185_v60, %v1961_v51  ;;  %v5325_v10 = vmax.f32 %v2300_v47, %v2332_v26  ;;  %v2824_v62 = vld [vmem:[#allocation8 + $0x58] sm:$0xff]  ;;  %v2858_v51 = vld [vmem:[#allocation8 + $0x168] sm:$0xff]  ;;  %v2839_v53 = vld [vmem:[#allocation8 + $0xd0] sm:$0xff] }
 0x2df   : > { %v1965_v25 = vpop.f32.mrf.mxu1  ;;  %v2873_v60 = vld [vmem:[#allocation8 + $0x1e0] sm:$0xff]  ;;  %v2823_v47 = vld [vmem:[#allocation8 + $0x50] sm:$0xff] }
 0x2e0   : > { %v2240_v38 = vmax.f32 %v2186_v19, 0.0  ;;  %v1966_v2 = vadd.f32 %v5217_v20, %v1965_v25  ;;  %3694 = vmatmul.mubr.f32.gmra.mxu1 %v5325_v10  ;;  %v2857_v26 = vld [vmem:[#allocation8 + $0x160] sm:$0xff]  ;;  %v2838_v19 = vld [vmem:[#allocation8 + $0xc8] sm:$0xff] }
 0x2e1   : > { %v1967_v24 = vpop.f32.mrf.mxu1  ;;  %v2822_v25 = vld [vmem:[#allocation8 + $0x48] sm:$0xff] }
 0x2e2   : > { %2272 = vst [vmem:[#allocation2 + $0xd0] sm:$0xff] %v2240_v38  ;;  %v2191_v50 = vadd.f32 %v3639_v11, %v1966_v2  ;;  %v2874_v11 = vld [vmem:[#allocation8 + $0x1e8] sm:$0xff]  ;;  %v2856_v38 = vld [vmem:[#allocation8 + $0x158] sm:$0xff]  ;;  %v2837_v2 = vld [vmem:[#allocation8 + $0xc0] sm:$0xff] }
 0x2e3   : > { %v1970_v1 = vpop.f32.mrf.mxu1  ;;  %v3642_v16 = vpop.f32.mrf.mxu0  ;;  %v2871_v24 = vld [vmem:[#allocation8 + $0x1d0] sm:$0xff] }
 0x2e4   : > { %v2241_v7 = vmax.f32 %v2191_v50, 0.0  ;;  %v1971_v57 = vadd.f32 %v5217_v20, %v1970_v1  ;;  %v2821_v50 = vld [vmem:[#allocation8 + $0x40] sm:$0xff]  ;;  %v2855_v1 = vld [vmem:[#allocation8 + $0x150] sm:$0xff] }
 0x2e5   : > { %v1972_v54 = vpop.f32.mrf.mxu1  ;;  %v2195_v32 = vpop.f32.mrf.mxu0  ;;  %v2302_v29 = vld [vmem:[#allocation2 + $0xc0] ss:$2 sm:$0xff]  ;;  %v2334_v8 = vld [vmem:[#allocation2 + $0xc1] ss:$2 sm:$0xff] }
 0x2e6   : > { %2273 = vst [vmem:[#allocation2 + $0xd8] sm:$0xff] %v2241_v7  ;;  %v2196_v15 = vadd.f32 %v2195_v32, %v1971_v57  ;;  %v2353_v31 = vmax.f32 %v2302_v29, %v2334_v8  ;;  %v2870_v7 = vld [vmem:[#allocation8 + $0x1c8] sm:$0xff]  ;;  %v2820_v57 = vld [vmem:[#allocation8 + $0x38] sm:$0xff]  ;;  %v2869_v32 = vld [vmem:[#allocation8 + $0x1c0] sm:$0xff] }
 0x2e7   : > { %v1975_v49 = vpop.f32.mrf.mxu1  ;;  %v2854_v54 = vld [vmem:[#allocation8 + $0x148] sm:$0xff]  ;;  %v2835_v29 = vld [vmem:[#allocation8 + $0xb0] sm:$0xff]  ;;  %v2853_v8 = vld [vmem:[#allocation8 + $0x140] sm:$0xff] }
 0x2e8   : > { %v2242_v6 = vmax.f32 %v2196_v15, 0.0  ;;  %v1976_v33 = vadd.f32 %v5217_v20, %v1975_v49  ;;  %3696 = vmatprep.mubr.f32.mxu1 %v2353_v31  ;;  %v2819_v15 = vld [vmem:[#allocation8 + $0x30] sm:$0xff]  ;;  %v2834_v49 = vld [vmem:[#allocation8 + $0xa8] sm:$0xff] }
 0x2e9   : > { %v1977_v35 = vpop.f32.mrf.mxu1 }
 0x2ea   : > { %2274 = vst [vmem:[#allocation2 + $0xe0] sm:$0xff] %v2242_v6  ;;  %v2201_v14 = vadd.f32 %v3642_v16, %v1976_v33  ;;  %v2836_v16 = vld [vmem:[#allocation8 + $0xb8] sm:$0xff]  ;;  %v2818_v33 = vld [vmem:[#allocation8 + $0x28] sm:$0xff]  ;;  %v2867_v35 = vld [vmem:[#allocation8 + $0x1b0] sm:$0xff] }
 0x2eb   : > { %v1980_v28 = vpop.f32.mrf.mxu1  ;;  %v3645_v4 = vpop.f32.mrf.mxu0  ;;  %v2852_v6 = vld [vmem:[#allocation8 + $0x138] sm:$0xff] }
 0x2ec   : > { %v2243_v37 = vmax.f32 %v2201_v14, 0.0  ;;  %v1981_v36 = vadd.f32 %v5217_v20, %v1980_v28  ;;  %v2833_v14 = vld [vmem:[#allocation8 + $0xa0] sm:$0xff]  ;;  %v2851_v28 = vld [vmem:[#allocation8 + $0x130] sm:$0xff] }
 0x2ed   : > { %v1982_v27 = vpop.f32.mrf.mxu1  ;;  %v2205_v46 = vpop.f32.mrf.mxu0  ;;  %v2304_v40 = vld [vmem:[#allocation2 + $0xd0] ss:$2 sm:$0xff]  ;;  %v2336_v48 = vld [vmem:[#allocation2 + $0xd1] ss:$2 sm:$0xff] }
 0x2ee   : > { %2275 = vst [vmem:[#allocation2 + $0xe8] sm:$0xff] %v2243_v37  ;;  %v2206_v63 = vadd.f32 %v2205_v46, %v1981_v36  ;;  %v2354_v41 = vmax.f32 %v2304_v40, %v2336_v48  ;;  %v2866_v37 = vld [vmem:[#allocation8 + $0x1a8] sm:$0xff]  ;;  %v2832_v36 = vld [vmem:[#allocation8 + $0x98] sm:$0xff]  ;;  %v2865_v40 = vld [vmem:[#allocation8 + $0x1a0] sm:$0xff] }
 0x2ef   : > { %v1985_v42 = vpop.f32.mrf.mxu1  ;;  %v2850_v27 = vld [vmem:[#allocation8 + $0x128] sm:$0xff]  ;;  %v2816_v46 = vld [vmem:[#allocation8 + $0x18] sm:$0xff]  ;;  %v2831_v48 = vld [vmem:[#allocation8 + $0x90] sm:$0xff] }
 0x2f0   : > { %v2244_v34 = vmax.f32 %v2206_v63, 0.0  ;;  %v1986_v56 = vadd.f32 %v5217_v20, %v1985_v42  ;;  %3697 = vmatmul.mubr.f32.gmra.mxu1 %v2354_v41  ;;  %v2844_v20 = vld [vmem:[#allocation8 + $0xf8] sm:$0xff]  ;;  %v2849_v63 = vld [vmem:[#allocation8 + $0x120] sm:$0xff] }
 0x2f1   : > { %v1987_v45 = vpop.f32.mrf.mxu1  ;;  %3472 = vmatprep.subr.mxu0 %v2844_v20  ;;  %v2864_v42 = vld [vmem:[#allocation8 + $0x198] sm:$0xff] }
 0x2f2   : > { %2276 = vst [vmem:[#allocation2 + $0xf0] sm:$0xff] %v2244_v34  ;;  %v2211_v0 = vadd.f32 %v3645_v4, %v1986_v56  ;;  %v2817_v4 = vld [vmem:[#allocation8 + $0x20] sm:$0xff]  ;;  %v2848_v34 = vld [vmem:[#allocation8 + $0x118] sm:$0xff]  ;;  %v2863_v56 = vld [vmem:[#allocation8 + $0x190] sm:$0xff] }
 0x2f3   : > { %v2847_v45 = vld [vmem:[#allocation8 + $0x110] sm:$0xff] }
 0x2f4   : > { %v2245_v18 = vmax.f32 %v2211_v0, 0.0 }
 0x2f5   : > { %v2306_v44 = vld [vmem:[#allocation2 + $0xe0] ss:$2 sm:$0xff]  ;;  %v2338_v9 = vld [vmem:[#allocation2 + $0xe1] ss:$2 sm:$0xff] }
 0x2f6   : > { %2277 = vst [vmem:[#allocation2 + $0xf8] sm:$0xff] %v2245_v18  ;;  %v2355_v52 = vmax.f32 %v2306_v44, %v2338_v9 }
 0x2f8   : > { %3699 = vmatprep.mubr.f32.mxu1 %v2355_v52 }
 0x2fd   : > { %v2308_v23 = vld [vmem:[#allocation2 + $0xf0] ss:$2 sm:$0xff]  ;;  %v2340_v43 = vld [vmem:[#allocation2 + $0xf1] ss:$2 sm:$0xff] }
 0x2fe   : > { %v2356_v17 = vmax.f32 %v2308_v23, %v2340_v43 }
 0x300   : > { %3700 = vmatmul.mubr.f32.gmra.mxu1 %v2356_v17 }
 0x301   : > { %3734 = vmatprep.mubr.f32.mxu1 %v5224_v55  ;;  %v2828_v55 = vld [vmem:[#allocation8 + $0x78] sm:$0xff] }
 0x302   : > { %3473 = vmatpush3.msra.mxu0 %v2828_v55 }
 0x304   : > { %3735 = vmatmul.mubr.f32.vlgmr.msra.gmra.mxu1 %v5229_v5  ;;  %v2843_v5 = vld [vmem:[#allocation8 + $0xf0] sm:$0xff] }
 0x305   : > { %3737 = vmatprep.mubr.f32.mxu1 %v5247_v39  ;;  %v2827_v39 = vld [vmem:[#allocation8 + $0x70] sm:$0xff]  ;;  %3474 = vmatprep.subr.mxu0 %v2843_v5 }
 0x306   : > { %3475 = vmatpush3.msra.mxu0 %v2827_v39 }
 0x308   : > { %3738 = vmatmul.mubr.f32.gmra.mxu1 %v5264_v13  ;;  %v2842_v13 = vld [vmem:[#allocation8 + $0xe8] sm:$0xff] }
 0x309   : > { %3740 = vmatprep.mubr.f32.mxu1 %v5281_v21  ;;  %v2826_v21 = vld [vmem:[#allocation8 + $0x68] sm:$0xff]  ;;  %3476 = vmatprep.subr.mxu0 %v2842_v13 }
 0x30a   : > { %3477 = vmatpush3.msra.mxu0 %v2826_v21 }
 0x30c   : > { %3741 = vmatmul.mubr.f32.gmra.mxu1 %v5295_v22  ;;  %v2841_v22 = vld [vmem:[#allocation8 + $0xe0] sm:$0xff] }
 0x30d   : > { %3743 = vmatprep.mubr.f32.mxu1 %v5300_v12  ;;  %v2876_v12 = vld [vmem:[#allocation8 + $0x1f8] sm:$0xff]  ;;  %3478 = vmatprep.subr.mxu0 %v2841_v22 }
 0x30e   : > { %3510 = vmatprep.subr.mxu1 %v2876_v12 }
 0x310   : > { %3744 = vmatmul.mubr.f32.gmra.mxu1 %v5305_v59  ;;  %v2860_v59 = vld [vmem:[#allocation8 + $0x178] sm:$0xff] }
 0x311   : > { %3746 = vmatprep.mubr.f32.mxu1 %v5310_v3  ;;  %v2875_v3 = vld [vmem:[#allocation8 + $0x1f0] sm:$0xff]  ;;  %3511 = vmatpush3.msra.mxu1 %v2860_v59 }
 0x312   : > { %3512 = vmatprep.subr.mxu1 %v2875_v3 }
 0x314   : > { %3747 = vmatmul.mubr.f32.gmra.mxu1 %v5315_v30  ;;  %v2825_v30 = vld [vmem:[#allocation8 + $0x60] sm:$0xff] }
 0x315   : > { %3749 = vmatprep.mubr.f32.mxu1 %v5320_v61  ;;  %v2859_v61 = vld [vmem:[#allocation8 + $0x170] sm:$0xff]  ;;  %3479 = vmatpush3.msra.mxu0 %v2825_v30 }
 0x316   : > { %3513 = vmatpush3.msra.mxu1 %v2859_v61  ;;  %3480 = vmatprep.subr.mxu0 %v2840_v58 }
 0x317   : > { %3514 = vmatprep.subr.mxu1 %v2874_v11  ;;  %3481 = vmatpush3.msra.mxu0 %v2824_v62 }
 0x318   : > { %3750 = vmatmul.mubr.f32.gmra.mxu1 %v5325_v10  ;;  %v2872_v10 = vld [vmem:[#allocation8 + $0x1d8] sm:$0xff]  ;;  %3482 = vmatprep.subr.mxu0 %v2839_v53 }
 0x319   : > { %3752 = vmatprep.mubr.f32.mxu1 %v2353_v31  ;;  %3515 = vmatpush3.msra.mxu1 %v2858_v51  ;;  %v2868_v31 = vld [vmem:[#allocation8 + $0x1b8] sm:$0xff] }
 0x31a   : > { %3516 = vmatprep.subr.mxu1 %v2873_v60  ;;  %3483 = vmatpush3.msra.mxu0 %v2823_v47 }
 0x31b   : > { %3517 = vmatpush3.msra.mxu1 %v2857_v26  ;;  %3484 = vmatprep.subr.mxu0 %v2838_v19 }
 0x31c   : > { %3753 = vmatmul.mubr.f32.gmra.mxu1 %v2354_v41  ;;  %3518 = vmatprep.subr.mxu1 %v2872_v10  ;;  %v2815_v41 = vld [vmem:[#allocation8 + $0x10] sm:$0xff] }
 0x31d   : > { %3755 = vmatprep.mubr.f32.mxu1 %v2355_v52  ;;  %3485 = vmatpush3.msra.mxu0 %v2822_v25 }
 0x31e   : > { %3519 = vmatpush3.msra.mxu1 %v2856_v38  ;;  %3486 = vmatprep.subr.mxu0 %v2837_v2 }
 0x31f   : > { %3520 = vmatprep.subr.mxu1 %v2871_v24  ;;  %3487 = vmatpush3.msra.mxu0 %v2821_v50 }
 0x320   : > { %3756 = vmatmul.mubr.f32.gmra.mxu1 %v2356_v17  ;;  %3488 = vmatprep.subr.mxu0 %v2836_v16  ;;  %v2862_v16 = vld [vmem:[#allocation8 + $0x188] sm:$0xff] }
 0x321   : > { %3521 = vmatpush3.msra.mxu1 %v2855_v1  ;;  %3489 = vmatpush3.msra.mxu0 %v2820_v57  ;;  %v2830_v1 = vld [vmem:[#allocation8 + $0x88] sm:$0xff] }
 0x322   : > { %3522 = vmatprep.subr.mxu1 %v2870_v7  ;;  %3490 = vmatprep.subr.mxu0 %v2835_v29  ;;  %v2814_v7 = vld [vmem:[#allocation8 + $0x8] sm:$0xff]  ;;  %v2861_v29 = vld [vmem:[#allocation8 + $0x180] sm:$0xff] }
 0x323   : > { %3523 = vmatpush3.msra.mxu1 %v2854_v54  ;;  %3491 = vmatpush3.msra.mxu0 %v2819_v15  ;;  %v2846_v54 = vld [vmem:[#allocation8 + $0x108] sm:$0xff]  ;;  %v2813_v15 = vld [vmem:[#allocation8] sm:$0xff] }
 0x324   : > { %3524 = vmatprep.subr.mxu1 %v2869_v32  ;;  %3492 = vmatprep.subr.mxu0 %v2834_v49  ;;  %v2829_v32 = vld [vmem:[#allocation8 + $0x80] sm:$0xff] }
 0x325   : > { %3525 = vmatpush3.msra.mxu1 %v2853_v8  ;;  %3493 = vmatpush3.msra.mxu0 %v2818_v33 }
 0x326   : > { %3526 = vmatprep.subr.mxu1 %v2868_v31  ;;  %3494 = vmatprep.subr.mxu0 %v2833_v14  ;;  %v2845_v31 = vld [vmem:[#allocation8 + $0x100] sm:$0xff] }
 0x327   : > { %3527 = vmatpush3.msra.mxu1 %v2852_v6  ;;  %3495 = vmatpush3.msra.mxu0 %v2817_v4 }
 0x328   : > { %3528 = vmatprep.subr.mxu1 %v2867_v35  ;;  %3496 = vmatprep.subr.mxu0 %v2832_v36 }
 0x329   : > { %3529 = vmatpush3.msra.mxu1 %v2851_v28  ;;  %3497 = vmatpush3.msra.mxu0 %v2816_v46 }
 0x32a   : > { %3530 = vmatprep.subr.mxu1 %v2866_v37  ;;  %3498 = vmatprep.subr.mxu0 %v2831_v48 }
 0x32b   : > { %3531 = vmatpush3.msra.mxu1 %v2850_v27  ;;  %3499 = vmatpush3.msra.mxu0 %v2815_v41 }
 0x32c   : > { %3532 = vmatprep.subr.mxu1 %v2865_v40  ;;  %3500 = vmatprep.subr.mxu0 %v2830_v1 }
 0x32d   : > { %3533 = vmatpush3.msra.mxu1 %v2849_v63  ;;  %3501 = vmatpush3.msra.mxu0 %v2814_v7 }
 0x32e   : > { %3534 = vmatprep.subr.mxu1 %v2864_v42  ;;  %3502 = vmatprep.subr.mxu0 %v2829_v32 }
 0x32f   : > { %3535 = vmatpush3.msra.mxu1 %v2848_v34  ;;  %3503 = vmatpush3.msra.mxu0 %v2813_v15  ;;  %v3050_v15 = vld [vmem:[#allocation9 + $0x70] sm:$0xff] }
 0x330   : > { %3536 = vmatprep.subr.mxu1 %v2863_v56 }
 0x331   : > { %3537 = vmatpush3.msra.mxu1 %v2847_v45 }
 0x332   : > { %3538 = vmatprep.subr.mxu1 %v2862_v16 }
 0x333   : > { %3539 = vmatpush3.msra.mxu1 %v2846_v54 }
 0x334   : > { %3540 = vmatprep.subr.mxu1 %v2861_v29 }
 0x335   : > { %3541 = vmatpush3.msra.mxu1 %v2845_v31  ;;  %v3049_v31 = vld [vmem:[#allocation9 + $0x68] sm:$0xff] }
 0x350   : > { %v3680_v0 = vpop.f32.mrf.mxu1 }
 0x352   : > { %v2439_v18 = vpop.f32.mrf.mxu1 }
 0x360   : > { %v3683_v44 = vpop.f32.mrf.mxu1 }
 0x362   : > { %v2449_v9 = vpop.f32.mrf.mxu1 }
 0x370   : > { %v3686_v52 = vpop.f32.mrf.mxu1 }
 0x372   : > { %v2459_v23 = vpop.f32.mrf.mxu1 }
 0x380   : > { %v3689_v43 = vpop.f32.mrf.mxu1 }
 0x382   : > { %v2469_v17 = vpop.f32.mrf.mxu1 }
 0x390   : > { %v3692_v20 = vpop.f32.mrf.mxu1 }
 0x392   : > { %v2479_v55 = vpop.f32.mrf.mxu1 }
 0x3a0   : > { %v3695_v5 = vpop.f32.mrf.mxu1 }
 0x3a2   : > { %v5345_v39 = vpop.f32.mrf.mxu1 }
 0x3b0   : > { %v5347_v13 = vpop.f32.mrf.mxu1 }
 0x3b2   : > { %v5349_v21 = vpop.f32.mrf.mxu1 }
 0x3c0   : > { %v5351_v22 = vpop.f32.mrf.mxu1 }
 0x3c2   : > { %v5353_v12 = vpop.f32.mrf.mxu1 }
 0x3c4   : > { %v3736_v59 = vpop.f32.mrf.mxu1 }
 0x3c5   : > { %v2681_v3 = vmax.f32 %v3680_v0, %v3736_v59 }
 0x3c6   : > { %v2601_v30 = vpop.f32.mrf.mxu1 }
 0x3c7   : > { %2697 = vst.msk [vmem:[#allocation2 + $0x8] sm:$0xff] %vm908_vm3, %v2681_v3  ;;  %v2680_v61 = vmax.f32 %v2439_v18, %v2601_v30 }
 0x3c8   : > { %v3739_v58 = vpop.f32.mrf.mxu1 }
 0x3c9   : > { %2696 = vst.msk [vmem:[#allocation2] sm:$0xff] %vm908_vm3, %v2680_v61  ;;  %v2683_v11 = vmax.f32 %v3683_v44, %v3739_v58 }
 0x3ca   : > { %v2611_v62 = vpop.f32.mrf.mxu1 }
 0x3cb   : > { %2699 = vst.msk [vmem:[#allocation2 + $0x18] sm:$0xff] %vm908_vm3, %v2683_v11  ;;  %v2682_v51 = vmax.f32 %v2449_v9, %v2611_v62 }
 0x3cc   : > { %v3742_v53 = vpop.f32.mrf.mxu1 }
 0x3cd   : > { %2698 = vst.msk [vmem:[#allocation2 + $0x10] sm:$0xff] %vm908_vm3, %v2682_v51  ;;  %v2685_v60 = vmax.f32 %v3686_v52, %v3742_v53 }
 0x3ce   : > { %v2621_v47 = vpop.f32.mrf.mxu1 }
 0x3cf   : > { %2701 = vst.msk [vmem:[#allocation2 + $0x28] sm:$0xff] %vm908_vm3, %v2685_v60  ;;  %v2684_v26 = vmax.f32 %v2459_v23, %v2621_v47 }
 0x3d0   : > { %v3745_v19 = vpop.f32.mrf.mxu1 }
 0x3d1   : > { %2700 = vst.msk [vmem:[#allocation2 + $0x20] sm:$0xff] %vm908_vm3, %v2684_v26  ;;  %v2687_v10 = vmax.f32 %v3689_v43, %v3745_v19  ;;  %v3051_v43 = vld [vmem:[#allocation9 + $0x78] sm:$0xff] }
 0x3d2   : > { %v2631_v25 = vpop.f32.mrf.mxu1  ;;  %3758 = vmatprep.subr.mxu0 %v3051_v43 }
 0x3d3   : > { %2703 = vst.msk [vmem:[#allocation2 + $0x38] sm:$0xff] %vm908_vm3, %v2687_v10  ;;  %v2686_v38 = vmax.f32 %v2469_v17, %v2631_v25 }
 0x3d4   : > { %v3748_v2 = vpop.f32.mrf.mxu1  ;;  %v2750_v33 = vld [vmem:[#allocation2 + $0x5] ss:$8 sm:$0xf]  ;;  %v2766_v35 = vld [vmem:[#allocation2 + $0x7] ss:$8 sm:$0xf] }
 0x3d5   : > { %2702 = vst.msk [vmem:[#allocation2 + $0x30] sm:$0xff] %vm908_vm3, %v2686_v38  ;;  %v2689_v24 = vmax.f32 %v3692_v20, %v3748_v2  ;;  %v2719_v28 = vld [vmem:[#allocation2 + $0x1] ss:$8 sm:$0xf] }
 0x3d6   : > { %v2641_v50 = vpop.f32.mrf.mxu1  ;;  %v2734_v4 = vld [vmem:[#allocation2 + $0x3] ss:$8 sm:$0xf]  ;;  %v2758_v47 = vld [vmem:[#allocation2 + $0x6] ss:$8 sm:$0xf] }
 0x3d7   : > { %2705 = vst.msk [vmem:[#allocation2 + $0x48] sm:$0xff] %vm908_vm3, %v2689_v24  ;;  %v2688_v57 = vmax.f32 %v2479_v55, %v2641_v50  ;;  %v2742_v26 = vld [vmem:[#allocation2 + $0x4] ss:$8 sm:$0xf] }
 0x3d8   : > { %v3751_v8 = vpop.f32.mrf.mxu1  ;;  %v2726_v38 = vld [vmem:[#allocation2 + $0x2] ss:$8 sm:$0xf]  ;;  %v2712_v24 = vld [vmem:[#allocation2] ss:$8 sm:$0xf] }
 0x3d9   : > { %2704 = vst.msk [vmem:[#allocation2 + $0x40] sm:$0xff] %vm908_vm3, %v2688_v57  ;;  %v2691_v49 = vmax.f32 %v3695_v5, %v3751_v8 }
 0x3da   : > { %v2651_v6 = vpop.f32.mrf.mxu1 }
 0x3db   : > { %2707 = vst.msk [vmem:[#allocation2 + $0x58] sm:$0xff] %vm908_vm3, %v2691_v49  ;;  %v2690_v14 = vmax.f32 %v5345_v39, %v2651_v6 }
 0x3dc   : > { %v3754_v37 = vpop.f32.mrf.mxu1  ;;  %v2751_v36 = vld [vmem:[#allocation2 + $0x5] ss:$8 sm:$0xf0]  ;;  %v2767_v27 = vld [vmem:[#allocation2 + $0x7] ss:$8 sm:$0xf0] }
 0x3dd   : > { %2706 = vst.msk [vmem:[#allocation2 + $0x50] sm:$0xff] %vm908_vm3, %v2690_v14  ;;  %v2693_v46 = vmax.f32 %v5347_v13, %v3754_v37  ;;  %v2752_v40 = vor.u32 %v2751_v36, %v2750_v33  ;;  %v2768_v48 = vor.u32 %v2767_v27, %v2766_v35  ;;  %v2720_v63 = vld [vmem:[#allocation2 + $0x1] ss:$8 sm:$0xf0] }
 0x3de   : > { %v2735_v41 = vld [vmem:[#allocation2 + $0x3] ss:$8 sm:$0xf0]  ;;  %v2661_v42 = vpop.f32.mrf.mxu1  ;;  %v2721_v34 = vor.u32 %v2720_v63, %v2719_v28  ;;  %v2743_v62 = vld [vmem:[#allocation2 + $0x4] ss:$8 sm:$0xf0] }
 0x3df   : > { %v2736_v56 = vor.u32 %v2735_v41, %v2734_v4  ;;  %2709 = vst.msk [vmem:[#allocation2 + $0x68] sm:$0xff] %vm908_vm3, %v2693_v46  ;;  %v2692_v45 = vmax.f32 %v5349_v21, %v2661_v42  ;;  %v3881_v0 = vpack.i.bf16 %v2752_v40, %v2768_v48  ;;  %v2727_v51 = vld [vmem:[#allocation2 + $0x2] ss:$8 sm:$0xf0]  ;;  %v2744_v50 = vor.u32 %v2743_v62, %v2742_v26 }
 0x3e0   : > { %v3757_v18 = vpop.f32.mrf.mxu1  ;;  %v2713_v53 = vld [vmem:[#allocation2] ss:$8 sm:$0xf0]  ;;  %v2728_v7 = vor.u32 %v2727_v51, %v2726_v38 }
 0x3e1   : > { %v3876_v44 = vpack.i.bf16 %v2721_v34, %v2736_v56  ;;  %2708 = vst.msk [vmem:[#allocation2 + $0x60] sm:$0xff] %vm908_vm3, %v2692_v45  ;;  %v2695_v9 = vmax.f32 %v5351_v22, %v3757_v18  ;;  %3882 = vrot.lane.b32.xlu1 %v3881_v0, %s4083_s1  ;;  %v2714_v57 = vor.u32 %v2713_v53, %v2712_v24 }
 0x3e2   : > { %v2671_v52 = vpop.f32.mrf.mxu1 }
 0x3e3   : > { %3877 = vrot.lane.b32.xlu0 %v3876_v44, %s4083_s1  ;;  %2711 = vst.msk [vmem:[#allocation2 + $0x78] sm:$0xff] %vm908_vm3, %v2695_v9  ;;  %v2694_v23 = vmax.f32 %v5353_v12, %v2671_v52  ;;  %v2759_v12 = vld [vmem:[#allocation2 + $0x6] ss:$8 sm:$0xf0] }
 0x3e4   : > { %v2754_v17 = vld [vmem:[#allocation2 + $0x45] ss:$8 sm:$0xf]  ;;  %v2770_v20 = vld [vmem:[#allocation2 + $0x47] ss:$8 sm:$0xf]  ;;  %v2760_v2 = vor.u32 %v2759_v12, %v2758_v47 }
 0x3e5   : > { %2710 = vst.msk [vmem:[#allocation2 + $0x70] sm:$0xff] %vm908_vm3, %v2694_v23  ;;  %v2722_v55 = vld [vmem:[#allocation2 + $0x41] ss:$8 sm:$0xf] }
 0x3e6   : > { %v2738_v5 = vld [vmem:[#allocation2 + $0x43] ss:$8 sm:$0xf]  ;;  %v2762_v28 = vld [vmem:[#allocation2 + $0x46] ss:$8 sm:$0xf] }
 0x3e7   : > { %v2746_v4 = vld [vmem:[#allocation2 + $0x44] ss:$8 sm:$0xf]  ;;  %v2730_v46 = vld [vmem:[#allocation2 + $0x42] ss:$8 sm:$0xf] }
 0x3e8   : > { %v2716_v48 = vld [vmem:[#allocation2 + $0x40] ss:$8 sm:$0xf] }
 0x3e9   : > { %v3048_v9 = vld [vmem:[#allocation9 + $0x60] sm:$0xff]  ;;  %v3047_v52 = vld [vmem:[#allocation9 + $0x58] sm:$0xff]  ;;  %v3046_v23 = vld [vmem:[#allocation9 + $0x50] sm:$0xff] }
 0x3ec   : > { %v2755_v39 = vld [vmem:[#allocation2 + $0x45] ss:$8 sm:$0xf0]  ;;  %v2771_v13 = vld [vmem:[#allocation2 + $0x47] ss:$8 sm:$0xf0] }
 0x3ed   : > { %v2756_v21 = vor.u32 %v2755_v39, %v2754_v17  ;;  %v2772_v22 = vor.u32 %v2771_v13, %v2770_v20  ;;  %v2723_v59 = vld [vmem:[#allocation2 + $0x41] ss:$8 sm:$0xf0]  ;;  %v2739_v3 = vld [vmem:[#allocation2 + $0x43] ss:$8 sm:$0xf0] }
 0x3ee   : > { %v2724_v30 = vor.u32 %v2723_v59, %v2722_v55  ;;  %v2740_v61 = vor.u32 %v2739_v3, %v2738_v5  ;;  %v2763_v49 = vld [vmem:[#allocation2 + $0x46] ss:$8 sm:$0xf0]  ;;  %v2747_v6 = vld [vmem:[#allocation2 + $0x44] ss:$8 sm:$0xf0] }
 0x3ef   : > { %v3891_v58 = vpack.i.bf16 %v2756_v21, %v2772_v22  ;;  %v2731_v33 = vld [vmem:[#allocation2 + $0x42] ss:$8 sm:$0xf0]  ;;  %v2717_v35 = vld [vmem:[#allocation2 + $0x40] ss:$8 sm:$0xf0]  ;;  %v2764_v40 = vor.u32 %v2763_v49, %v2762_v28  ;;  %v2748_v63 = vor.u32 %v2747_v6, %v2746_v4 }
 0x3f0   : > { %v3886_v11 = vpack.i.bf16 %v2724_v30, %v2740_v61  ;;  %v2732_v34 = vor.u32 %v2731_v33, %v2730_v46  ;;  %v2718_v56 = vor.u32 %v2717_v35, %v2716_v48  ;;  %v3044_v17 = vld [vmem:[#allocation9 + $0x40] sm:$0xff]  ;;  %v3043_v20 = vld [vmem:[#allocation9 + $0x38] sm:$0xff]  ;;  %v3042_v55 = vld [vmem:[#allocation9 + $0x30] sm:$0xff] }
 0x3f1   : > { %3892 = vrot.lane.b32.xlu1 %v3891_v58, %s4083_s1  ;;  %v3041_v5 = vld [vmem:[#allocation9 + $0x28] sm:$0xff]  ;;  %v3040_v39 = vld [vmem:[#allocation9 + $0x20] sm:$0xff]  ;;  %v3039_v13 = vld [vmem:[#allocation9 + $0x18] sm:$0xff] }
 0x3f2   : > { %3887 = vrot.lane.b32.xlu0 %v3886_v11, %s4083_s1  ;;  %v3038_v21 = vld [vmem:[#allocation9 + $0x10] sm:$0xff]  ;;  %v3037_v22 = vld [vmem:[#allocation9 + $0x8] sm:$0xff]  ;;  %v3036_v59 = vld [vmem:[#allocation9] sm:$0xff]  ;;  %s4008_s1 = scalar_lea.vmem %s4007_s23, 512 }
 0x3f3   : > { %v3350_v61 = vld [vmem:[%s5451_s7] ss:$0 sm:$0xff]  ;;  %p4010_p0 = scmp.lt.s32.totalorder %s4008_s1, %s4002_s27 }
 0x3f5   : > { %p4011_p2 = por %p4010_p0, %p4009_p13 }
 0x3f7   : > { %p4012_p10 = pnand %p4011_p2, %p4005_p9 }
 0x453   : > { %v3883_v60 = vpop.permute.xlu1 %3882 }
 0x454   : > { %v3885_v19 = vunpack.i.h.bf16 %v3883_v60  ;;  %v3884_v10 = vunpack.i.l.bf16 %v3883_v60 }
 0x455   : > { %v3878_v25 = vpop.permute.xlu0 %3877 }
 0x456   : > { %v3880_v1 = vunpack.i.h.bf16 %v3878_v25  ;;  %v3879_v16 = vunpack.i.l.bf16 %v3878_v25  ;;  %v2811_v54 = vsel %vm908_vm3, %v2760_v2, %v3884_v10  ;;  %v2809_v32 = vsel %vm908_vm3, %v2744_v50, %v3885_v19 }
 0x457   : > { %3023 = vmatprep.mubr.f32.mxu1 %v2811_v54 }
 0x458   : > { %v2807_v29 = vsel %vm908_vm3, %v2728_v7, %v3879_v16  ;;  %v2805_v8 = vsel %vm908_vm3, %v2714_v57, %v3880_v1  ;;  %3024 = vmatmul.mubr.f32.vlgmr.msra.gmra.mxu1 %v2809_v32  ;;  %v3351_v1 = vld [vmem:[%s5453_s9] ss:$0 sm:$0xff] }
 0x459   : > { %2948 = vmatprep.mubr.f32.mxu0 %v2807_v29 }
 0x45a   : > { %2949 = vmatmul.mubr.f32.vlgmr.msra.gmra.mxu0 %v2805_v8 }
 0x45b   : > { %3759 = vmatpush3.msra.mxu0 %v3051_v43  ;;  %v3045_v43 = vld [vmem:[#allocation9 + $0x48] sm:$0xff] }
 0x45c   : > { %3760 = vmatprep.subr.mxu0 %v3050_v15 }
 0x45d   : > { %3761 = vmatpush3.msra.mxu0 %v3050_v15 }
 0x45e   : > { %3762 = vmatprep.subr.mxu0 %v3049_v31 }
 0x45f   : > { %3763 = vmatpush3.msra.mxu0 %v3049_v31 }
 0x460   : > { %3764 = vmatprep.subr.mxu0 %v3048_v9 }
 0x461   : > { %3765 = vmatpush3.msra.mxu0 %v3048_v9 }
 0x462   : > { %3766 = vmatprep.subr.mxu0 %v3047_v52 }
 0x463   : > { %v3893_v14 = vpop.permute.xlu1 %3892  ;;  %3767 = vmatpush3.msra.mxu0 %v3047_v52 }
 0x464   : > { %v3895_v37 = vunpack.i.h.bf16 %v3893_v14  ;;  %v3894_v36 = vunpack.i.l.bf16 %v3893_v14  ;;  %v3888_v27 = vpop.permute.xlu0 %3887  ;;  %3768 = vmatprep.subr.mxu0 %v3046_v23 }
 0x465   : > { %v3890_v41 = vunpack.i.h.bf16 %v3888_v27  ;;  %v3889_v42 = vunpack.i.l.bf16 %v3888_v27  ;;  %3769 = vmatpush3.msra.mxu0 %v3046_v23 }
 0x466   : > { %v2812_v45 = vsel %vm908_vm3, %v2764_v40, %v3894_v36  ;;  %v2810_v0 = vsel %vm908_vm3, %v2748_v63, %v3895_v37  ;;  %3770 = vmatprep.subr.mxu0 %v3045_v43 }
 0x467   : > { %v2808_v18 = vsel %vm908_vm3, %v2732_v34, %v3889_v42  ;;  %3028 = vmatprep.mubr.f32.mxu1 %v2812_v45  ;;  %v2806_v44 = vsel %vm908_vm3, %v2718_v56, %v3890_v41  ;;  %3771 = vmatpush3.msra.mxu0 %v3045_v43 }
 0x468   : > { %2953 = vmatprep.mubr.f32.mxu0 %v2808_v18  ;;  %3029 = vmatmul.mubr.f32.gmra.mxu1 %v2810_v0 }
 0x469   : > { %2954 = vmatmul.mubr.f32.gmra.mxu0 %v2806_v44  ;;  %3772 = vmatprep.subr.mxu0 %v3044_v17 }
 0x46a   : > { %3773 = vmatpush3.msra.mxu0 %v3044_v17 }
 0x46b   : > { %3774 = vmatprep.subr.mxu0 %v3043_v20 }
 0x46c   : > { %3775 = vmatpush3.msra.mxu0 %v3043_v20 }
 0x46d   : > { %3776 = vmatprep.subr.mxu0 %v3042_v55 }
 0x46e   : > { %3777 = vmatpush3.msra.mxu0 %v3042_v55 }
 0x46f   : > { %3778 = vmatprep.subr.mxu0 %v3041_v5 }
 0x470   : > { %3779 = vmatpush3.msra.mxu0 %v3041_v5 }
 0x471   : > { %3780 = vmatprep.subr.mxu0 %v3040_v39 }
 0x472   : > { %3781 = vmatpush3.msra.mxu0 %v3040_v39 }
 0x473   : > { %3782 = vmatprep.subr.mxu0 %v3039_v13 }
 0x474   : > { %3783 = vmatpush3.msra.mxu0 %v3039_v13 }
 0x475   : > { %3784 = vmatprep.subr.mxu0 %v3038_v21 }
 0x476   : > { %3785 = vmatpush3.msra.mxu0 %v3038_v21 }
 0x477   : > { %3786 = vmatprep.subr.mxu0 %v3037_v22 }
 0x478   : > { %3787 = vmatpush3.msra.mxu0 %v3037_v22 }
 0x479   : > { %3788 = vmatprep.subr.mxu0 %v3036_v59 }
 0x47a   : > { %3789 = vmatpush3.msra.mxu0 %v3036_v59 }
 0x518   : > { %v3542_v3 = vpop.f32.mrf.mxu1 }
 0x51a   : > { %v3504_v30 = vpop.f32.mrf.mxu0  ;;  %v3543_v11 = vpop.f32.mrf.mxu1 }
 0x51b   : > { %v3544_v51 = vadd.f32 %v3543_v11, %v3542_v3 }
 0x51c   : > { %v3505_v58 = vpop.f32.mrf.mxu0 }
 0x51d   : > { %v3506_v12 = vadd.f32 %v3505_v58, %v3504_v30 }
 0x51f   : > { %v2951_v62 = vadd.f32 %v3506_v12, %v3350_v61 }
 0x521   : > { %v3026_v53 = vadd.f32 %v3544_v51, %v2951_v62 }
 0x523   : > { %v3034_v60 = vmax.f32 %v3026_v53, 0.0 }
 0x525   : > { %3790 = vmatprep.mubr.f32.mxu0 %v3034_v60 }
 0x528   : > { %v3545_v47 = vpop.f32.mrf.mxu1 }
 0x529   : > { %v3507_v26 = vpop.f32.mrf.mxu0 }
 0x52a   : > { %v3546_v10 = vpop.f32.mrf.mxu1 }
 0x52b   : > { %v3508_v19 = vpop.f32.mrf.mxu0  ;;  %v3547_v2 = vadd.f32 %v3546_v10, %v3545_v47 }
 0x52c   : > { %v3509_v25 = vadd.f32 %v3508_v19, %v3507_v26 }
 0x52e   : > { %v2956_v38 = vadd.f32 %v3509_v25, %v3350_v61 }
 0x530   : > { %v3031_v24 = vadd.f32 %v3547_v2, %v2956_v38 }
 0x532   : > { %v3035_v50 = vmax.f32 %v3031_v24, 0.0 }
 0x534   : > { %3791 = vmatmul.mubr.f32.vlgmr.msra.gmra.mxu0 %v3035_v50 }
 0x5f4   : > { %v3792_v16 = vpop.f32.mrf.mxu0 }
 0x5f5   : > { %v3131_v7 = vadd.f32 %v3792_v16, %v3351_v1 }
 0x5f6   : > { %v3125_v57 = vpop.f32.mrf.mxu0 }
 0x5f7   : > { %3135 = vst [vmem:[%s422_s12 + $0x8] sm:$0xff] %v3131_v7  ;;  %v3126_v54 = vadd.f32 %v3351_v1, %v3125_v57 }
 0x5f9   : > { %3134 = vst [vmem:[%s422_s12] sm:$0xff] %v3126_v54 }
 0x5fa   : > { %4015 = shalt.err (!%p4012_p10)
}
 0x5fb   : > { %s4016_s6 = scalar_lea.hbm %s5401_s18, 256  ;;  %s4020_s28 = scalar_lea.hbm %s5454_s10, 512 }
 0x5fc   : > { %p4017_p6 = scmp.ne.s32.totalorder %s5401_s18, %s4016_s6  ;;  %p4021_p3 = scmp.lt.s32.totalorder %s5401_s18, %s5454_s10 }
 0x5fd   : > { %p4022_p11 = scmp.lt.s32.totalorder %s4020_s28, %s4016_s6 }
 0x5fe   : > { %p4018_p4 = pnand %p4017_p6, %p5484_p1 }
 0x5ff   : > { %p4023_p5 = por %p4022_p11, %p4021_p3 }
 0x600   : > { %p4019_p8 = pneg %p4018_p4 }
 0x602   : > { %p4024_p7 = pnand %p4023_p5, %p4019_p8 }
 0x604   : > { %4027 = shalt.err (!%p4024_p7)
}
 0x605   : > { %s4085_s30 = smov 128   ;;  %s4086_s11 = smov 8  }
 0x606   : > { %3807 = dma.vmem_to_hbm [thread:$0]  (%p5484_p1), %s5396_s19, 256, %s5401_s18, %s3137_s24, %s4085_s30, %s4085_s30, %s4086_s11  }
 0x607 PF: > { %s3165_s27 = sand.u32 1, %s4062_s13   ;;  %p5485_p12 = scmp.ne.s32.totalorder %s5465_s20, 0 }
 0x608   : > { %p5486_p9 = scmp.ge.s32.totalorder %s4074_s16, 2  ;;  %s3166_s17 = scalar_lea.sflag [#allocation5], %s3165_s27 }
 0x60a   : > { %p3824_p13 = pnand %p5486_p9, %p5485_p12 }
 0x60c   : > { %p3825_p0 = pneg %p3824_p13 }
 0x60e   : > { %4057 = dma.done.wait (%p3825_p0), %s3166_s17, 256  }
 0x60f   : > { %4059 = vsyncadd (%p3825_p0), %s3166_s17, 4294967040  ;;  %s5487_s23 = sld [smem:[#allocation16_spill]]  ;;  %p25_p2 = scmp.ge.s32.totalorder %s4231_s26, 4  }
 0x610   : > { %s5488_s13 = smov %s4066_s14  ;;  %s5489_s14 = smov %s4070_s15 }
 0x611   : > { %s5491_s16 = smov %s4231_s26  ;;  %27 = sbr.rel (!%p25_p2) target bundleno = 11 (0xb), region = 162 }
 0x615   : > { %s5490_s15 = smov %s5487_s23 }
 0x616   :  { %3171 = vsyncpa [#allocation4], 1 }
 0x617   :  { %3173 = vsyncpa [#allocation4 + $0x1], 1 }
 0x618   :  { %3174 = vsyncpa [#allocation7], 1 }
 0x619   :  { %3175 = vsyncpa [#allocation10], 1 }
 0x61a   :  { %3176 = vsyncpa [#allocation5], 1 }
 0x61b   :  { %3178 = vsyncpa [#allocation5 + $0x1], 1 }

</bundles_post_ra>
